<compile_context>
chip_gen: v7x
topology: tpu7x:2x2x1
jax: 0.10.0
libtpu: 0.0.40
codegen_flags: <defaults>
</compile_context>

<pallas_src>
import functools

import jax
import jax.numpy as jnp
from jax import lax
from jax.experimental import pallas as pl
from jax.experimental.pallas import tpu as pltpu

START_TAG = '<START>'
STOP_TAG = '<STOP>'

NEG_BIG = -1.0e9          # padding value for the padded tag dimension
_GATE_POS = (0, 1, 3, 2)  # torch gate order i,f,g,o -> grouped layout [i|f|o|g]


def _round_up(x, m):
    return ((x + m - 1) // m) * m


# ----------------------------------------------------------------------------
# The fused kernel
# ----------------------------------------------------------------------------
def _bilstm_crf_kernel(
        # inputs --------------------------------------------------------------
        xc_ref,        # (L*NW, 2*Ce)  char inputs, row t*NW+w = [fwd | rev]
        wih_c_ref,     # (2*Ce, 8*CHp) joint char input weights (128 lanes)
        whh_c_ref,     # (2*CHp, 8*CHp) joint char recurrent weights
        b_c_ref,       # (1, 8*CHp)
        last_ref,      # (NW, 1) int32: last valid char step per word (= len-1)
        we_ref,        # (T, 2*E)      [word_embeds | word_embeds reversed]
        w_we_ref,      # (2*E, 8*H)    word-embed rows of the joint word wih
        w_chf_ref,     # (2*CHp, 8*H)  char-feature rows -> fwd gate columns
        w_chr_ref,     # (2*CHp, 8*H)  char-feature rows -> rev gate columns
        whh_w_ref,     # (2*H, 8*H)
        b_w_ref,       # (1, 8*H)
        wtf_ref,       # (H, NTp) hidden2tag fwd half (tag dim padded)
        wtr_ref,       # (H, NTp) hidden2tag rev half
        bt_ref,        # (1, NTp)
        p_ref,         # (T, NW) permutation: chars_final = P @ chars_sel
        pr_ref,        # (T, NW) row-reversed P (reversed word stream)
        transT_ref,    # (NTp, NTp) transitions transposed + padded: [j,k]=tr[k,j]
        # outputs -------------------------------------------------------------
        bptrs_ref,     # (T, NTp) int32 Viterbi backpointers
        fv_ref,        # (1, NTp) f32   final Viterbi forward variable
        # scratch -------------------------------------------------------------
        xp_c, h_c, c_c, cs, xp_w, h_w, c_w, h_all, feats_sc, bp_sc,
        *, start_idx):
    f32 = jnp.float32
    NW, CH2 = h_c.shape              # n_words, 2*CHp
    L = xp_c.shape[0] // NW
    T = xp_w.shape[0]
    H2 = h_w.shape[1]                # 2*H
    H = H2 // 2
    NT = transT_ref.shape[0]         # padded tagset size

    # ---- Stage 1: char BiLSTM (fwd+rev fused; batch = NW words) --------------
    # Hoisted, lane-dense input projection for the whole char sequence.
    xp_c[...] = (jnp.dot(xc_ref[...], wih_c_ref[...],
                         preferred_element_type=f32) + b_c_ref[...])
    h_c[...] = jnp.zeros_like(h_c)
    c_c[...] = jnp.zeros_like(c_c)
    cs[...] = jnp.zeros_like(cs)     # selected per-word outputs (accumulated)
    last = last_ref[...]             # (NW, 1); words with length 0 stay zero

    def char_step(t, carry):
        row = pl.multiple_of(t * NW, NW)
        gates = xp_c[pl.ds(row, NW), :] + jnp.dot(
            h_c[...], whh_c_ref[...], preferred_element_type=f32)
        sig = jax.nn.sigmoid(gates[:, :3 * CH2])     # grouped [i | f | o]
        g_g = jnp.tanh(gates[:, 3 * CH2:])
        c_new = sig[:, CH2:2 * CH2] * c_c[...] + sig[:, :CH2] * g_g
        h_new = sig[:, 2 * CH2:3 * CH2] * jnp.tanh(c_new)
        h_c[...] = h_new
        c_c[...] = c_new
        # Accumulate each word's output at its last valid step (exactly one hit
        # per word) instead of per-step masked stores to an output ref.
        cs[...] = cs[...] + (last == t).astype(f32) * h_new
        return carry

    lax.fori_loop(0, L, char_step, 0, unroll=True)

    # ---- Stage 2: hoisted word input projection (no lane concats) ------------
    # xp_w[t] = [we(t)|we(T-1-t)] @ W_we + (P@cs) @ W_ch_f + (P_rev@cs) @ W_ch_r + b
    ch_f = jnp.dot(cs[...], w_chf_ref[...], preferred_element_type=f32)
    ch_r = jnp.dot(cs[...], w_chr_ref[...], preferred_element_type=f32)
    xp_w[...] = (jnp.dot(we_ref[...], w_we_ref[...], preferred_element_type=f32)
                 + jnp.dot(p_ref[...], ch_f, preferred_element_type=f32)
                 + jnp.dot(pr_ref[...], ch_r, preferred_element_type=f32)
                 + b_w_ref[...])

    # ---- Stage 3: word BiLSTM recurrence (B=1, fwd+rev fused) ----------------
    h_w[...] = jnp.zeros_like(h_w)
    c_w[...] = jnp.zeros_like(c_w)

    def word_step(t, carry):
        gates = xp_w[pl.ds(t, 1), :] + jnp.dot(
            h_w[...], whh_w_ref[...], preferred_element_type=f32)
        sig = jax.nn.sigmoid(gates[:, :3 * H2])
        g_g = jnp.tanh(gates[:, 3 * H2:])
        c_new = sig[:, H2:2 * H2] * c_w[...] + sig[:, :H2] * g_g
        h_new = sig[:, 2 * H2:3 * H2] * jnp.tanh(c_new)
        h_w[...] = h_new
        c_w[...] = c_new
        h_all[pl.ds(t, 1), :] = h_new     # natural step order; reversed at read
        return carry

    lax.fori_loop(0, T, word_step, 0, unroll=True)

    # ---- Stage 4: hidden2tag epilogue (reversal as a matmul, no lane concat) -
    hall = h_all[...]
    hf = hall[:, :H]
    hr = hall[:, H:]
    ra = lax.broadcasted_iota(jnp.int32, (T, T), 0)
    rb = lax.broadcasted_iota(jnp.int32, (T, T), 1)
    rev_m = (ra + rb == T - 1).astype(f32)       # time-reversal matrix
    feats_sc[...] = (jnp.dot(hf, wtf_ref[...], preferred_element_type=f32)
                     + jnp.dot(rev_m,
                               jnp.dot(hr, wtr_ref[...],
                                       preferred_element_type=f32),
                               preferred_element_type=f32)
                     + bt_ref[...])

    # ---- Stage 5: Viterbi forward recursion (bptrs + final forward var) ------
    eye = (lax.broadcasted_iota(jnp.int32, (NT, NT), 0)
           == lax.broadcasted_iota(jnp.int32, (NT, NT), 1)).astype(f32)
    ones_nn = jnp.ones((NT, NT), f32)
    idx_j = lax.broadcasted_iota(jnp.int32, (NT, NT), 0).astype(f32)  # [j,k] = j
    trans_t = transT_ref[...]
    fv0 = jnp.where(
        lax.broadcasted_iota(jnp.int32, (1, NT), 1) == start_idx,
        jnp.float32(0.0), jnp.float32(-10000.0))

    def vit_step(t, fv):
        # F[j, k] = fv[j] via a tiny matmul (avoids an in-kernel transpose).
        f_col = jnp.dot(eye * fv, ones_nn, preferred_element_type=f32)
        ntv = f_col + trans_t                      # [j,k] = fv[j] + trans[k,j]
        vv = jnp.max(ntv, axis=0, keepdims=True)   # best score into tag k
        bp = jnp.min(jnp.where(ntv == vv, idx_j, jnp.float32(NT)),
                     axis=0, keepdims=True)        # argmax_j (first max)
        bp_sc[pl.ds(t, 1), :] = bp
        return vv + feats_sc[pl.ds(t, 1), :]

    fv_final = lax.fori_loop(0, T, vit_step, fv0, unroll=True)
    fv_ref[...] = fv_final
    bptrs_ref[...] = bp_sc[...].astype(jnp.int32)


def _fused_call(xc, last, we_cat, p_mat, p_rev, trans_t, packed, start_idx):
    wc, ww = packed['char'], packed['word']
    LN = xc.shape[0]
    NW = last.shape[0]
    T = we_cat.shape[0]
    CH2, GC = wc['whh'].shape        # 2*CHp, 8*CHp
    H2, GW = ww['whh'].shape         # 2*H,   8*H
    NTp = trans_t.shape[0]
    vmem = pl.BlockSpec(memory_space=pltpu.MemorySpace.VMEM)
    kernel = functools.partial(_bilstm_crf_kernel, start_idx=start_idx)
    return pl.pallas_call(
        kernel,
        out_shape=(jax.ShapeDtypeStruct((T, NTp), jnp.int32),
                   jax.ShapeDtypeStruct((1, NTp), jnp.float32)),
        in_specs=[vmem] * 17,
        out_specs=(vmem, vmem),
        scratch_shapes=[
            pltpu.VMEM((LN, GC), jnp.float32),   # xp_c: hoisted char x-proj
            pltpu.VMEM((NW, CH2), jnp.float32),  # h_c
            pltpu.VMEM((NW, CH2), jnp.float32),  # c_c
            pltpu.VMEM((NW, CH2), jnp.float32),  # cs: selected char features
            pltpu.VMEM((T, GW), jnp.float32),    # xp_w: hoisted word x-proj
            pltpu.VMEM((1, H2), jnp.float32),    # h_w
            pltpu.VMEM((1, H2), jnp.float32),    # c_w
            pltpu.VMEM((T, H2), jnp.float32),    # h_all (word hidden states)
            pltpu.VMEM((T, NTp), jnp.float32),   # feats
            pltpu.VMEM((T, NTp), jnp.float32),   # backpointers (f32 staging)
        ],
    )(xc, wc['wih'], wc['whh'], wc['b'], last,
      we_cat, ww['w_we'], ww['w_ch_f'], ww['w_ch_r'], ww['whh'], ww['b'],
      ww['wt_f'], ww['wt_r'], ww['bt'], p_mat, p_rev, trans_t)


# ----------------------------------------------------------------------------
# Parameter initialization (shapes from BiLSTM_CRF.__init__) + joint packing
# ----------------------------------------------------------------------------
def init_params(key, vocab_size, n_chars, tag_to_ix, embedding_dim, hidden_dim,
                char_lstm_dim, char_embedding_dim):
    tagset_size = len(tag_to_ix)
    keys = jax.random.split(key, 12)
    u = lambda k, shape, s=0.1: jax.random.uniform(k, shape, jnp.float32, -s, s)

    def lstm_dir(kk, D, H):
        k1, k2, k3 = jax.random.split(kk, 3)
        return {'w_ih': u(k1, (D, 4 * H)),     # == torch weight_ih_l0.T
                'w_hh': u(k2, (H, 4 * H)),     # == torch weight_hh_l0.T
                'b': u(k3, (1, 4 * H))}        # == bias_ih + bias_hh

    params = {
        'char_embeds': u(keys[0], (n_chars, char_embedding_dim), 0.5),
        'word_embeds': u(keys[1], (vocab_size, embedding_dim), 0.5),
        'char_lstm_f': lstm_dir(keys[2], char_embedding_dim, char_lstm_dim),
        'char_lstm_r': lstm_dir(keys[3], char_embedding_dim, char_lstm_dim),
    }
    d_main = embedding_dim + 2 * char_lstm_dim
    params['lstm_f'] = lstm_dir(keys[4], d_main, hidden_dim)
    params['lstm_r'] = lstm_dir(keys[5], d_main, hidden_dim)
    params['hidden2tag_w'] = u(keys[6], (2 * hidden_dim, tagset_size))
    params['hidden2tag_b'] = u(keys[7], (1, tagset_size))
    trans = u(keys[8], (tagset_size, tagset_size), 0.5)
    trans = trans.at[tag_to_ix[START_TAG], :].set(-10000.0)
    trans = trans.at[:, tag_to_ix[STOP_TAG]].set(-10000.0)
    params['transitions'] = trans
    return params


def _pack_char(p_f, p_r, h_pad):
    """Joint fwd/rev char weights; hidden zero-padded to h_pad (8*h_pad lanes)."""
    d, h4 = p_f['w_ih'].shape
    h = h4 // 4
    g = 8 * h_pad
    wih = jnp.zeros((2 * d, g), jnp.float32)
    whh = jnp.zeros((2 * h_pad, g), jnp.float32)
    b = jnp.zeros((1, g), jnp.float32)
    for gs in range(4):
        gd = _GATE_POS[gs]
        src = slice(gs * h, (gs + 1) * h)
        fcol = slice(gd * 2 * h_pad, gd * 2 * h_pad + h)
        rcol = slice(gd * 2 * h_pad + h_pad, gd * 2 * h_pad + h_pad + h)
        wih = wih.at[:d, fcol].set(p_f['w_ih'][:, src])
        wih = wih.at[d:, rcol].set(p_r['w_ih'][:, src])
        whh = whh.at[:h, fcol].set(p_f['w_hh'][:, src])
        whh = whh.at[h_pad:h_pad + h, rcol].set(p_r['w_hh'][:, src])
        b = b.at[:, fcol].set(p_f['b'][:, src])
        b = b.at[:, rcol].set(p_r['b'][:, src])
    return {'wih': wih, 'whh': whh, 'b': b}


def _pack_word(p_f, p_r, w_tag, b_tag, emb_dim, hc, hc_pad, nt_pad):
    """Joint word weights; input rows split into word-embed / char-feature parts
    (char-feature rows expanded to the padded char layout), tag dim padded."""
    d, h4 = p_f['w_ih'].shape            # d = emb_dim + 2*hc
    h = h4 // 4
    g = 8 * h
    e = emb_dim
    w_we = jnp.zeros((2 * e, g), jnp.float32)
    w_ch_f = jnp.zeros((2 * hc_pad, g), jnp.float32)
    w_ch_r = jnp.zeros((2 * hc_pad, g), jnp.float32)
    whh = jnp.zeros((2 * h, g), jnp.float32)
    b = jnp.zeros((1, g), jnp.float32)
    for gs in range(4):
        gd = _GATE_POS[gs]
        src = slice(gs * h, (gs + 1) * h)
        fcol = slice(gd * 2 * h, gd * 2 * h + h)
        rcol = slice(gd * 2 * h + h, (gd + 1) * 2 * h)
        w_we = w_we.at[:e, fcol].set(p_f['w_ih'][:e, src])
        w_we = w_we.at[e:, rcol].set(p_r['w_ih'][:e, src])
        w_ch_f = w_ch_f.at[:hc, fcol].set(p_f['w_ih'][e:e + hc, src])
        w_ch_f = w_ch_f.at[hc_pad:hc_pad + hc, fcol].set(p_f['w_ih'][e + hc:, src])
        w_ch_r = w_ch_r.at[:hc, rcol].set(p_r['w_ih'][e:e + hc, src])
        w_ch_r = w_ch_r.at[hc_pad:hc_pad + hc, rcol].set(p_r['w_ih'][e + hc:, src])
        whh = whh.at[:h, fcol].set(p_f['w_hh'][:, src])
        whh = whh.at[h:, rcol].set(p_r['w_hh'][:, src])
        b = b.at[:, fcol].set(p_f['b'][:, src])
        b = b.at[:, rcol].set(p_r['b'][:, src])
    n_tags = w_tag.shape[1]
    wt = jnp.zeros((2 * h, nt_pad), jnp.float32).at[:, :n_tags].set(w_tag)
    bt = jnp.zeros((1, nt_pad), jnp.float32).at[:, :n_tags].set(b_tag)
    return {'w_we': w_we, 'w_ch_f': w_ch_f, 'w_ch_r': w_ch_r, 'whh': whh, 'b': b,
            'wt_f': wt[:h, :], 'wt_r': wt[h:, :], 'bt': bt}


def pack_params(params, char_lstm_dim, embedding_dim):
    hc = char_lstm_dim
    hc_pad = max(_round_up(hc, 16), 16)      # 8*hc_pad is a multiple of 128 lanes
    n_tags = params['transitions'].shape[0]
    nt_pad = _round_up(n_tags, 8)
    return {
        'char': _pack_char(params['char_lstm_f'], params['char_lstm_r'], hc_pad),
        'word': _pack_word(params['lstm_f'], params['lstm_r'],
                           params['hidden2tag_w'], params['hidden2tag_b'],
                           embedding_dim, hc, hc_pad, nt_pad),
    }


# ----------------------------------------------------------------------------
# Forward pass (_get_lstm_features + viterbi_decode)
# ----------------------------------------------------------------------------
@functools.partial(jax.jit, static_argnames=('start_idx', 'stop_idx'))
def bilstm_crf_forward(params, packed, sentence, chars2, caps, chars2_length, d,
                       *, start_idx, stop_idx):
    del caps  # n_cap=None / cap_embedding_dim=None path: caps unused
    # TODO(synk): embedding gathers and the per-word char reversal
    # (pack_padded_sequence emulation) are data-dependent indexing; kept in
    # plain JAX — there is no clean rectangular-tile Pallas form.
    chars_embeds = params['char_embeds'][chars2]              # (NW, L, Ce)
    NW, L, Ce = chars_embeds.shape

    # Reverse-direction stream: per-word reversed *valid* characters; reading the
    # rev output at step len-1 gives the backward output at original char 0.
    pos = jnp.arange(L)[None, :]
    rev_idx = jnp.clip(chars2_length[:, None] - 1 - pos, 0, L - 1)
    chars_rev = jnp.take_along_axis(chars_embeds, rev_idx[:, :, None], axis=1)
    x_f = jnp.transpose(chars_embeds, (1, 0, 2)).reshape(L * NW, Ce)
    x_r = jnp.transpose(chars_rev, (1, 0, 2)).reshape(L * NW, Ce)
    xc = jnp.concatenate([x_f, x_r], axis=-1)                 # (L*NW, 2Ce)
    # NOTE: chars2_length must be >= 1 (PyTorch pack_padded_sequence would
    # raise otherwise); length-0 words would silently get zero char features.
    last = (chars2_length - 1).astype(jnp.int32)[:, None]     # (NW, 1)

    we = params['word_embeds'][sentence]                      # (T, E)
    T = we.shape[0]
    we_cat = jnp.concatenate([we, we[::-1]], axis=-1)         # (T, 2E)

    # chars_final[d[i]] = chars_sel[i]: expressed as a matmul inside the kernel.
    p_mat = jax.nn.one_hot(d, T, dtype=jnp.float32).T         # (T, NW)
    p_rev = p_mat[::-1]

    n_tags = params['transitions'].shape[0]
    nt_pad = packed['word']['wt_f'].shape[1]
    trans_t = jnp.full((nt_pad, nt_pad), NEG_BIG, jnp.float32)
    trans_t = trans_t.at[:n_tags, :n_tags].set(params['transitions'].T)

    # nn.Dropout(0.5): identity in eval mode.
    bptrs, fv_final = _fused_call(xc, last, we_cat, p_mat, p_rev, trans_t,
                                  packed, start_idx)

    # ----- Viterbi termination + backtracking (sequential scalar gathers) -----
    # TODO(synk): backtracking is a serial scalar-gather chain; kept in JAX.
    terminal = fv_final[0, :n_tags] + params['transitions'][stop_idx]
    terminal = terminal.at[stop_idx].set(-10000.0).at[start_idx].set(-10000.0)
    best = jnp.argmax(terminal)
    path_score = terminal[best]

    def back(carry, bptr_t):
        return bptr_t[carry], carry

    start_tag, best_path = lax.scan(back, best, bptrs, reverse=True)
    return path_score, best_path, start_tag


# ----------------------------------------------------------------------------
# TODO(synk): batching several sentences per pallas_call (and a "parallel"
# grid axis for v7x megacore) needs a multi-sentence API, which the reference
# single-sentence forward() does not expose; not done here.
if __name__ == "__main__":
    key = jax.random.PRNGKey(0)

    vocab_size = 50
    n_chars = 30
    tag_to_ix = {'B': 0, 'I': 1, 'O': 2, START_TAG: 3, STOP_TAG: 4}
    embedding_dim = 16
    hidden_dim = 16
    char_lstm_dim = 8
    char_embedding_dim = 8
    seq_len = 8          # number of words
    max_char_len = 6     # chars per word (padded)

    pkey, dkey = jax.random.split(key)
    params = init_params(pkey, vocab_size, n_chars, tag_to_ix, embedding_dim,
                         hidden_dim, char_lstm_dim, char_embedding_dim)
    packed = pack_params(params, char_lstm_dim, embedding_dim)

    k1, k2, k3, k4 = jax.random.split(dkey, 4)
    sentence = jax.random.randint(k1, (seq_len,), 0, vocab_size)
    # char sequences sorted by descending length (pack_padded_sequence
    # convention); d maps sorted index -> original word index
    chars2_length = jnp.sort(
        jax.random.randint(k2, (seq_len,), 1, max_char_len + 1))[::-1]
    chars2 = jax.random.randint(k3, (seq_len, max_char_len), 0, n_chars)
    chars2 = jnp.where(
        jnp.arange(max_char_len)[None, :] < chars2_length[:, None], chars2, 0)
    d = jax.random.permutation(k4, seq_len)
    caps = jnp.zeros((seq_len,), jnp.int32)   # unused (n_cap=None)

    score, path, start_tag = bilstm_crf_forward(
        params, packed, sentence, chars2, caps, chars2_length, d,
        start_idx=tag_to_ix[START_TAG], stop_idx=tag_to_ix[STOP_TAG])
    jax.block_until_ready((score, path, start_tag))

    assert int(start_tag) == tag_to_ix[START_TAG]
    assert path.shape == (seq_len,)
    assert jnp.isfinite(score)
    assert int(jnp.max(path)) < len(tag_to_ix)
    print("KERNEL_OK")
</pallas_src>

<mosaic_0001>
module attributes {stable_mosaic.version = 11 : i64} {
  func.func @_bilstm_crf_kernel(%arg0: memref<48x16xf32, #tpu.memory_space<vmem>>, %arg1: memref<16x128xf32, #tpu.memory_space<vmem>>, %arg2: memref<32x128xf32, #tpu.memory_space<vmem>>, %arg3: memref<1x128xf32, #tpu.memory_space<vmem>>, %arg4: memref<8x1xi32, #tpu.memory_space<vmem>>, %arg5: memref<8x32xf32, #tpu.memory_space<vmem>>, %arg6: memref<32x128xf32, #tpu.memory_space<vmem>>, %arg7: memref<32x128xf32, #tpu.memory_space<vmem>>, %arg8: memref<32x128xf32, #tpu.memory_space<vmem>>, %arg9: memref<32x128xf32, #tpu.memory_space<vmem>>, %arg10: memref<1x128xf32, #tpu.memory_space<vmem>>, %arg11: memref<16x8xf32, #tpu.memory_space<vmem>>, %arg12: memref<16x8xf32, #tpu.memory_space<vmem>>, %arg13: memref<1x8xf32, #tpu.memory_space<vmem>>, %arg14: memref<8x8xf32, #tpu.memory_space<vmem>>, %arg15: memref<8x8xf32, #tpu.memory_space<vmem>>, %arg16: memref<8x8xf32, #tpu.memory_space<vmem>>, %arg17: memref<8x8xi32, #tpu.memory_space<vmem>>, %arg18: memref<1x8xf32, #tpu.memory_space<vmem>>, %arg19: memref<48x128xf32, #tpu.memory_space<vmem>>, %arg20: memref<8x32xf32, #tpu.memory_space<vmem>>, %arg21: memref<8x32xf32, #tpu.memory_space<vmem>>, %arg22: memref<8x32xf32, #tpu.memory_space<vmem>>, %arg23: memref<8x128xf32, #tpu.memory_space<vmem>>, %arg24: memref<1x32xf32, #tpu.memory_space<vmem>>, %arg25: memref<1x32xf32, #tpu.memory_space<vmem>>, %arg26: memref<8x32xf32, #tpu.memory_space<vmem>>, %arg27: memref<8x8xf32, #tpu.memory_space<vmem>>, %arg28: memref<8x8xf32, #tpu.memory_space<vmem>>) attributes {dimension_semantics = [], scalar_prefetch = 0 : i64, scratch_operands = 10 : i64, tpu.core_type = #tpu.core_type<tc>} {
    %c0 = arith.constant 0 : index
    %c0_0 = arith.constant 0 : index
    %0 = vector.load %arg0[%c0, %c0_0] : memref<48x16xf32, #tpu.memory_space<vmem>>, vector<48x16xf32>
    %c0_1 = arith.constant 0 : index
    %c0_2 = arith.constant 0 : index
    %1 = vector.load %arg1[%c0_1, %c0_2] : memref<16x128xf32, #tpu.memory_space<vmem>>, vector<16x128xf32>
    %cst = arith.constant dense<0.000000e+00> : vector<48x128xf32>
    %2 = tpu.matmul %0, %1, %cst {dimension_numbers = #tpu.dot_dimension_numbers<[1], [0], [0], [1], [0, 0, 1, 1], [], []>} : vector<48x16xf32>, vector<16x128xf32>, vector<48x128xf32> -> vector<48x128xf32>
    %c0_3 = arith.constant 0 : index
    %c0_4 = arith.constant 0 : index
    %3 = vector.load %arg3[%c0_3, %c0_4] : memref<1x128xf32, #tpu.memory_space<vmem>>, vector<1x128xf32>
    %4 = vector.broadcast %3 : vector<1x128xf32> to vector<48x128xf32>
    %5 = arith.addf %2, %4 : vector<48x128xf32>
    %c0_5 = arith.constant 0 : index
    %c0_6 = arith.constant 0 : index
    %6 = vector.load %arg19[%c0_5, %c0_6] : memref<48x128xf32, #tpu.memory_space<vmem>>, vector<48x128xf32>
    tpu.vector_store %arg19[%c0_5, %c0_6], %5 {strides = array<i32>} : memref<48x128xf32, #tpu.memory_space<vmem>>, vector<48x128xf32>,
    %cst_7 = arith.constant 0.000000e+00 : f32
    %7 = vector.broadcast %cst_7 : f32 to vector<8x32xf32>
    %c0_8 = arith.constant 0 : index
    %c0_9 = arith.constant 0 : index
    %8 = vector.load %arg20[%c0_8, %c0_9] : memref<8x32xf32, #tpu.memory_space<vmem>>, vector<8x32xf32>
    tpu.vector_store %arg20[%c0_8, %c0_9], %7 {strides = array<i32>} : memref<8x32xf32, #tpu.memory_space<vmem>>, vector<8x32xf32>,
    %cst_10 = arith.constant 0.000000e+00 : f32
    %9 = vector.broadcast %cst_10 : f32 to vector<8x32xf32>
    %c0_11 = arith.constant 0 : index
    %c0_12 = arith.constant 0 : index
    %10 = vector.load %arg21[%c0_11, %c0_12] : memref<8x32xf32, #tpu.memory_space<vmem>>, vector<8x32xf32>
    tpu.vector_store %arg21[%c0_11, %c0_12], %9 {strides = array<i32>} : memref<8x32xf32, #tpu.memory_space<vmem>>, vector<8x32xf32>,
    %cst_13 = arith.constant 0.000000e+00 : f32
    %11 = vector.broadcast %cst_13 : f32 to vector<8x32xf32>
    %c0_14 = arith.constant 0 : index
    %c0_15 = arith.constant 0 : index
    %12 = vector.load %arg22[%c0_14, %c0_15] : memref<8x32xf32, #tpu.memory_space<vmem>>, vector<8x32xf32>
    tpu.vector_store %arg22[%c0_14, %c0_15], %11 {strides = array<i32>} : memref<8x32xf32, #tpu.memory_space<vmem>>, vector<8x32xf32>,
    %c0_16 = arith.constant 0 : index
    %c0_17 = arith.constant 0 : index
    %13 = vector.load %arg4[%c0_16, %c0_17] : memref<8x1xi32, #tpu.memory_space<vmem>>, vector<8x1xi32>
    %c0_i32 = arith.constant 0 : i32
    %c8_i32 = arith.constant 8 : i32
    %14 = arith.muli %c0_i32, %c8_i32 : i32
    %15 = tpu.assume_multiple %14, 8 : i32
    %16 = arith.index_cast %15 : i32 to index
    %c0_18 = arith.constant 0 : index
    %17 = vector.load %arg19[%16, %c0_18] : memref<48x128xf32, #tpu.memory_space<vmem>>, vector<8x128xf32>
    %c0_19 = arith.constant 0 : index
    %c0_20 = arith.constant 0 : index
    %18 = vector.load %arg20[%c0_19, %c0_20] : memref<8x32xf32, #tpu.memory_space<vmem>>, vector<8x32xf32>
    %c0_21 = arith.constant 0 : index
    %c0_22 = arith.constant 0 : index
    %19 = vector.load %arg2[%c0_21, %c0_22] : memref<32x128xf32, #tpu.memory_space<vmem>>, vector<32x128xf32>
    %cst_23 = arith.constant dense<0.000000e+00> : vector<8x128xf32>
    %20 = tpu.matmul %18, %19, %cst_23 {dimension_numbers = #tpu.dot_dimension_numbers<[1], [0], [0], [1], [0, 0, 1, 1], [], []>} : vector<8x32xf32>, vector<32x128xf32>, vector<8x128xf32> -> vector<8x128xf32>
    %21 = arith.addf %17, %20 : vector<8x128xf32>
    %22 = vector.extract_strided_slice %21 {offsets = [0, 0], sizes = [8, 96], strides = [1, 1]} : vector<8x128xf32> to vector<8x96xf32>
    %23 = arith.negf %22 : vector<8x96xf32>
    %24 = math.exp %23 : vector<8x96xf32>
    %cst_24 = arith.constant 1.000000e+00 : f32
    %25 = vector.broadcast %cst_24 : f32 to vector<8x96xf32>
    %26 = arith.addf %25, %24 : vector<8x96xf32>
    %27 = arith.divf %25, %26 : vector<8x96xf32>
    %28 = vector.extract_strided_slice %21 {offsets = [0, 96], sizes = [8, 32], strides = [1, 1]} : vector<8x128xf32> to vector<8x32xf32>
    %29 = math.tanh %28 : vector<8x32xf32>
    %30 = vector.extract_strided_slice %27 {offsets = [0, 32], sizes = [8, 32], strides = [1, 1]} : vector<8x96xf32> to vector<8x32xf32>
    %c0_25 = arith.constant 0 : index
    %c0_26 = arith.constant 0 : index
    %31 = vector.load %arg21[%c0_25, %c0_26] : memref<8x32xf32, #tpu.memory_space<vmem>>, vector<8x32xf32>
    %32 = arith.mulf %30, %31 : vector<8x32xf32>
    %33 = vector.extract_strided_slice %27 {offsets = [0, 0], sizes = [8, 32], strides = [1, 1]} : vector<8x96xf32> to vector<8x32xf32>
    %34 = arith.mulf %33, %29 : vector<8x32xf32>
    %35 = arith.addf %32, %34 : vector<8x32xf32>
    %36 = vector.extract_strided_slice %27 {offsets = [0, 64], sizes = [8, 32], strides = [1, 1]} : vector<8x96xf32> to vector<8x32xf32>
    %37 = math.tanh %35 : vector<8x32xf32>
    %38 = arith.mulf %36, %37 : vector<8x32xf32>
    %c0_27 = arith.constant 0 : index
    %c0_28 = arith.constant 0 : index
    %39 = vector.load %arg20[%c0_27, %c0_28] : memref<8x32xf32, #tpu.memory_space<vmem>>, vector<8x32xf32>
    tpu.vector_store %arg20[%c0_27, %c0_28], %38 {strides = array<i32>} : memref<8x32xf32, #tpu.memory_space<vmem>>, vector<8x32xf32>,
    %c0_29 = arith.constant 0 : index
    %c0_30 = arith.constant 0 : index
    %40 = vector.load %arg21[%c0_29, %c0_30] : memref<8x32xf32, #tpu.memory_space<vmem>>, vector<8x32xf32>
    tpu.vector_store %arg21[%c0_29, %c0_30], %35 {strides = array<i32>} : memref<8x32xf32, #tpu.memory_space<vmem>>, vector<8x32xf32>,
    %c0_31 = arith.constant 0 : index
    %c0_32 = arith.constant 0 : index
    %41 = vector.load %arg22[%c0_31, %c0_32] : memref<8x32xf32, #tpu.memory_space<vmem>>, vector<8x32xf32>
    %42 = vector.broadcast %c0_i32 : i32 to vector<8x1xi32>
    %43 = arith.cmpi eq, %13, %42 : vector<8x1xi32>
    %44 = arith.extui %43 : vector<8x1xi1> to vector<8x1xi32>
    %45 = arith.sitofp %44 : vector<8x1xi32> to vector<8x1xf32>
    %46 = vector.broadcast %45 : vector<8x1xf32> to vector<8x32xf32>
    %47 = arith.mulf %46, %38 : vector<8x32xf32>
    %48 = arith.addf %41, %47 : vector<8x32xf32>
    %c0_33 = arith.constant 0 : index
    %c0_34 = arith.constant 0 : index
    %49 = vector.load %arg22[%c0_33, %c0_34] : memref<8x32xf32, #tpu.memory_space<vmem>>, vector<8x32xf32>
    tpu.vector_store %arg22[%c0_33, %c0_34], %48 {strides = array<i32>} : memref<8x32xf32, #tpu.memory_space<vmem>>, vector<8x32xf32>,
    %c1_i32 = arith.constant 1 : i32
    %c8_i32_35 = arith.constant 8 : i32
    %50 = arith.muli %c1_i32, %c8_i32_35 : i32
    %51 = tpu.assume_multiple %50, 8 : i32
    %52 = arith.index_cast %51 : i32 to index
    %c0_36 = arith.constant 0 : index
    %53 = vector.load %arg19[%52, %c0_36] : memref<48x128xf32, #tpu.memory_space<vmem>>, vector<8x128xf32>
    %c0_37 = arith.constant 0 : index
    %c0_38 = arith.constant 0 : index
    %54 = vector.load %arg20[%c0_37, %c0_38] : memref<8x32xf32, #tpu.memory_space<vmem>>, vector<8x32xf32>
    %c0_39 = arith.constant 0 : index
    %c0_40 = arith.constant 0 : index
    %55 = vector.load %arg2[%c0_39, %c0_40] : memref<32x128xf32, #tpu.memory_space<vmem>>, vector<32x128xf32>
    %cst_41 = arith.constant dense<0.000000e+00> : vector<8x128xf32>
    %56 = tpu.matmul %54, %55, %cst_41 {dimension_numbers = #tpu.dot_dimension_numbers<[1], [0], [0], [1], [0, 0, 1, 1], [], []>} : vector<8x32xf32>, vector<32x128xf32>, vector<8x128xf32> -> vector<8x128xf32>
    %57 = arith.addf %53, %56 : vector<8x128xf32>
    %58 = vector.extract_strided_slice %57 {offsets = [0, 0], sizes = [8, 96], strides = [1, 1]} : vector<8x128xf32> to vector<8x96xf32>
    %59 = arith.negf %58 : vector<8x96xf32>
    %60 = math.exp %59 : vector<8x96xf32>
    %cst_42 = arith.constant 1.000000e+00 : f32
    %61 = vector.broadcast %cst_42 : f32 to vector<8x96xf32>
    %62 = arith.addf %61, %60 : vector<8x96xf32>
    %63 = arith.divf %61, %62 : vector<8x96xf32>
    %64 = vector.extract_strided_slice %57 {offsets = [0, 96], sizes = [8, 32], strides = [1, 1]} : vector<8x128xf32> to vector<8x32xf32>
    %65 = math.tanh %64 : vector<8x32xf32>
    %66 = vector.extract_strided_slice %63 {offsets = [0, 32], sizes = [8, 32], strides = [1, 1]} : vector<8x96xf32> to vector<8x32xf32>
    %c0_43 = arith.constant 0 : index
    %c0_44 = arith.constant 0 : index
    %67 = vector.load %arg21[%c0_43, %c0_44] : memref<8x32xf32, #tpu.memory_space<vmem>>, vector<8x32xf32>
    %68 = arith.mulf %66, %67 : vector<8x32xf32>
    %69 = vector.extract_strided_slice %63 {offsets = [0, 0], sizes = [8, 32], strides = [1, 1]} : vector<8x96xf32> to vector<8x32xf32>
    %70 = arith.mulf %69, %65 : vector<8x32xf32>
    %71 = arith.addf %68, %70 : vector<8x32xf32>
    %72 = vector.extract_strided_slice %63 {offsets = [0, 64], sizes = [8, 32], strides = [1, 1]} : vector<8x96xf32> to vector<8x32xf32>
    %73 = math.tanh %71 : vector<8x32xf32>
    %74 = arith.mulf %72, %73 : vector<8x32xf32>
    %c0_45 = arith.constant 0 : index
    %c0_46 = arith.constant 0 : index
    %75 = vector.load %arg20[%c0_45, %c0_46] : memref<8x32xf32, #tpu.memory_space<vmem>>, vector<8x32xf32>
    tpu.vector_store %arg20[%c0_45, %c0_46], %74 {strides = array<i32>} : memref<8x32xf32, #tpu.memory_space<vmem>>, vector<8x32xf32>,
    %c0_47 = arith.constant 0 : index
    %c0_48 = arith.constant 0 : index
    %76 = vector.load %arg21[%c0_47, %c0_48] : memref<8x32xf32, #tpu.memory_space<vmem>>, vector<8x32xf32>
    tpu.vector_store %arg21[%c0_47, %c0_48], %71 {strides = array<i32>} : memref<8x32xf32, #tpu.memory_space<vmem>>, vector<8x32xf32>,
    %c0_49 = arith.constant 0 : index
    %c0_50 = arith.constant 0 : index
    %77 = vector.load %arg22[%c0_49, %c0_50] : memref<8x32xf32, #tpu.memory_space<vmem>>, vector<8x32xf32>
    %78 = vector.broadcast %c1_i32 : i32 to vector<8x1xi32>
    %79 = arith.cmpi eq, %13, %78 : vector<8x1xi32>
    %80 = arith.extui %79 : vector<8x1xi1> to vector<8x1xi32>
    %81 = arith.sitofp %80 : vector<8x1xi32> to vector<8x1xf32>
    %82 = vector.broadcast %81 : vector<8x1xf32> to vector<8x32xf32>
    %83 = arith.mulf %82, %74 : vector<8x32xf32>
    %84 = arith.addf %77, %83 : vector<8x32xf32>
    %c0_51 = arith.constant 0 : index
    %c0_52 = arith.constant 0 : index
    %85 = vector.load %arg22[%c0_51, %c0_52] : memref<8x32xf32, #tpu.memory_space<vmem>>, vector<8x32xf32>
    tpu.vector_store %arg22[%c0_51, %c0_52], %84 {strides = array<i32>} : memref<8x32xf32, #tpu.memory_space<vmem>>, vector<8x32xf32>,
    %c2_i32 = arith.constant 2 : i32
    %c8_i32_53 = arith.constant 8 : i32
    %86 = arith.muli %c2_i32, %c8_i32_53 : i32
    %87 = tpu.assume_multiple %86, 8 : i32
    %88 = arith.index_cast %87 : i32 to index
    %c0_54 = arith.constant 0 : index
    %89 = vector.load %arg19[%88, %c0_54] : memref<48x128xf32, #tpu.memory_space<vmem>>, vector<8x128xf32>
    %c0_55 = arith.constant 0 : index
    %c0_56 = arith.constant 0 : index
    %90 = vector.load %arg20[%c0_55, %c0_56] : memref<8x32xf32, #tpu.memory_space<vmem>>, vector<8x32xf32>
    %c0_57 = arith.constant 0 : index
    %c0_58 = arith.constant 0 : index
    %91 = vector.load %arg2[%c0_57, %c0_58] : memref<32x128xf32, #tpu.memory_space<vmem>>, vector<32x128xf32>
    %cst_59 = arith.constant dense<0.000000e+00> : vector<8x128xf32>
    %92 = tpu.matmul %90, %91, %cst_59 {dimension_numbers = #tpu.dot_dimension_numbers<[1], [0], [0], [1], [0, 0, 1, 1], [], []>} : vector<8x32xf32>, vector<32x128xf32>, vector<8x128xf32> -> vector<8x128xf32>
    %93 = arith.addf %89, %92 : vector<8x128xf32>
    %94 = vector.extract_strided_slice %93 {offsets = [0, 0], sizes = [8, 96], strides = [1, 1]} : vector<8x128xf32> to vector<8x96xf32>
    %95 = arith.negf %94 : vector<8x96xf32>
    %96 = math.exp %95 : vector<8x96xf32>
    %cst_60 = arith.constant 1.000000e+00 : f32
    %97 = vector.broadcast %cst_60 : f32 to vector<8x96xf32>
    %98 = arith.addf %97, %96 : vector<8x96xf32>
    %99 = arith.divf %97, %98 : vector<8x96xf32>
    %100 = vector.extract_strided_slice %93 {offsets = [0, 96], sizes = [8, 32], strides = [1, 1]} : vector<8x128xf32> to vector<8x32xf32>
    %101 = math.tanh %100 : vector<8x32xf32>
    %102 = vector.extract_strided_slice %99 {offsets = [0, 32], sizes = [8, 32], strides = [1, 1]} : vector<8x96xf32> to vector<8x32xf32>
    %c0_61 = arith.constant 0 : index
    %c0_62 = arith.constant 0 : index
    %103 = vector.load %arg21[%c0_61, %c0_62] : memref<8x32xf32, #tpu.memory_space<vmem>>, vector<8x32xf32>
    %104 = arith.mulf %102, %103 : vector<8x32xf32>
    %105 = vector.extract_strided_slice %99 {offsets = [0, 0], sizes = [8, 32], strides = [1, 1]} : vector<8x96xf32> to vector<8x32xf32>
    %106 = arith.mulf %105, %101 : vector<8x32xf32>
    %107 = arith.addf %104, %106 : vector<8x32xf32>
    %108 = vector.extract_strided_slice %99 {offsets = [0, 64], sizes = [8, 32], strides = [1, 1]} : vector<8x96xf32> to vector<8x32xf32>
    %109 = math.tanh %107 : vector<8x32xf32>
    %110 = arith.mulf %108, %109 : vector<8x32xf32>
    %c0_63 = arith.constant 0 : index
    %c0_64 = arith.constant 0 : index
    %111 = vector.load %arg20[%c0_63, %c0_64] : memref<8x32xf32, #tpu.memory_space<vmem>>, vector<8x32xf32>
    tpu.vector_store %arg20[%c0_63, %c0_64], %110 {strides = array<i32>} : memref<8x32xf32, #tpu.memory_space<vmem>>, vector<8x32xf32>,
    %c0_65 = arith.constant 0 : index
    %c0_66 = arith.constant 0 : index
    %112 = vector.load %arg21[%c0_65, %c0_66] : memref<8x32xf32, #tpu.memory_space<vmem>>, vector<8x32xf32>
    tpu.vector_store %arg21[%c0_65, %c0_66], %107 {strides = array<i32>} : memref<8x32xf32, #tpu.memory_space<vmem>>, vector<8x32xf32>,
    %c0_67 = arith.constant 0 : index
    %c0_68 = arith.constant 0 : index
    %113 = vector.load %arg22[%c0_67, %c0_68] : memref<8x32xf32, #tpu.memory_space<vmem>>, vector<8x32xf32>
    %114 = vector.broadcast %c2_i32 : i32 to vector<8x1xi32>
    %115 = arith.cmpi eq, %13, %114 : vector<8x1xi32>
    %116 = arith.extui %115 : vector<8x1xi1> to vector<8x1xi32>
    %117 = arith.sitofp %116 : vector<8x1xi32> to vector<8x1xf32>
    %118 = vector.broadcast %117 : vector<8x1xf32> to vector<8x32xf32>
    %119 = arith.mulf %118, %110 : vector<8x32xf32>
    %120 = arith.addf %113, %119 : vector<8x32xf32>
    %c0_69 = arith.constant 0 : index
    %c0_70 = arith.constant 0 : index
    %121 = vector.load %arg22[%c0_69, %c0_70] : memref<8x32xf32, #tpu.memory_space<vmem>>, vector<8x32xf32>
    tpu.vector_store %arg22[%c0_69, %c0_70], %120 {strides = array<i32>} : memref<8x32xf32, #tpu.memory_space<vmem>>, vector<8x32xf32>,
    %c3_i32 = arith.constant 3 : i32
    %c8_i32_71 = arith.constant 8 : i32
    %122 = arith.muli %c3_i32, %c8_i32_71 : i32
    %123 = tpu.assume_multiple %122, 8 : i32
    %124 = arith.index_cast %123 : i32 to index
    %c0_72 = arith.constant 0 : index
    %125 = vector.load %arg19[%124, %c0_72] : memref<48x128xf32, #tpu.memory_space<vmem>>, vector<8x128xf32>
    %c0_73 = arith.constant 0 : index
    %c0_74 = arith.constant 0 : index
    %126 = vector.load %arg20[%c0_73, %c0_74] : memref<8x32xf32, #tpu.memory_space<vmem>>, vector<8x32xf32>
    %c0_75 = arith.constant 0 : index
    %c0_76 = arith.constant 0 : index
    %127 = vector.load %arg2[%c0_75, %c0_76] : memref<32x128xf32, #tpu.memory_space<vmem>>, vector<32x128xf32>
    %cst_77 = arith.constant dense<0.000000e+00> : vector<8x128xf32>
    %128 = tpu.matmul %126, %127, %cst_77 {dimension_numbers = #tpu.dot_dimension_numbers<[1], [0], [0], [1], [0, 0, 1, 1], [], []>} : vector<8x32xf32>, vector<32x128xf32>, vector<8x128xf32> -> vector<8x128xf32>
    %129 = arith.addf %125, %128 : vector<8x128xf32>
    %130 = vector.extract_strided_slice %129 {offsets = [0, 0], sizes = [8, 96], strides = [1, 1]} : vector<8x128xf32> to vector<8x96xf32>
    %131 = arith.negf %130 : vector<8x96xf32>
    %132 = math.exp %131 : vector<8x96xf32>
    %cst_78 = arith.constant 1.000000e+00 : f32
    %133 = vector.broadcast %cst_78 : f32 to vector<8x96xf32>
    %134 = arith.addf %133, %132 : vector<8x96xf32>
    %135 = arith.divf %133, %134 : vector<8x96xf32>
    %136 = vector.extract_strided_slice %129 {offsets = [0, 96], sizes = [8, 32], strides = [1, 1]} : vector<8x128xf32> to vector<8x32xf32>
    %137 = math.tanh %136 : vector<8x32xf32>
    %138 = vector.extract_strided_slice %135 {offsets = [0, 32], sizes = [8, 32], strides = [1, 1]} : vector<8x96xf32> to vector<8x32xf32>
    %c0_79 = arith.constant 0 : index
    %c0_80 = arith.constant 0 : index
    %139 = vector.load %arg21[%c0_79, %c0_80] : memref<8x32xf32, #tpu.memory_space<vmem>>, vector<8x32xf32>
    %140 = arith.mulf %138, %139 : vector<8x32xf32>
    %141 = vector.extract_strided_slice %135 {offsets = [0, 0], sizes = [8, 32], strides = [1, 1]} : vector<8x96xf32> to vector<8x32xf32>
    %142 = arith.mulf %141, %137 : vector<8x32xf32>
    %143 = arith.addf %140, %142 : vector<8x32xf32>
    %144 = vector.extract_strided_slice %135 {offsets = [0, 64], sizes = [8, 32], strides = [1, 1]} : vector<8x96xf32> to vector<8x32xf32>
    %145 = math.tanh %143 : vector<8x32xf32>
    %146 = arith.mulf %144, %145 : vector<8x32xf32>
    %c0_81 = arith.constant 0 : index
    %c0_82 = arith.constant 0 : index
    %147 = vector.load %arg20[%c0_81, %c0_82] : memref<8x32xf32, #tpu.memory_space<vmem>>, vector<8x32xf32>
    tpu.vector_store %arg20[%c0_81, %c0_82], %146 {strides = array<i32>} : memref<8x32xf32, #tpu.memory_space<vmem>>, vector<8x32xf32>,
    %c0_83 = arith.constant 0 : index
    %c0_84 = arith.constant 0 : index
    %148 = vector.load %arg21[%c0_83, %c0_84] : memref<8x32xf32, #tpu.memory_space<vmem>>, vector<8x32xf32>
    tpu.vector_store %arg21[%c0_83, %c0_84], %143 {strides = array<i32>} : memref<8x32xf32, #tpu.memory_space<vmem>>, vector<8x32xf32>,
    %c0_85 = arith.constant 0 : index
    %c0_86 = arith.constant 0 : index
    %149 = vector.load %arg22[%c0_85, %c0_86] : memref<8x32xf32, #tpu.memory_space<vmem>>, vector<8x32xf32>
    %150 = vector.broadcast %c3_i32 : i32 to vector<8x1xi32>
    %151 = arith.cmpi eq, %13, %150 : vector<8x1xi32>
    %152 = arith.extui %151 : vector<8x1xi1> to vector<8x1xi32>
    %153 = arith.sitofp %152 : vector<8x1xi32> to vector<8x1xf32>
    %154 = vector.broadcast %153 : vector<8x1xf32> to vector<8x32xf32>
    %155 = arith.mulf %154, %146 : vector<8x32xf32>
    %156 = arith.addf %149, %155 : vector<8x32xf32>
    %c0_87 = arith.constant 0 : index
    %c0_88 = arith.constant 0 : index
    %157 = vector.load %arg22[%c0_87, %c0_88] : memref<8x32xf32, #tpu.memory_space<vmem>>, vector<8x32xf32>
    tpu.vector_store %arg22[%c0_87, %c0_88], %156 {strides = array<i32>} : memref<8x32xf32, #tpu.memory_space<vmem>>, vector<8x32xf32>,
    %c4_i32 = arith.constant 4 : i32
    %c8_i32_89 = arith.constant 8 : i32
    %158 = arith.muli %c4_i32, %c8_i32_89 : i32
    %159 = tpu.assume_multiple %158, 8 : i32
    %160 = arith.index_cast %159 : i32 to index
    %c0_90 = arith.constant 0 : index
    %161 = vector.load %arg19[%160, %c0_90] : memref<48x128xf32, #tpu.memory_space<vmem>>, vector<8x128xf32>
    %c0_91 = arith.constant 0 : index
    %c0_92 = arith.constant 0 : index
    %162 = vector.load %arg20[%c0_91, %c0_92] : memref<8x32xf32, #tpu.memory_space<vmem>>, vector<8x32xf32>
    %c0_93 = arith.constant 0 : index
    %c0_94 = arith.constant 0 : index
    %163 = vector.load %arg2[%c0_93, %c0_94] : memref<32x128xf32, #tpu.memory_space<vmem>>, vector<32x128xf32>
    %cst_95 = arith.constant dense<0.000000e+00> : vector<8x128xf32>
    %164 = tpu.matmul %162, %163, %cst_95 {dimension_numbers = #tpu.dot_dimension_numbers<[1], [0], [0], [1], [0, 0, 1, 1], [], []>} : vector<8x32xf32>, vector<32x128xf32>, vector<8x128xf32> -> vector<8x128xf32>
    %165 = arith.addf %161, %164 : vector<8x128xf32>
    %166 = vector.extract_strided_slice %165 {offsets = [0, 0], sizes = [8, 96], strides = [1, 1]} : vector<8x128xf32> to vector<8x96xf32>
    %167 = arith.negf %166 : vector<8x96xf32>
    %168 = math.exp %167 : vector<8x96xf32>
    %cst_96 = arith.constant 1.000000e+00 : f32
    %169 = vector.broadcast %cst_96 : f32 to vector<8x96xf32>
    %170 = arith.addf %169, %168 : vector<8x96xf32>
    %171 = arith.divf %169, %170 : vector<8x96xf32>
    %172 = vector.extract_strided_slice %165 {offsets = [0, 96], sizes = [8, 32], strides = [1, 1]} : vector<8x128xf32> to vector<8x32xf32>
    %173 = math.tanh %172 : vector<8x32xf32>
    %174 = vector.extract_strided_slice %171 {offsets = [0, 32], sizes = [8, 32], strides = [1, 1]} : vector<8x96xf32> to vector<8x32xf32>
    %c0_97 = arith.constant 0 : index
    %c0_98 = arith.constant 0 : index
    %175 = vector.load %arg21[%c0_97, %c0_98] : memref<8x32xf32, #tpu.memory_space<vmem>>, vector<8x32xf32>
    %176 = arith.mulf %174, %175 : vector<8x32xf32>
    %177 = vector.extract_strided_slice %171 {offsets = [0, 0], sizes = [8, 32], strides = [1, 1]} : vector<8x96xf32> to vector<8x32xf32>
    %178 = arith.mulf %177, %173 : vector<8x32xf32>
    %179 = arith.addf %176, %178 : vector<8x32xf32>
    %180 = vector.extract_strided_slice %171 {offsets = [0, 64], sizes = [8, 32], strides = [1, 1]} : vector<8x96xf32> to vector<8x32xf32>
    %181 = math.tanh %179 : vector<8x32xf32>
    %182 = arith.mulf %180, %181 : vector<8x32xf32>
    %c0_99 = arith.constant 0 : index
    %c0_100 = arith.constant 0 : index
    %183 = vector.load %arg20[%c0_99, %c0_100] : memref<8x32xf32, #tpu.memory_space<vmem>>, vector<8x32xf32>
    tpu.vector_store %arg20[%c0_99, %c0_100], %182 {strides = array<i32>} : memref<8x32xf32, #tpu.memory_space<vmem>>, vector<8x32xf32>,
    %c0_101 = arith.constant 0 : index
    %c0_102 = arith.constant 0 : index
    %184 = vector.load %arg21[%c0_101, %c0_102] : memref<8x32xf32, #tpu.memory_space<vmem>>, vector<8x32xf32>
    tpu.vector_store %arg21[%c0_101, %c0_102], %179 {strides = array<i32>} : memref<8x32xf32, #tpu.memory_space<vmem>>, vector<8x32xf32>,
    %c0_103 = arith.constant 0 : index
    %c0_104 = arith.constant 0 : index
    %185 = vector.load %arg22[%c0_103, %c0_104] : memref<8x32xf32, #tpu.memory_space<vmem>>, vector<8x32xf32>
    %186 = vector.broadcast %c4_i32 : i32 to vector<8x1xi32>
    %187 = arith.cmpi eq, %13, %186 : vector<8x1xi32>
    %188 = arith.extui %187 : vector<8x1xi1> to vector<8x1xi32>
    %189 = arith.sitofp %188 : vector<8x1xi32> to vector<8x1xf32>
    %190 = vector.broadcast %189 : vector<8x1xf32> to vector<8x32xf32>
    %191 = arith.mulf %190, %182 : vector<8x32xf32>
    %192 = arith.addf %185, %191 : vector<8x32xf32>
    %c0_105 = arith.constant 0 : index
    %c0_106 = arith.constant 0 : index
    %193 = vector.load %arg22[%c0_105, %c0_106] : memref<8x32xf32, #tpu.memory_space<vmem>>, vector<8x32xf32>
    tpu.vector_store %arg22[%c0_105, %c0_106], %192 {strides = array<i32>} : memref<8x32xf32, #tpu.memory_space<vmem>>, vector<8x32xf32>,
    %c5_i32 = arith.constant 5 : i32
    %c8_i32_107 = arith.constant 8 : i32
    %194 = arith.muli %c5_i32, %c8_i32_107 : i32
    %195 = tpu.assume_multiple %194, 8 : i32
    %196 = arith.index_cast %195 : i32 to index
    %c0_108 = arith.constant 0 : index
    %197 = vector.load %arg19[%196, %c0_108] : memref<48x128xf32, #tpu.memory_space<vmem>>, vector<8x128xf32>
    %c0_109 = arith.constant 0 : index
    %c0_110 = arith.constant 0 : index
    %198 = vector.load %arg20[%c0_109, %c0_110] : memref<8x32xf32, #tpu.memory_space<vmem>>, vector<8x32xf32>
    %c0_111 = arith.constant 0 : index
    %c0_112 = arith.constant 0 : index
    %199 = vector.load %arg2[%c0_111, %c0_112] : memref<32x128xf32, #tpu.memory_space<vmem>>, vector<32x128xf32>
    %cst_113 = arith.constant dense<0.000000e+00> : vector<8x128xf32>
    %200 = tpu.matmul %198, %199, %cst_113 {dimension_numbers = #tpu.dot_dimension_numbers<[1], [0], [0], [1], [0, 0, 1, 1], [], []>} : vector<8x32xf32>, vector<32x128xf32>, vector<8x128xf32> -> vector<8x128xf32>
    %201 = arith.addf %197, %200 : vector<8x128xf32>
    %202 = vector.extract_strided_slice %201 {offsets = [0, 0], sizes = [8, 96], strides = [1, 1]} : vector<8x128xf32> to vector<8x96xf32>
    %203 = arith.negf %202 : vector<8x96xf32>
    %204 = math.exp %203 : vector<8x96xf32>
    %cst_114 = arith.constant 1.000000e+00 : f32
    %205 = vector.broadcast %cst_114 : f32 to vector<8x96xf32>
    %206 = arith.addf %205, %204 : vector<8x96xf32>
    %207 = arith.divf %205, %206 : vector<8x96xf32>
    %208 = vector.extract_strided_slice %201 {offsets = [0, 96], sizes = [8, 32], strides = [1, 1]} : vector<8x128xf32> to vector<8x32xf32>
    %209 = math.tanh %208 : vector<8x32xf32>
    %210 = vector.extract_strided_slice %207 {offsets = [0, 32], sizes = [8, 32], strides = [1, 1]} : vector<8x96xf32> to vector<8x32xf32>
    %c0_115 = arith.constant 0 : index
    %c0_116 = arith.constant 0 : index
    %211 = vector.load %arg21[%c0_115, %c0_116] : memref<8x32xf32, #tpu.memory_space<vmem>>, vector<8x32xf32>
    %212 = arith.mulf %210, %211 : vector<8x32xf32>
    %213 = vector.extract_strided_slice %207 {offsets = [0, 0], sizes = [8, 32], strides = [1, 1]} : vector<8x96xf32> to vector<8x32xf32>
    %214 = arith.mulf %213, %209 : vector<8x32xf32>
    %215 = arith.addf %212, %214 : vector<8x32xf32>
    %216 = vector.extract_strided_slice %207 {offsets = [0, 64], sizes = [8, 32], strides = [1, 1]} : vector<8x96xf32> to vector<8x32xf32>
    %217 = math.tanh %215 : vector<8x32xf32>
    %218 = arith.mulf %216, %217 : vector<8x32xf32>
    %c0_117 = arith.constant 0 : index
    %c0_118 = arith.constant 0 : index
    %219 = vector.load %arg20[%c0_117, %c0_118] : memref<8x32xf32, #tpu.memory_space<vmem>>, vector<8x32xf32>
    tpu.vector_store %arg20[%c0_117, %c0_118], %218 {strides = array<i32>} : memref<8x32xf32, #tpu.memory_space<vmem>>, vector<8x32xf32>,
    %c0_119 = arith.constant 0 : index
    %c0_120 = arith.constant 0 : index
    %220 = vector.load %arg21[%c0_119, %c0_120] : memref<8x32xf32, #tpu.memory_space<vmem>>, vector<8x32xf32>
    tpu.vector_store %arg21[%c0_119, %c0_120], %215 {strides = array<i32>} : memref<8x32xf32, #tpu.memory_space<vmem>>, vector<8x32xf32>,
    %c0_121 = arith.constant 0 : index
    %c0_122 = arith.constant 0 : index
    %221 = vector.load %arg22[%c0_121, %c0_122] : memref<8x32xf32, #tpu.memory_space<vmem>>, vector<8x32xf32>
    %222 = vector.broadcast %c5_i32 : i32 to vector<8x1xi32>
    %223 = arith.cmpi eq, %13, %222 : vector<8x1xi32>
    %224 = arith.extui %223 : vector<8x1xi1> to vector<8x1xi32>
    %225 = arith.sitofp %224 : vector<8x1xi32> to vector<8x1xf32>
    %226 = vector.broadcast %225 : vector<8x1xf32> to vector<8x32xf32>
    %227 = arith.mulf %226, %218 : vector<8x32xf32>
    %228 = arith.addf %221, %227 : vector<8x32xf32>
    %c0_123 = arith.constant 0 : index
    %c0_124 = arith.constant 0 : index
    %229 = vector.load %arg22[%c0_123, %c0_124] : memref<8x32xf32, #tpu.memory_space<vmem>>, vector<8x32xf32>
    tpu.vector_store %arg22[%c0_123, %c0_124], %228 {strides = array<i32>} : memref<8x32xf32, #tpu.memory_space<vmem>>, vector<8x32xf32>,
    %c6_i32 = arith.constant 6 : i32
    %c0_125 = arith.constant 0 : index
    %c0_126 = arith.constant 0 : index
    %230 = vector.load %arg22[%c0_125, %c0_126] : memref<8x32xf32, #tpu.memory_space<vmem>>, vector<8x32xf32>
    %c0_127 = arith.constant 0 : index
    %c0_128 = arith.constant 0 : index
    %231 = vector.load %arg7[%c0_127, %c0_128] : memref<32x128xf32, #tpu.memory_space<vmem>>, vector<32x128xf32>
    %cst_129 = arith.constant dense<0.000000e+00> : vector<8x128xf32>
    %232 = tpu.matmul %230, %231, %cst_129 {dimension_numbers = #tpu.dot_dimension_numbers<[1], [0], [0], [1], [0, 0, 1, 1], [], []>} : vector<8x32xf32>, vector<32x128xf32>, vector<8x128xf32> -> vector<8x128xf32>
    %c0_130 = arith.constant 0 : index
    %c0_131 = arith.constant 0 : index
    %233 = vector.load %arg22[%c0_130, %c0_131] : memref<8x32xf32, #tpu.memory_space<vmem>>, vector<8x32xf32>
    %c0_132 = arith.constant 0 : index
    %c0_133 = arith.constant 0 : index
    %234 = vector.load %arg8[%c0_132, %c0_133] : memref<32x128xf32, #tpu.memory_space<vmem>>, vector<32x128xf32>
    %cst_134 = arith.constant dense<0.000000e+00> : vector<8x128xf32>
    %235 = tpu.matmul %233, %234, %cst_134 {dimension_numbers = #tpu.dot_dimension_numbers<[1], [0], [0], [1], [0, 0, 1, 1], [], []>} : vector<8x32xf32>, vector<32x128xf32>, vector<8x128xf32> -> vector<8x128xf32>
    %c0_135 = arith.constant 0 : index
    %c0_136 = arith.constant 0 : index
    %236 = vector.load %arg5[%c0_135, %c0_136] : memref<8x32xf32, #tpu.memory_space<vmem>>, vector<8x32xf32>
    %c0_137 = arith.constant 0 : index
    %c0_138 = arith.constant 0 : index
    %237 = vector.load %arg6[%c0_137, %c0_138] : memref<32x128xf32, #tpu.memory_space<vmem>>, vector<32x128xf32>
    %cst_139 = arith.constant dense<0.000000e+00> : vector<8x128xf32>
    %238 = tpu.matmul %236, %237, %cst_139 {dimension_numbers = #tpu.dot_dimension_numbers<[1], [0], [0], [1], [0, 0, 1, 1], [], []>} : vector<8x32xf32>, vector<32x128xf32>, vector<8x128xf32> -> vector<8x128xf32>
    %c0_140 = arith.constant 0 : index
    %c0_141 = arith.constant 0 : index
    %239 = vector.load %arg14[%c0_140, %c0_141] : memref<8x8xf32, #tpu.memory_space<vmem>>, vector<8x8xf32>
    %cst_142 = arith.constant dense<0.000000e+00> : vector<8x128xf32>
    %240 = tpu.matmul %239, %232, %cst_142 {dimension_numbers = #tpu.dot_dimension_numbers<[1], [0], [0], [1], [0, 0, 1, 1], [], []>} : vector<8x8xf32>, vector<8x128xf32>, vector<8x128xf32> -> vector<8x128xf32>
    %241 = arith.addf %238, %240 : vector<8x128xf32>
    %c0_143 = arith.constant 0 : index
    %c0_144 = arith.constant 0 : index
    %242 = vector.load %arg15[%c0_143, %c0_144] : memref<8x8xf32, #tpu.memory_space<vmem>>, vector<8x8xf32>
    %cst_145 = arith.constant dense<0.000000e+00> : vector<8x128xf32>
    %243 = tpu.matmul %242, %235, %cst_145 {dimension_numbers = #tpu.dot_dimension_numbers<[1], [0], [0], [1], [0, 0, 1, 1], [], []>} : vector<8x8xf32>, vector<8x128xf32>, vector<8x128xf32> -> vector<8x128xf32>
    %244 = arith.addf %241, %243 : vector<8x128xf32>
    %c0_146 = arith.constant 0 : index
    %c0_147 = arith.constant 0 : index
    %245 = vector.load %arg10[%c0_146, %c0_147] : memref<1x128xf32, #tpu.memory_space<vmem>>, vector<1x128xf32>
    %246 = vector.broadcast %245 : vector<1x128xf32> to vector<8x128xf32>
    %247 = arith.addf %244, %246 : vector<8x128xf32>
    %c0_148 = arith.constant 0 : index
    %c0_149 = arith.constant 0 : index
    %248 = vector.load %arg23[%c0_148, %c0_149] : memref<8x128xf32, #tpu.memory_space<vmem>>, vector<8x128xf32>
    tpu.vector_store %arg23[%c0_148, %c0_149], %247 {strides = array<i32>} : memref<8x128xf32, #tpu.memory_space<vmem>>, vector<8x128xf32>,
    %cst_150 = arith.constant 0.000000e+00 : f32
    %249 = vector.broadcast %cst_150 : f32 to vector<1x32xf32>
    %c0_151 = arith.constant 0 : index
    %c0_152 = arith.constant 0 : index
    %250 = vector.load %arg24[%c0_151, %c0_152] : memref<1x32xf32, #tpu.memory_space<vmem>>, vector<1x32xf32>
    tpu.vector_store %arg24[%c0_151, %c0_152], %249 {strides = array<i32>} : memref<1x32xf32, #tpu.memory_space<vmem>>, vector<1x32xf32>,
    %cst_153 = arith.constant 0.000000e+00 : f32
    %251 = vector.broadcast %cst_153 : f32 to vector<1x32xf32>
    %c0_154 = arith.constant 0 : index
    %c0_155 = arith.constant 0 : index
    %252 = vector.load %arg25[%c0_154, %c0_155] : memref<1x32xf32, #tpu.memory_space<vmem>>, vector<1x32xf32>
    tpu.vector_store %arg25[%c0_154, %c0_155], %251 {strides = array<i32>} : memref<1x32xf32, #tpu.memory_space<vmem>>, vector<1x32xf32>,
    %c0_i32_156 = arith.constant 0 : i32
    %253 = arith.index_cast %c0_i32_156 : i32 to index
    %c0_157 = arith.constant 0 : index
    %254 = vector.load %arg23[%253, %c0_157] : memref<8x128xf32, #tpu.memory_space<vmem>>, vector<1x128xf32>
    %c0_158 = arith.constant 0 : index
    %c0_159 = arith.constant 0 : index
    %255 = vector.load %arg24[%c0_158, %c0_159] : memref<1x32xf32, #tpu.memory_space<vmem>>, vector<1x32xf32>
    %c0_160 = arith.constant 0 : index
    %c0_161 = arith.constant 0 : index
    %256 = vector.load %arg9[%c0_160, %c0_161] : memref<32x128xf32, #tpu.memory_space<vmem>>, vector<32x128xf32>
    %cst_162 = arith.constant dense<0.000000e+00> : vector<1x128xf32>
    %257 = tpu.matmul %255, %256, %cst_162 {dimension_numbers = #tpu.dot_dimension_numbers<[1], [0], [0], [1], [0, 0, 1, 1], [], []>} : vector<1x32xf32>, vector<32x128xf32>, vector<1x128xf32> -> vector<1x128xf32>
    %258 = arith.addf %254, %257 : vector<1x128xf32>
    %259 = vector.extract_strided_slice %258 {offsets = [0, 0], sizes = [1, 96], strides = [1, 1]} : vector<1x128xf32> to vector<1x96xf32>
    %260 = arith.negf %259 : vector<1x96xf32>
    %261 = math.exp %260 : vector<1x96xf32>
    %cst_163 = arith.constant 1.000000e+00 : f32
    %262 = vector.broadcast %cst_163 : f32 to vector<1x96xf32>
    %263 = arith.addf %262, %261 : vector<1x96xf32>
    %264 = arith.divf %262, %263 : vector<1x96xf32>
    %265 = vector.extract_strided_slice %258 {offsets = [0, 96], sizes = [1, 32], strides = [1, 1]} : vector<1x128xf32> to vector<1x32xf32>
    %266 = math.tanh %265 : vector<1x32xf32>
    %267 = vector.extract_strided_slice %264 {offsets = [0, 32], sizes = [1, 32], strides = [1, 1]} : vector<1x96xf32> to vector<1x32xf32>
    %c0_164 = arith.constant 0 : index
    %c0_165 = arith.constant 0 : index
    %268 = vector.load %arg25[%c0_164, %c0_165] : memref<1x32xf32, #tpu.memory_space<vmem>>, vector<1x32xf32>
    %269 = arith.mulf %267, %268 : vector<1x32xf32>
    %270 = vector.extract_strided_slice %264 {offsets = [0, 0], sizes = [1, 32], strides = [1, 1]} : vector<1x96xf32> to vector<1x32xf32>
    %271 = arith.mulf %270, %266 : vector<1x32xf32>
    %272 = arith.addf %269, %271 : vector<1x32xf32>
    %273 = vector.extract_strided_slice %264 {offsets = [0, 64], sizes = [1, 32], strides = [1, 1]} : vector<1x96xf32> to vector<1x32xf32>
    %274 = math.tanh %272 : vector<1x32xf32>
    %275 = arith.mulf %273, %274 : vector<1x32xf32>
    %c0_166 = arith.constant 0 : index
    %c0_167 = arith.constant 0 : index
    %276 = vector.load %arg24[%c0_166, %c0_167] : memref<1x32xf32, #tpu.memory_space<vmem>>, vector<1x32xf32>
    tpu.vector_store %arg24[%c0_166, %c0_167], %275 {strides = array<i32>} : memref<1x32xf32, #tpu.memory_space<vmem>>, vector<1x32xf32>,
    %c0_168 = arith.constant 0 : index
    %c0_169 = arith.constant 0 : index
    %277 = vector.load %arg25[%c0_168, %c0_169] : memref<1x32xf32, #tpu.memory_space<vmem>>, vector<1x32xf32>
    tpu.vector_store %arg25[%c0_168, %c0_169], %272 {strides = array<i32>} : memref<1x32xf32, #tpu.memory_space<vmem>>, vector<1x32xf32>,
    %278 = arith.index_cast %c0_i32_156 : i32 to index
    %c0_170 = arith.constant 0 : index
    %279 = vector.load %arg26[%278, %c0_170] : memref<8x32xf32, #tpu.memory_space<vmem>>, vector<1x32xf32>
    tpu.vector_store %arg26[%278, %c0_170], %275 {strides = array<i32>} : memref<8x32xf32, #tpu.memory_space<vmem>>, vector<1x32xf32>,
    %c1_i32_171 = arith.constant 1 : i32
    %280 = arith.index_cast %c1_i32_171 : i32 to index
    %c0_172 = arith.constant 0 : index
    %281 = vector.load %arg23[%280, %c0_172] : memref<8x128xf32, #tpu.memory_space<vmem>>, vector<1x128xf32>
    %c0_173 = arith.constant 0 : index
    %c0_174 = arith.constant 0 : index
    %282 = vector.load %arg24[%c0_173, %c0_174] : memref<1x32xf32, #tpu.memory_space<vmem>>, vector<1x32xf32>
    %c0_175 = arith.constant 0 : index
    %c0_176 = arith.constant 0 : index
    %283 = vector.load %arg9[%c0_175, %c0_176] : memref<32x128xf32, #tpu.memory_space<vmem>>, vector<32x128xf32>
    %cst_177 = arith.constant dense<0.000000e+00> : vector<1x128xf32>
    %284 = tpu.matmul %282, %283, %cst_177 {dimension_numbers = #tpu.dot_dimension_numbers<[1], [0], [0], [1], [0, 0, 1, 1], [], []>} : vector<1x32xf32>, vector<32x128xf32>, vector<1x128xf32> -> vector<1x128xf32>
    %285 = arith.addf %281, %284 : vector<1x128xf32>
    %286 = vector.extract_strided_slice %285 {offsets = [0, 0], sizes = [1, 96], strides = [1, 1]} : vector<1x128xf32> to vector<1x96xf32>
    %287 = arith.negf %286 : vector<1x96xf32>
    %288 = math.exp %287 : vector<1x96xf32>
    %cst_178 = arith.constant 1.000000e+00 : f32
    %289 = vector.broadcast %cst_178 : f32 to vector<1x96xf32>
    %290 = arith.addf %289, %288 : vector<1x96xf32>
    %291 = arith.divf %289, %290 : vector<1x96xf32>
    %292 = vector.extract_strided_slice %285 {offsets = [0, 96], sizes = [1, 32], strides = [1, 1]} : vector<1x128xf32> to vector<1x32xf32>
    %293 = math.tanh %292 : vector<1x32xf32>
    %294 = vector.extract_strided_slice %291 {offsets = [0, 32], sizes = [1, 32], strides = [1, 1]} : vector<1x96xf32> to vector<1x32xf32>
    %c0_179 = arith.constant 0 : index
    %c0_180 = arith.constant 0 : index
    %295 = vector.load %arg25[%c0_179, %c0_180] : memref<1x32xf32, #tpu.memory_space<vmem>>, vector<1x32xf32>
    %296 = arith.mulf %294, %295 : vector<1x32xf32>
    %297 = vector.extract_strided_slice %291 {offsets = [0, 0], sizes = [1, 32], strides = [1, 1]} : vector<1x96xf32> to vector<1x32xf32>
    %298 = arith.mulf %297, %293 : vector<1x32xf32>
    %299 = arith.addf %296, %298 : vector<1x32xf32>
    %300 = vector.extract_strided_slice %291 {offsets = [0, 64], sizes = [1, 32], strides = [1, 1]} : vector<1x96xf32> to vector<1x32xf32>
    %301 = math.tanh %299 : vector<1x32xf32>
    %302 = arith.mulf %300, %301 : vector<1x32xf32>
    %c0_181 = arith.constant 0 : index
    %c0_182 = arith.constant 0 : index
    %303 = vector.load %arg24[%c0_181, %c0_182] : memref<1x32xf32, #tpu.memory_space<vmem>>, vector<1x32xf32>
    tpu.vector_store %arg24[%c0_181, %c0_182], %302 {strides = array<i32>} : memref<1x32xf32, #tpu.memory_space<vmem>>, vector<1x32xf32>,
    %c0_183 = arith.constant 0 : index
    %c0_184 = arith.constant 0 : index
    %304 = vector.load %arg25[%c0_183, %c0_184] : memref<1x32xf32, #tpu.memory_space<vmem>>, vector<1x32xf32>
    tpu.vector_store %arg25[%c0_183, %c0_184], %299 {strides = array<i32>} : memref<1x32xf32, #tpu.memory_space<vmem>>, vector<1x32xf32>,
    %305 = arith.index_cast %c1_i32_171 : i32 to index
    %c0_185 = arith.constant 0 : index
    %306 = vector.load %arg26[%305, %c0_185] : memref<8x32xf32, #tpu.memory_space<vmem>>, vector<1x32xf32>
    tpu.vector_store %arg26[%305, %c0_185], %302 {strides = array<i32>} : memref<8x32xf32, #tpu.memory_space<vmem>>, vector<1x32xf32>,
    %c2_i32_186 = arith.constant 2 : i32
    %307 = arith.index_cast %c2_i32_186 : i32 to index
    %c0_187 = arith.constant 0 : index
    %308 = vector.load %arg23[%307, %c0_187] : memref<8x128xf32, #tpu.memory_space<vmem>>, vector<1x128xf32>
    %c0_188 = arith.constant 0 : index
    %c0_189 = arith.constant 0 : index
    %309 = vector.load %arg24[%c0_188, %c0_189] : memref<1x32xf32, #tpu.memory_space<vmem>>, vector<1x32xf32>
    %c0_190 = arith.constant 0 : index
    %c0_191 = arith.constant 0 : index
    %310 = vector.load %arg9[%c0_190, %c0_191] : memref<32x128xf32, #tpu.memory_space<vmem>>, vector<32x128xf32>
    %cst_192 = arith.constant dense<0.000000e+00> : vector<1x128xf32>
    %311 = tpu.matmul %309, %310, %cst_192 {dimension_numbers = #tpu.dot_dimension_numbers<[1], [0], [0], [1], [0, 0, 1, 1], [], []>} : vector<1x32xf32>, vector<32x128xf32>, vector<1x128xf32> -> vector<1x128xf32>
    %312 = arith.addf %308, %311 : vector<1x128xf32>
    %313 = vector.extract_strided_slice %312 {offsets = [0, 0], sizes = [1, 96], strides = [1, 1]} : vector<1x128xf32> to vector<1x96xf32>
    %314 = arith.negf %313 : vector<1x96xf32>
    %315 = math.exp %314 : vector<1x96xf32>
    %cst_193 = arith.constant 1.000000e+00 : f32
    %316 = vector.broadcast %cst_193 : f32 to vector<1x96xf32>
    %317 = arith.addf %316, %315 : vector<1x96xf32>
    %318 = arith.divf %316, %317 : vector<1x96xf32>
    %319 = vector.extract_strided_slice %312 {offsets = [0, 96], sizes = [1, 32], strides = [1, 1]} : vector<1x128xf32> to vector<1x32xf32>
    %320 = math.tanh %319 : vector<1x32xf32>
    %321 = vector.extract_strided_slice %318 {offsets = [0, 32], sizes = [1, 32], strides = [1, 1]} : vector<1x96xf32> to vector<1x32xf32>
    %c0_194 = arith.constant 0 : index
    %c0_195 = arith.constant 0 : index
    %322 = vector.load %arg25[%c0_194, %c0_195] : memref<1x32xf32, #tpu.memory_space<vmem>>, vector<1x32xf32>
    %323 = arith.mulf %321, %322 : vector<1x32xf32>
    %324 = vector.extract_strided_slice %318 {offsets = [0, 0], sizes = [1, 32], strides = [1, 1]} : vector<1x96xf32> to vector<1x32xf32>
    %325 = arith.mulf %324, %320 : vector<1x32xf32>
    %326 = arith.addf %323, %325 : vector<1x32xf32>
    %327 = vector.extract_strided_slice %318 {offsets = [0, 64], sizes = [1, 32], strides = [1, 1]} : vector<1x96xf32> to vector<1x32xf32>
    %328 = math.tanh %326 : vector<1x32xf32>
    %329 = arith.mulf %327, %328 : vector<1x32xf32>
    %c0_196 = arith.constant 0 : index
    %c0_197 = arith.constant 0 : index
    %330 = vector.load %arg24[%c0_196, %c0_197] : memref<1x32xf32, #tpu.memory_space<vmem>>, vector<1x32xf32>
    tpu.vector_store %arg24[%c0_196, %c0_197], %329 {strides = array<i32>} : memref<1x32xf32, #tpu.memory_space<vmem>>, vector<1x32xf32>,
    %c0_198 = arith.constant 0 : index
    %c0_199 = arith.constant 0 : index
    %331 = vector.load %arg25[%c0_198, %c0_199] : memref<1x32xf32, #tpu.memory_space<vmem>>, vector<1x32xf32>
    tpu.vector_store %arg25[%c0_198, %c0_199], %326 {strides = array<i32>} : memref<1x32xf32, #tpu.memory_space<vmem>>, vector<1x32xf32>,
    %332 = arith.index_cast %c2_i32_186 : i32 to index
    %c0_200 = arith.constant 0 : index
    %333 = vector.load %arg26[%332, %c0_200] : memref<8x32xf32, #tpu.memory_space<vmem>>, vector<1x32xf32>
    tpu.vector_store %arg26[%332, %c0_200], %329 {strides = array<i32>} : memref<8x32xf32, #tpu.memory_space<vmem>>, vector<1x32xf32>,
    %c3_i32_201 = arith.constant 3 : i32
    %334 = arith.index_cast %c3_i32_201 : i32 to index
    %c0_202 = arith.constant 0 : index
    %335 = vector.load %arg23[%334, %c0_202] : memref<8x128xf32, #tpu.memory_space<vmem>>, vector<1x128xf32>
    %c0_203 = arith.constant 0 : index
    %c0_204 = arith.constant 0 : index
    %336 = vector.load %arg24[%c0_203, %c0_204] : memref<1x32xf32, #tpu.memory_space<vmem>>, vector<1x32xf32>
    %c0_205 = arith.constant 0 : index
    %c0_206 = arith.constant 0 : index
    %337 = vector.load %arg9[%c0_205, %c0_206] : memref<32x128xf32, #tpu.memory_space<vmem>>, vector<32x128xf32>
    %cst_207 = arith.constant dense<0.000000e+00> : vector<1x128xf32>
    %338 = tpu.matmul %336, %337, %cst_207 {dimension_numbers = #tpu.dot_dimension_numbers<[1], [0], [0], [1], [0, 0, 1, 1], [], []>} : vector<1x32xf32>, vector<32x128xf32>, vector<1x128xf32> -> vector<1x128xf32>
    %339 = arith.addf %335, %338 : vector<1x128xf32>
    %340 = vector.extract_strided_slice %339 {offsets = [0, 0], sizes = [1, 96], strides = [1, 1]} : vector<1x128xf32> to vector<1x96xf32>
    %341 = arith.negf %340 : vector<1x96xf32>
    %342 = math.exp %341 : vector<1x96xf32>
    %cst_208 = arith.constant 1.000000e+00 : f32
    %343 = vector.broadcast %cst_208 : f32 to vector<1x96xf32>
    %344 = arith.addf %343, %342 : vector<1x96xf32>
    %345 = arith.divf %343, %344 : vector<1x96xf32>
    %346 = vector.extract_strided_slice %339 {offsets = [0, 96], sizes = [1, 32], strides = [1, 1]} : vector<1x128xf32> to vector<1x32xf32>
    %347 = math.tanh %346 : vector<1x32xf32>
    %348 = vector.extract_strided_slice %345 {offsets = [0, 32], sizes = [1, 32], strides = [1, 1]} : vector<1x96xf32> to vector<1x32xf32>
    %c0_209 = arith.constant 0 : index
    %c0_210 = arith.constant 0 : index
    %349 = vector.load %arg25[%c0_209, %c0_210] : memref<1x32xf32, #tpu.memory_space<vmem>>, vector<1x32xf32>
    %350 = arith.mulf %348, %349 : vector<1x32xf32>
    %351 = vector.extract_strided_slice %345 {offsets = [0, 0], sizes = [1, 32], strides = [1, 1]} : vector<1x96xf32> to vector<1x32xf32>
    %352 = arith.mulf %351, %347 : vector<1x32xf32>
    %353 = arith.addf %350, %352 : vector<1x32xf32>
    %354 = vector.extract_strided_slice %345 {offsets = [0, 64], sizes = [1, 32], strides = [1, 1]} : vector<1x96xf32> to vector<1x32xf32>
    %355 = math.tanh %353 : vector<1x32xf32>
    %356 = arith.mulf %354, %355 : vector<1x32xf32>
    %c0_211 = arith.constant 0 : index
    %c0_212 = arith.constant 0 : index
    %357 = vector.load %arg24[%c0_211, %c0_212] : memref<1x32xf32, #tpu.memory_space<vmem>>, vector<1x32xf32>
    tpu.vector_store %arg24[%c0_211, %c0_212], %356 {strides = array<i32>} : memref<1x32xf32, #tpu.memory_space<vmem>>, vector<1x32xf32>,
    %c0_213 = arith.constant 0 : index
    %c0_214 = arith.constant 0 : index
    %358 = vector.load %arg25[%c0_213, %c0_214] : memref<1x32xf32, #tpu.memory_space<vmem>>, vector<1x32xf32>
    tpu.vector_store %arg25[%c0_213, %c0_214], %353 {strides = array<i32>} : memref<1x32xf32, #tpu.memory_space<vmem>>, vector<1x32xf32>,
    %359 = arith.index_cast %c3_i32_201 : i32 to index
    %c0_215 = arith.constant 0 : index
    %360 = vector.load %arg26[%359, %c0_215] : memref<8x32xf32, #tpu.memory_space<vmem>>, vector<1x32xf32>
    tpu.vector_store %arg26[%359, %c0_215], %356 {strides = array<i32>} : memref<8x32xf32, #tpu.memory_space<vmem>>, vector<1x32xf32>,
    %c4_i32_216 = arith.constant 4 : i32
    %361 = arith.index_cast %c4_i32_216 : i32 to index
    %c0_217 = arith.constant 0 : index
    %362 = vector.load %arg23[%361, %c0_217] : memref<8x128xf32, #tpu.memory_space<vmem>>, vector<1x128xf32>
    %c0_218 = arith.constant 0 : index
    %c0_219 = arith.constant 0 : index
    %363 = vector.load %arg24[%c0_218, %c0_219] : memref<1x32xf32, #tpu.memory_space<vmem>>, vector<1x32xf32>
    %c0_220 = arith.constant 0 : index
    %c0_221 = arith.constant 0 : index
    %364 = vector.load %arg9[%c0_220, %c0_221] : memref<32x128xf32, #tpu.memory_space<vmem>>, vector<32x128xf32>
    %cst_222 = arith.constant dense<0.000000e+00> : vector<1x128xf32>
    %365 = tpu.matmul %363, %364, %cst_222 {dimension_numbers = #tpu.dot_dimension_numbers<[1], [0], [0], [1], [0, 0, 1, 1], [], []>} : vector<1x32xf32>, vector<32x128xf32>, vector<1x128xf32> -> vector<1x128xf32>
    %366 = arith.addf %362, %365 : vector<1x128xf32>
    %367 = vector.extract_strided_slice %366 {offsets = [0, 0], sizes = [1, 96], strides = [1, 1]} : vector<1x128xf32> to vector<1x96xf32>
    %368 = arith.negf %367 : vector<1x96xf32>
    %369 = math.exp %368 : vector<1x96xf32>
    %cst_223 = arith.constant 1.000000e+00 : f32
    %370 = vector.broadcast %cst_223 : f32 to vector<1x96xf32>
    %371 = arith.addf %370, %369 : vector<1x96xf32>
    %372 = arith.divf %370, %371 : vector<1x96xf32>
    %373 = vector.extract_strided_slice %366 {offsets = [0, 96], sizes = [1, 32], strides = [1, 1]} : vector<1x128xf32> to vector<1x32xf32>
    %374 = math.tanh %373 : vector<1x32xf32>
    %375 = vector.extract_strided_slice %372 {offsets = [0, 32], sizes = [1, 32], strides = [1, 1]} : vector<1x96xf32> to vector<1x32xf32>
    %c0_224 = arith.constant 0 : index
    %c0_225 = arith.constant 0 : index
    %376 = vector.load %arg25[%c0_224, %c0_225] : memref<1x32xf32, #tpu.memory_space<vmem>>, vector<1x32xf32>
    %377 = arith.mulf %375, %376 : vector<1x32xf32>
    %378 = vector.extract_strided_slice %372 {offsets = [0, 0], sizes = [1, 32], strides = [1, 1]} : vector<1x96xf32> to vector<1x32xf32>
    %379 = arith.mulf %378, %374 : vector<1x32xf32>
    %380 = arith.addf %377, %379 : vector<1x32xf32>
    %381 = vector.extract_strided_slice %372 {offsets = [0, 64], sizes = [1, 32], strides = [1, 1]} : vector<1x96xf32> to vector<1x32xf32>
    %382 = math.tanh %380 : vector<1x32xf32>
    %383 = arith.mulf %381, %382 : vector<1x32xf32>
    %c0_226 = arith.constant 0 : index
    %c0_227 = arith.constant 0 : index
    %384 = vector.load %arg24[%c0_226, %c0_227] : memref<1x32xf32, #tpu.memory_space<vmem>>, vector<1x32xf32>
    tpu.vector_store %arg24[%c0_226, %c0_227], %383 {strides = array<i32>} : memref<1x32xf32, #tpu.memory_space<vmem>>, vector<1x32xf32>,
    %c0_228 = arith.constant 0 : index
    %c0_229 = arith.constant 0 : index
    %385 = vector.load %arg25[%c0_228, %c0_229] : memref<1x32xf32, #tpu.memory_space<vmem>>, vector<1x32xf32>
    tpu.vector_store %arg25[%c0_228, %c0_229], %380 {strides = array<i32>} : memref<1x32xf32, #tpu.memory_space<vmem>>, vector<1x32xf32>,
    %386 = arith.index_cast %c4_i32_216 : i32 to index
    %c0_230 = arith.constant 0 : index
    %387 = vector.load %arg26[%386, %c0_230] : memref<8x32xf32, #tpu.memory_space<vmem>>, vector<1x32xf32>
    tpu.vector_store %arg26[%386, %c0_230], %383 {strides = array<i32>} : memref<8x32xf32, #tpu.memory_space<vmem>>, vector<1x32xf32>,
    %c5_i32_231 = arith.constant 5 : i32
    %388 = arith.index_cast %c5_i32_231 : i32 to index
    %c0_232 = arith.constant 0 : index
    %389 = vector.load %arg23[%388, %c0_232] : memref<8x128xf32, #tpu.memory_space<vmem>>, vector<1x128xf32>
    %c0_233 = arith.constant 0 : index
    %c0_234 = arith.constant 0 : index
    %390 = vector.load %arg24[%c0_233, %c0_234] : memref<1x32xf32, #tpu.memory_space<vmem>>, vector<1x32xf32>
    %c0_235 = arith.constant 0 : index
    %c0_236 = arith.constant 0 : index
    %391 = vector.load %arg9[%c0_235, %c0_236] : memref<32x128xf32, #tpu.memory_space<vmem>>, vector<32x128xf32>
    %cst_237 = arith.constant dense<0.000000e+00> : vector<1x128xf32>
    %392 = tpu.matmul %390, %391, %cst_237 {dimension_numbers = #tpu.dot_dimension_numbers<[1], [0], [0], [1], [0, 0, 1, 1], [], []>} : vector<1x32xf32>, vector<32x128xf32>, vector<1x128xf32> -> vector<1x128xf32>
    %393 = arith.addf %389, %392 : vector<1x128xf32>
    %394 = vector.extract_strided_slice %393 {offsets = [0, 0], sizes = [1, 96], strides = [1, 1]} : vector<1x128xf32> to vector<1x96xf32>
    %395 = arith.negf %394 : vector<1x96xf32>
    %396 = math.exp %395 : vector<1x96xf32>
    %cst_238 = arith.constant 1.000000e+00 : f32
    %397 = vector.broadcast %cst_238 : f32 to vector<1x96xf32>
    %398 = arith.addf %397, %396 : vector<1x96xf32>
    %399 = arith.divf %397, %398 : vector<1x96xf32>
    %400 = vector.extract_strided_slice %393 {offsets = [0, 96], sizes = [1, 32], strides = [1, 1]} : vector<1x128xf32> to vector<1x32xf32>
    %401 = math.tanh %400 : vector<1x32xf32>
    %402 = vector.extract_strided_slice %399 {offsets = [0, 32], sizes = [1, 32], strides = [1, 1]} : vector<1x96xf32> to vector<1x32xf32>
    %c0_239 = arith.constant 0 : index
    %c0_240 = arith.constant 0 : index
    %403 = vector.load %arg25[%c0_239, %c0_240] : memref<1x32xf32, #tpu.memory_space<vmem>>, vector<1x32xf32>
    %404 = arith.mulf %402, %403 : vector<1x32xf32>
    %405 = vector.extract_strided_slice %399 {offsets = [0, 0], sizes = [1, 32], strides = [1, 1]} : vector<1x96xf32> to vector<1x32xf32>
    %406 = arith.mulf %405, %401 : vector<1x32xf32>
    %407 = arith.addf %404, %406 : vector<1x32xf32>
    %408 = vector.extract_strided_slice %399 {offsets = [0, 64], sizes = [1, 32], strides = [1, 1]} : vector<1x96xf32> to vector<1x32xf32>
    %409 = math.tanh %407 : vector<1x32xf32>
    %410 = arith.mulf %408, %409 : vector<1x32xf32>
    %c0_241 = arith.constant 0 : index
    %c0_242 = arith.constant 0 : index
    %411 = vector.load %arg24[%c0_241, %c0_242] : memref<1x32xf32, #tpu.memory_space<vmem>>, vector<1x32xf32>
    tpu.vector_store %arg24[%c0_241, %c0_242], %410 {strides = array<i32>} : memref<1x32xf32, #tpu.memory_space<vmem>>, vector<1x32xf32>,
    %c0_243 = arith.constant 0 : index
    %c0_244 = arith.constant 0 : index
    %412 = vector.load %arg25[%c0_243, %c0_244] : memref<1x32xf32, #tpu.memory_space<vmem>>, vector<1x32xf32>
    tpu.vector_store %arg25[%c0_243, %c0_244], %407 {strides = array<i32>} : memref<1x32xf32, #tpu.memory_space<vmem>>, vector<1x32xf32>,
    %413 = arith.index_cast %c5_i32_231 : i32 to index
    %c0_245 = arith.constant 0 : index
    %414 = vector.load %arg26[%413, %c0_245] : memref<8x32xf32, #tpu.memory_space<vmem>>, vector<1x32xf32>
    tpu.vector_store %arg26[%413, %c0_245], %410 {strides = array<i32>} : memref<8x32xf32, #tpu.memory_space<vmem>>, vector<1x32xf32>,
    %c6_i32_246 = arith.constant 6 : i32
    %415 = arith.index_cast %c6_i32_246 : i32 to index
    %c0_247 = arith.constant 0 : index
    %416 = vector.load %arg23[%415, %c0_247] : memref<8x128xf32, #tpu.memory_space<vmem>>, vector<1x128xf32>
    %c0_248 = arith.constant 0 : index
    %c0_249 = arith.constant 0 : index
    %417 = vector.load %arg24[%c0_248, %c0_249] : memref<1x32xf32, #tpu.memory_space<vmem>>, vector<1x32xf32>
    %c0_250 = arith.constant 0 : index
    %c0_251 = arith.constant 0 : index
    %418 = vector.load %arg9[%c0_250, %c0_251] : memref<32x128xf32, #tpu.memory_space<vmem>>, vector<32x128xf32>
    %cst_252 = arith.constant dense<0.000000e+00> : vector<1x128xf32>
    %419 = tpu.matmul %417, %418, %cst_252 {dimension_numbers = #tpu.dot_dimension_numbers<[1], [0], [0], [1], [0, 0, 1, 1], [], []>} : vector<1x32xf32>, vector<32x128xf32>, vector<1x128xf32> -> vector<1x128xf32>
    %420 = arith.addf %416, %419 : vector<1x128xf32>
    %421 = vector.extract_strided_slice %420 {offsets = [0, 0], sizes = [1, 96], strides = [1, 1]} : vector<1x128xf32> to vector<1x96xf32>
    %422 = arith.negf %421 : vector<1x96xf32>
    %423 = math.exp %422 : vector<1x96xf32>
    %cst_253 = arith.constant 1.000000e+00 : f32
    %424 = vector.broadcast %cst_253 : f32 to vector<1x96xf32>
    %425 = arith.addf %424, %423 : vector<1x96xf32>
    %426 = arith.divf %424, %425 : vector<1x96xf32>
    %427 = vector.extract_strided_slice %420 {offsets = [0, 96], sizes = [1, 32], strides = [1, 1]} : vector<1x128xf32> to vector<1x32xf32>
    %428 = math.tanh %427 : vector<1x32xf32>
    %429 = vector.extract_strided_slice %426 {offsets = [0, 32], sizes = [1, 32], strides = [1, 1]} : vector<1x96xf32> to vector<1x32xf32>
    %c0_254 = arith.constant 0 : index
    %c0_255 = arith.constant 0 : index
    %430 = vector.load %arg25[%c0_254, %c0_255] : memref<1x32xf32, #tpu.memory_space<vmem>>, vector<1x32xf32>
    %431 = arith.mulf %429, %430 : vector<1x32xf32>
    %432 = vector.extract_strided_slice %426 {offsets = [0, 0], sizes = [1, 32], strides = [1, 1]} : vector<1x96xf32> to vector<1x32xf32>
    %433 = arith.mulf %432, %428 : vector<1x32xf32>
    %434 = arith.addf %431, %433 : vector<1x32xf32>
    %435 = vector.extract_strided_slice %426 {offsets = [0, 64], sizes = [1, 32], strides = [1, 1]} : vector<1x96xf32> to vector<1x32xf32>
    %436 = math.tanh %434 : vector<1x32xf32>
    %437 = arith.mulf %435, %436 : vector<1x32xf32>
    %c0_256 = arith.constant 0 : index
    %c0_257 = arith.constant 0 : index
    %438 = vector.load %arg24[%c0_256, %c0_257] : memref<1x32xf32, #tpu.memory_space<vmem>>, vector<1x32xf32>
    tpu.vector_store %arg24[%c0_256, %c0_257], %437 {strides = array<i32>} : memref<1x32xf32, #tpu.memory_space<vmem>>, vector<1x32xf32>,
    %c0_258 = arith.constant 0 : index
    %c0_259 = arith.constant 0 : index
    %439 = vector.load %arg25[%c0_258, %c0_259] : memref<1x32xf32, #tpu.memory_space<vmem>>, vector<1x32xf32>
    tpu.vector_store %arg25[%c0_258, %c0_259], %434 {strides = array<i32>} : memref<1x32xf32, #tpu.memory_space<vmem>>, vector<1x32xf32>,
    %440 = arith.index_cast %c6_i32_246 : i32 to index
    %c0_260 = arith.constant 0 : index
    %441 = vector.load %arg26[%440, %c0_260] : memref<8x32xf32, #tpu.memory_space<vmem>>, vector<1x32xf32>
    tpu.vector_store %arg26[%440, %c0_260], %437 {strides = array<i32>} : memref<8x32xf32, #tpu.memory_space<vmem>>, vector<1x32xf32>,
    %c7_i32 = arith.constant 7 : i32
    %442 = arith.index_cast %c7_i32 : i32 to index
    %c0_261 = arith.constant 0 : index
    %443 = vector.load %arg23[%442, %c0_261] : memref<8x128xf32, #tpu.memory_space<vmem>>, vector<1x128xf32>
    %c0_262 = arith.constant 0 : index
    %c0_263 = arith.constant 0 : index
    %444 = vector.load %arg24[%c0_262, %c0_263] : memref<1x32xf32, #tpu.memory_space<vmem>>, vector<1x32xf32>
    %c0_264 = arith.constant 0 : index
    %c0_265 = arith.constant 0 : index
    %445 = vector.load %arg9[%c0_264, %c0_265] : memref<32x128xf32, #tpu.memory_space<vmem>>, vector<32x128xf32>
    %cst_266 = arith.constant dense<0.000000e+00> : vector<1x128xf32>
    %446 = tpu.matmul %444, %445, %cst_266 {dimension_numbers = #tpu.dot_dimension_numbers<[1], [0], [0], [1], [0, 0, 1, 1], [], []>} : vector<1x32xf32>, vector<32x128xf32>, vector<1x128xf32> -> vector<1x128xf32>
    %447 = arith.addf %443, %446 : vector<1x128xf32>
    %448 = vector.extract_strided_slice %447 {offsets = [0, 0], sizes = [1, 96], strides = [1, 1]} : vector<1x128xf32> to vector<1x96xf32>
    %449 = arith.negf %448 : vector<1x96xf32>
    %450 = math.exp %449 : vector<1x96xf32>
    %cst_267 = arith.constant 1.000000e+00 : f32
    %451 = vector.broadcast %cst_267 : f32 to vector<1x96xf32>
    %452 = arith.addf %451, %450 : vector<1x96xf32>
    %453 = arith.divf %451, %452 : vector<1x96xf32>
    %454 = vector.extract_strided_slice %447 {offsets = [0, 96], sizes = [1, 32], strides = [1, 1]} : vector<1x128xf32> to vector<1x32xf32>
    %455 = math.tanh %454 : vector<1x32xf32>
    %456 = vector.extract_strided_slice %453 {offsets = [0, 32], sizes = [1, 32], strides = [1, 1]} : vector<1x96xf32> to vector<1x32xf32>
    %c0_268 = arith.constant 0 : index
    %c0_269 = arith.constant 0 : index
    %457 = vector.load %arg25[%c0_268, %c0_269] : memref<1x32xf32, #tpu.memory_space<vmem>>, vector<1x32xf32>
    %458 = arith.mulf %456, %457 : vector<1x32xf32>
    %459 = vector.extract_strided_slice %453 {offsets = [0, 0], sizes = [1, 32], strides = [1, 1]} : vector<1x96xf32> to vector<1x32xf32>
    %460 = arith.mulf %459, %455 : vector<1x32xf32>
    %461 = arith.addf %458, %460 : vector<1x32xf32>
    %462 = vector.extract_strided_slice %453 {offsets = [0, 64], sizes = [1, 32], strides = [1, 1]} : vector<1x96xf32> to vector<1x32xf32>
    %463 = math.tanh %461 : vector<1x32xf32>
    %464 = arith.mulf %462, %463 : vector<1x32xf32>
    %c0_270 = arith.constant 0 : index
    %c0_271 = arith.constant 0 : index
    %465 = vector.load %arg24[%c0_270, %c0_271] : memref<1x32xf32, #tpu.memory_space<vmem>>, vector<1x32xf32>
    tpu.vector_store %arg24[%c0_270, %c0_271], %464 {strides = array<i32>} : memref<1x32xf32, #tpu.memory_space<vmem>>, vector<1x32xf32>,
    %c0_272 = arith.constant 0 : index
    %c0_273 = arith.constant 0 : index
    %466 = vector.load %arg25[%c0_272, %c0_273] : memref<1x32xf32, #tpu.memory_space<vmem>>, vector<1x32xf32>
    tpu.vector_store %arg25[%c0_272, %c0_273], %461 {strides = array<i32>} : memref<1x32xf32, #tpu.memory_space<vmem>>, vector<1x32xf32>,
    %467 = arith.index_cast %c7_i32 : i32 to index
    %c0_274 = arith.constant 0 : index
    %468 = vector.load %arg26[%467, %c0_274] : memref<8x32xf32, #tpu.memory_space<vmem>>, vector<1x32xf32>
    tpu.vector_store %arg26[%467, %c0_274], %464 {strides = array<i32>} : memref<8x32xf32, #tpu.memory_space<vmem>>, vector<1x32xf32>,
    %c8_i32_275 = arith.constant 8 : i32
    %c0_276 = arith.constant 0 : index
    %c0_277 = arith.constant 0 : index
    %469 = vector.load %arg26[%c0_276, %c0_277] : memref<8x32xf32, #tpu.memory_space<vmem>>, vector<8x32xf32>
    %470 = vector.extract_strided_slice %469 {offsets = [0, 0], sizes = [8, 16], strides = [1, 1]} : vector<8x32xf32> to vector<8x16xf32>
    %471 = vector.extract_strided_slice %469 {offsets = [0, 16], sizes = [8, 16], strides = [1, 1]} : vector<8x32xf32> to vector<8x16xf32>
    %472 = tpu.iota {dimensions = array<i32: 0>} : vector<8x8xi32>
    %473 = tpu.iota {dimensions = array<i32: 1>} : vector<8x8xi32>
    %474 = arith.addi %472, %473 : vector<8x8xi32>
    %c7_i32_278 = arith.constant 7 : i32
    %475 = vector.broadcast %c7_i32_278 : i32 to vector<8x8xi32>
    %476 = arith.cmpi eq, %474, %475 : vector<8x8xi32>
    %477 = arith.extui %476 : vector<8x8xi1> to vector<8x8xi32>
    %478 = arith.sitofp %477 : vector<8x8xi32> to vector<8x8xf32>
    %c0_279 = arith.constant 0 : index
    %c0_280 = arith.constant 0 : index
    %479 = vector.load %arg11[%c0_279, %c0_280] : memref<16x8xf32, #tpu.memory_space<vmem>>, vector<16x8xf32>
    %cst_281 = arith.constant dense<0.000000e+00> : vector<8x8xf32>
    %480 = tpu.matmul %470, %479, %cst_281 {dimension_numbers = #tpu.dot_dimension_numbers<[1], [0], [0], [1], [0, 0, 1, 1], [], []>} : vector<8x16xf32>, vector<16x8xf32>, vector<8x8xf32> -> vector<8x8xf32>
    %c0_282 = arith.constant 0 : index
    %c0_283 = arith.constant 0 : index
    %481 = vector.load %arg12[%c0_282, %c0_283] : memref<16x8xf32, #tpu.memory_space<vmem>>, vector<16x8xf32>
    %cst_284 = arith.constant dense<0.000000e+00> : vector<8x8xf32>
    %482 = tpu.matmul %471, %481, %cst_284 {dimension_numbers = #tpu.dot_dimension_numbers<[1], [0], [0], [1], [0, 0, 1, 1], [], []>} : vector<8x16xf32>, vector<16x8xf32>, vector<8x8xf32> -> vector<8x8xf32>
    %cst_285 = arith.constant dense<0.000000e+00> : vector<8x8xf32>
    %483 = tpu.matmul %478, %482, %cst_285 {dimension_numbers = #tpu.dot_dimension_numbers<[1], [0], [0], [1], [0, 0, 1, 1], [], []>} : vector<8x8xf32>, vector<8x8xf32>, vector<8x8xf32> -> vector<8x8xf32>
    %484 = arith.addf %480, %483 : vector<8x8xf32>
    %c0_286 = arith.constant 0 : index
    %c0_287 = arith.constant 0 : index
    %485 = vector.load %arg13[%c0_286, %c0_287] : memref<1x8xf32, #tpu.memory_space<vmem>>, vector<1x8xf32>
    %486 = vector.broadcast %485 : vector<1x8xf32> to vector<8x8xf32>
    %487 = arith.addf %484, %486 : vector<8x8xf32>
    %c0_288 = arith.constant 0 : index
    %c0_289 = arith.constant 0 : index
    %488 = vector.load %arg27[%c0_288, %c0_289] : memref<8x8xf32, #tpu.memory_space<vmem>>, vector<8x8xf32>
    tpu.vector_store %arg27[%c0_288, %c0_289], %487 {strides = array<i32>} : memref<8x8xf32, #tpu.memory_space<vmem>>, vector<8x8xf32>,
    %489 = tpu.iota {dimensions = array<i32: 0>} : vector<8x8xi32>
    %490 = tpu.iota {dimensions = array<i32: 1>} : vector<8x8xi32>
    %491 = arith.cmpi eq, %489, %490 : vector<8x8xi32>
    %492 = arith.extui %491 : vector<8x8xi1> to vector<8x8xi32>
    %493 = arith.sitofp %492 : vector<8x8xi32> to vector<8x8xf32>
    %cst_290 = arith.constant 1.000000e+00 : f32
    %494 = vector.broadcast %cst_290 : f32 to vector<8x8xf32>
    %495 = tpu.iota {dimensions = array<i32: 0>} : vector<8x8xi32>
    %496 = arith.sitofp %495 : vector<8x8xi32> to vector<8x8xf32>
    %c0_291 = arith.constant 0 : index
    %c0_292 = arith.constant 0 : index
    %497 = vector.load %arg16[%c0_291, %c0_292] : memref<8x8xf32, #tpu.memory_space<vmem>>, vector<8x8xf32>
    %498 = tpu.iota {dimensions = array<i32: 1>} : vector<1x8xi32>
    %c3_i32_293 = arith.constant 3 : i32
    %499 = vector.broadcast %c3_i32_293 : i32 to vector<1x8xi32>
    %500 = arith.cmpi eq, %498, %499 : vector<1x8xi32>
    %cst_294 = arith.constant 0.000000e+00 : f32
    %cst_295 = arith.constant -1.000000e+04 : f32
    %501 = vector.broadcast %cst_294 : f32 to vector<1x8xf32>
    %502 = vector.broadcast %cst_295 : f32 to vector<1x8xf32>
    %503 = arith.select %500, %501, %502 : vector<1x8xi1>, vector<1x8xf32>
    %c0_i32_296 = arith.constant 0 : i32
    %504 = vector.broadcast %503 : vector<1x8xf32> to vector<8x8xf32>
    %505 = arith.mulf %493, %504 : vector<8x8xf32>
    %cst_297 = arith.constant dense<0.000000e+00> : vector<8x8xf32>
    %506 = tpu.matmul %505, %494, %cst_297 {dimension_numbers = #tpu.dot_dimension_numbers<[1], [0], [0], [1], [0, 0, 1, 1], [], []>} : vector<8x8xf32>, vector<8x8xf32>, vector<8x8xf32> -> vector<8x8xf32>
    %507 = arith.addf %506, %497 : vector<8x8xf32>
    %cst_298 = arith.constant dense<0xFF800000> : vector<8xf32>
    %508 = vector.multi_reduction <maximumf>, %507, %cst_298 [0] : vector<8x8xf32> to vector<8xf32>
    %509 = vector.shape_cast %508 : vector<8xf32> to vector<1x8xf32>
    %510 = vector.broadcast %509 : vector<1x8xf32> to vector<8x8xf32>
    %511 = arith.cmpf oeq, %507, %510 : vector<8x8xf32>
    %cst_299 = arith.constant 8.000000e+00 : f32
    %512 = vector.broadcast %cst_299 : f32 to vector<8x8xf32>
    %513 = arith.select %511, %496, %512 : vector<8x8xi1>, vector<8x8xf32>
    %cst_300 = arith.constant dense<0x7F800000> : vector<8xf32>
    %514 = vector.multi_reduction <minimumf>, %513, %cst_300 [0] : vector<8x8xf32> to vector<8xf32>
    %515 = vector.shape_cast %514 : vector<8xf32> to vector<1x8xf32>
    %516 = arith.index_cast %c0_i32_296 : i32 to index
    %c0_301 = arith.constant 0 : index
    %517 = vector.load %arg28[%516, %c0_301] : memref<8x8xf32, #tpu.memory_space<vmem>>, vector<1x8xf32>
    tpu.vector_store %arg28[%516, %c0_301], %515 {strides = array<i32>} : memref<8x8xf32, #tpu.memory_space<vmem>>, vector<1x8xf32>,
    %518 = arith.index_cast %c0_i32_296 : i32 to index
    %c0_302 = arith.constant 0 : index
    %519 = vector.load %arg27[%518, %c0_302] : memref<8x8xf32, #tpu.memory_space<vmem>>, vector<1x8xf32>
    %520 = arith.addf %509, %519 : vector<1x8xf32>
    %c1_i32_303 = arith.constant 1 : i32
    %521 = vector.broadcast %520 : vector<1x8xf32> to vector<8x8xf32>
    %522 = arith.mulf %493, %521 : vector<8x8xf32>
    %cst_304 = arith.constant dense<0.000000e+00> : vector<8x8xf32>
    %523 = tpu.matmul %522, %494, %cst_304 {dimension_numbers = #tpu.dot_dimension_numbers<[1], [0], [0], [1], [0, 0, 1, 1], [], []>} : vector<8x8xf32>, vector<8x8xf32>, vector<8x8xf32> -> vector<8x8xf32>
    %524 = arith.addf %523, %497 : vector<8x8xf32>
    %cst_305 = arith.constant dense<0xFF800000> : vector<8xf32>
    %525 = vector.multi_reduction <maximumf>, %524, %cst_305 [0] : vector<8x8xf32> to vector<8xf32>
    %526 = vector.shape_cast %525 : vector<8xf32> to vector<1x8xf32>
    %527 = vector.broadcast %526 : vector<1x8xf32> to vector<8x8xf32>
    %528 = arith.cmpf oeq, %524, %527 : vector<8x8xf32>
    %cst_306 = arith.constant 8.000000e+00 : f32
    %529 = vector.broadcast %cst_306 : f32 to vector<8x8xf32>
    %530 = arith.select %528, %496, %529 : vector<8x8xi1>, vector<8x8xf32>
    %cst_307 = arith.constant dense<0x7F800000> : vector<8xf32>
    %531 = vector.multi_reduction <minimumf>, %530, %cst_307 [0] : vector<8x8xf32> to vector<8xf32>
    %532 = vector.shape_cast %531 : vector<8xf32> to vector<1x8xf32>
    %533 = arith.index_cast %c1_i32_303 : i32 to index
    %c0_308 = arith.constant 0 : index
    %534 = vector.load %arg28[%533, %c0_308] : memref<8x8xf32, #tpu.memory_space<vmem>>, vector<1x8xf32>
    tpu.vector_store %arg28[%533, %c0_308], %532 {strides = array<i32>} : memref<8x8xf32, #tpu.memory_space<vmem>>, vector<1x8xf32>,
    %535 = arith.index_cast %c1_i32_303 : i32 to index
    %c0_309 = arith.constant 0 : index
    %536 = vector.load %arg27[%535, %c0_309] : memref<8x8xf32, #tpu.memory_space<vmem>>, vector<1x8xf32>
    %537 = arith.addf %526, %536 : vector<1x8xf32>
    %c2_i32_310 = arith.constant 2 : i32
    %538 = vector.broadcast %537 : vector<1x8xf32> to vector<8x8xf32>
    %539 = arith.mulf %493, %538 : vector<8x8xf32>
    %cst_311 = arith.constant dense<0.000000e+00> : vector<8x8xf32>
    %540 = tpu.matmul %539, %494, %cst_311 {dimension_numbers = #tpu.dot_dimension_numbers<[1], [0], [0], [1], [0, 0, 1, 1], [], []>} : vector<8x8xf32>, vector<8x8xf32>, vector<8x8xf32> -> vector<8x8xf32>
    %541 = arith.addf %540, %497 : vector<8x8xf32>
    %cst_312 = arith.constant dense<0xFF800000> : vector<8xf32>
    %542 = vector.multi_reduction <maximumf>, %541, %cst_312 [0] : vector<8x8xf32> to vector<8xf32>
    %543 = vector.shape_cast %542 : vector<8xf32> to vector<1x8xf32>
    %544 = vector.broadcast %543 : vector<1x8xf32> to vector<8x8xf32>
    %545 = arith.cmpf oeq, %541, %544 : vector<8x8xf32>
    %cst_313 = arith.constant 8.000000e+00 : f32
    %546 = vector.broadcast %cst_313 : f32 to vector<8x8xf32>
    %547 = arith.select %545, %496, %546 : vector<8x8xi1>, vector<8x8xf32>
    %cst_314 = arith.constant dense<0x7F800000> : vector<8xf32>
    %548 = vector.multi_reduction <minimumf>, %547, %cst_314 [0] : vector<8x8xf32> to vector<8xf32>
    %549 = vector.shape_cast %548 : vector<8xf32> to vector<1x8xf32>
    %550 = arith.index_cast %c2_i32_310 : i32 to index
    %c0_315 = arith.constant 0 : index
    %551 = vector.load %arg28[%550, %c0_315] : memref<8x8xf32, #tpu.memory_space<vmem>>, vector<1x8xf32>
    tpu.vector_store %arg28[%550, %c0_315], %549 {strides = array<i32>} : memref<8x8xf32, #tpu.memory_space<vmem>>, vector<1x8xf32>,
    %552 = arith.index_cast %c2_i32_310 : i32 to index
    %c0_316 = arith.constant 0 : index
    %553 = vector.load %arg27[%552, %c0_316] : memref<8x8xf32, #tpu.memory_space<vmem>>, vector<1x8xf32>
    %554 = arith.addf %543, %553 : vector<1x8xf32>
    %c3_i32_317 = arith.constant 3 : i32
    %555 = vector.broadcast %554 : vector<1x8xf32> to vector<8x8xf32>
    %556 = arith.mulf %493, %555 : vector<8x8xf32>
    %cst_318 = arith.constant dense<0.000000e+00> : vector<8x8xf32>
    %557 = tpu.matmul %556, %494, %cst_318 {dimension_numbers = #tpu.dot_dimension_numbers<[1], [0], [0], [1], [0, 0, 1, 1], [], []>} : vector<8x8xf32>, vector<8x8xf32>, vector<8x8xf32> -> vector<8x8xf32>
    %558 = arith.addf %557, %497 : vector<8x8xf32>
    %cst_319 = arith.constant dense<0xFF800000> : vector<8xf32>
    %559 = vector.multi_reduction <maximumf>, %558, %cst_319 [0] : vector<8x8xf32> to vector<8xf32>
    %560 = vector.shape_cast %559 : vector<8xf32> to vector<1x8xf32>
    %561 = vector.broadcast %560 : vector<1x8xf32> to vector<8x8xf32>
    %562 = arith.cmpf oeq, %558, %561 : vector<8x8xf32>
    %cst_320 = arith.constant 8.000000e+00 : f32
    %563 = vector.broadcast %cst_320 : f32 to vector<8x8xf32>
    %564 = arith.select %562, %496, %563 : vector<8x8xi1>, vector<8x8xf32>
    %cst_321 = arith.constant dense<0x7F800000> : vector<8xf32>
    %565 = vector.multi_reduction <minimumf>, %564, %cst_321 [0] : vector<8x8xf32> to vector<8xf32>
    %566 = vector.shape_cast %565 : vector<8xf32> to vector<1x8xf32>
    %567 = arith.index_cast %c3_i32_317 : i32 to index
    %c0_322 = arith.constant 0 : index
    %568 = vector.load %arg28[%567, %c0_322] : memref<8x8xf32, #tpu.memory_space<vmem>>, vector<1x8xf32>
    tpu.vector_store %arg28[%567, %c0_322], %566 {strides = array<i32>} : memref<8x8xf32, #tpu.memory_space<vmem>>, vector<1x8xf32>,
    %569 = arith.index_cast %c3_i32_317 : i32 to index
    %c0_323 = arith.constant 0 : index
    %570 = vector.load %arg27[%569, %c0_323] : memref<8x8xf32, #tpu.memory_space<vmem>>, vector<1x8xf32>
    %571 = arith.addf %560, %570 : vector<1x8xf32>
    %c4_i32_324 = arith.constant 4 : i32
    %572 = vector.broadcast %571 : vector<1x8xf32> to vector<8x8xf32>
    %573 = arith.mulf %493, %572 : vector<8x8xf32>
    %cst_325 = arith.constant dense<0.000000e+00> : vector<8x8xf32>
    %574 = tpu.matmul %573, %494, %cst_325 {dimension_numbers = #tpu.dot_dimension_numbers<[1], [0], [0], [1], [0, 0, 1, 1], [], []>} : vector<8x8xf32>, vector<8x8xf32>, vector<8x8xf32> -> vector<8x8xf32>
    %575 = arith.addf %574, %497 : vector<8x8xf32>
    %cst_326 = arith.constant dense<0xFF800000> : vector<8xf32>
    %576 = vector.multi_reduction <maximumf>, %575, %cst_326 [0] : vector<8x8xf32> to vector<8xf32>
    %577 = vector.shape_cast %576 : vector<8xf32> to vector<1x8xf32>
    %578 = vector.broadcast %577 : vector<1x8xf32> to vector<8x8xf32>
    %579 = arith.cmpf oeq, %575, %578 : vector<8x8xf32>
    %cst_327 = arith.constant 8.000000e+00 : f32
    %580 = vector.broadcast %cst_327 : f32 to vector<8x8xf32>
    %581 = arith.select %579, %496, %580 : vector<8x8xi1>, vector<8x8xf32>
    %cst_328 = arith.constant dense<0x7F800000> : vector<8xf32>
    %582 = vector.multi_reduction <minimumf>, %581, %cst_328 [0] : vector<8x8xf32> to vector<8xf32>
    %583 = vector.shape_cast %582 : vector<8xf32> to vector<1x8xf32>
    %584 = arith.index_cast %c4_i32_324 : i32 to index
    %c0_329 = arith.constant 0 : index
    %585 = vector.load %arg28[%584, %c0_329] : memref<8x8xf32, #tpu.memory_space<vmem>>, vector<1x8xf32>
    tpu.vector_store %arg28[%584, %c0_329], %583 {strides = array<i32>} : memref<8x8xf32, #tpu.memory_space<vmem>>, vector<1x8xf32>,
    %586 = arith.index_cast %c4_i32_324 : i32 to index
    %c0_330 = arith.constant 0 : index
    %587 = vector.load %arg27[%586, %c0_330] : memref<8x8xf32, #tpu.memory_space<vmem>>, vector<1x8xf32>
    %588 = arith.addf %577, %587 : vector<1x8xf32>
    %c5_i32_331 = arith.constant 5 : i32
    %589 = vector.broadcast %588 : vector<1x8xf32> to vector<8x8xf32>
    %590 = arith.mulf %493, %589 : vector<8x8xf32>
    %cst_332 = arith.constant dense<0.000000e+00> : vector<8x8xf32>
    %591 = tpu.matmul %590, %494, %cst_332 {dimension_numbers = #tpu.dot_dimension_numbers<[1], [0], [0], [1], [0, 0, 1, 1], [], []>} : vector<8x8xf32>, vector<8x8xf32>, vector<8x8xf32> -> vector<8x8xf32>
    %592 = arith.addf %591, %497 : vector<8x8xf32>
    %cst_333 = arith.constant dense<0xFF800000> : vector<8xf32>
    %593 = vector.multi_reduction <maximumf>, %592, %cst_333 [0] : vector<8x8xf32> to vector<8xf32>
    %594 = vector.shape_cast %593 : vector<8xf32> to vector<1x8xf32>
    %595 = vector.broadcast %594 : vector<1x8xf32> to vector<8x8xf32>
    %596 = arith.cmpf oeq, %592, %595 : vector<8x8xf32>
    %cst_334 = arith.constant 8.000000e+00 : f32
    %597 = vector.broadcast %cst_334 : f32 to vector<8x8xf32>
    %598 = arith.select %596, %496, %597 : vector<8x8xi1>, vector<8x8xf32>
    %cst_335 = arith.constant dense<0x7F800000> : vector<8xf32>
    %599 = vector.multi_reduction <minimumf>, %598, %cst_335 [0] : vector<8x8xf32> to vector<8xf32>
    %600 = vector.shape_cast %599 : vector<8xf32> to vector<1x8xf32>
    %601 = arith.index_cast %c5_i32_331 : i32 to index
    %c0_336 = arith.constant 0 : index
    %602 = vector.load %arg28[%601, %c0_336] : memref<8x8xf32, #tpu.memory_space<vmem>>, vector<1x8xf32>
    tpu.vector_store %arg28[%601, %c0_336], %600 {strides = array<i32>} : memref<8x8xf32, #tpu.memory_space<vmem>>, vector<1x8xf32>,
    %603 = arith.index_cast %c5_i32_331 : i32 to index
    %c0_337 = arith.constant 0 : index
    %604 = vector.load %arg27[%603, %c0_337] : memref<8x8xf32, #tpu.memory_space<vmem>>, vector<1x8xf32>
    %605 = arith.addf %594, %604 : vector<1x8xf32>
    %c6_i32_338 = arith.constant 6 : i32
    %606 = vector.broadcast %605 : vector<1x8xf32> to vector<8x8xf32>
    %607 = arith.mulf %493, %606 : vector<8x8xf32>
    %cst_339 = arith.constant dense<0.000000e+00> : vector<8x8xf32>
    %608 = tpu.matmul %607, %494, %cst_339 {dimension_numbers = #tpu.dot_dimension_numbers<[1], [0], [0], [1], [0, 0, 1, 1], [], []>} : vector<8x8xf32>, vector<8x8xf32>, vector<8x8xf32> -> vector<8x8xf32>
    %609 = arith.addf %608, %497 : vector<8x8xf32>
    %cst_340 = arith.constant dense<0xFF800000> : vector<8xf32>
    %610 = vector.multi_reduction <maximumf>, %609, %cst_340 [0] : vector<8x8xf32> to vector<8xf32>
    %611 = vector.shape_cast %610 : vector<8xf32> to vector<1x8xf32>
    %612 = vector.broadcast %611 : vector<1x8xf32> to vector<8x8xf32>
    %613 = arith.cmpf oeq, %609, %612 : vector<8x8xf32>
    %cst_341 = arith.constant 8.000000e+00 : f32
    %614 = vector.broadcast %cst_341 : f32 to vector<8x8xf32>
    %615 = arith.select %613, %496, %614 : vector<8x8xi1>, vector<8x8xf32>
    %cst_342 = arith.constant dense<0x7F800000> : vector<8xf32>
    %616 = vector.multi_reduction <minimumf>, %615, %cst_342 [0] : vector<8x8xf32> to vector<8xf32>
    %617 = vector.shape_cast %616 : vector<8xf32> to vector<1x8xf32>
    %618 = arith.index_cast %c6_i32_338 : i32 to index
    %c0_343 = arith.constant 0 : index
    %619 = vector.load %arg28[%618, %c0_343] : memref<8x8xf32, #tpu.memory_space<vmem>>, vector<1x8xf32>
    tpu.vector_store %arg28[%618, %c0_343], %617 {strides = array<i32>} : memref<8x8xf32, #tpu.memory_space<vmem>>, vector<1x8xf32>,
    %620 = arith.index_cast %c6_i32_338 : i32 to index
    %c0_344 = arith.constant 0 : index
    %621 = vector.load %arg27[%620, %c0_344] : memref<8x8xf32, #tpu.memory_space<vmem>>, vector<1x8xf32>
    %622 = arith.addf %611, %621 : vector<1x8xf32>
    %c7_i32_345 = arith.constant 7 : i32
    %623 = vector.broadcast %622 : vector<1x8xf32> to vector<8x8xf32>
    %624 = arith.mulf %493, %623 : vector<8x8xf32>
    %cst_346 = arith.constant dense<0.000000e+00> : vector<8x8xf32>
    %625 = tpu.matmul %624, %494, %cst_346 {dimension_numbers = #tpu.dot_dimension_numbers<[1], [0], [0], [1], [0, 0, 1, 1], [], []>} : vector<8x8xf32>, vector<8x8xf32>, vector<8x8xf32> -> vector<8x8xf32>
    %626 = arith.addf %625, %497 : vector<8x8xf32>
    %cst_347 = arith.constant dense<0xFF800000> : vector<8xf32>
    %627 = vector.multi_reduction <maximumf>, %626, %cst_347 [0] : vector<8x8xf32> to vector<8xf32>
    %628 = vector.shape_cast %627 : vector<8xf32> to vector<1x8xf32>
    %629 = vector.broadcast %628 : vector<1x8xf32> to vector<8x8xf32>
    %630 = arith.cmpf oeq, %626, %629 : vector<8x8xf32>
    %cst_348 = arith.constant 8.000000e+00 : f32
    %631 = vector.broadcast %cst_348 : f32 to vector<8x8xf32>
    %632 = arith.select %630, %496, %631 : vector<8x8xi1>, vector<8x8xf32>
    %cst_349 = arith.constant dense<0x7F800000> : vector<8xf32>
    %633 = vector.multi_reduction <minimumf>, %632, %cst_349 [0] : vector<8x8xf32> to vector<8xf32>
    %634 = vector.shape_cast %633 : vector<8xf32> to vector<1x8xf32>
    %635 = arith.index_cast %c7_i32_345 : i32 to index
    %c0_350 = arith.constant 0 : index
    %636 = vector.load %arg28[%635, %c0_350] : memref<8x8xf32, #tpu.memory_space<vmem>>, vector<1x8xf32>
    tpu.vector_store %arg28[%635, %c0_350], %634 {strides = array<i32>} : memref<8x8xf32, #tpu.memory_space<vmem>>, vector<1x8xf32>,
    %637 = arith.index_cast %c7_i32_345 : i32 to index
    %c0_351 = arith.constant 0 : index
    %638 = vector.load %arg27[%637, %c0_351] : memref<8x8xf32, #tpu.memory_space<vmem>>, vector<1x8xf32>
    %639 = arith.addf %628, %638 : vector<1x8xf32>
    %c8_i32_352 = arith.constant 8 : i32
    %c0_353 = arith.constant 0 : index
    %c0_354 = arith.constant 0 : index
    %640 = vector.load %arg18[%c0_353, %c0_354] : memref<1x8xf32, #tpu.memory_space<vmem>>, vector<1x8xf32>
    tpu.vector_store %arg18[%c0_353, %c0_354], %639 {strides = array<i32>} : memref<1x8xf32, #tpu.memory_space<vmem>>, vector<1x8xf32>,
    %c0_355 = arith.constant 0 : index
    %c0_356 = arith.constant 0 : index
    %641 = vector.load %arg28[%c0_355, %c0_356] : memref<8x8xf32, #tpu.memory_space<vmem>>, vector<8x8xf32>
    %642 = arith.fptosi %641 : vector<8x8xf32> to vector<8x8xi32>
    %c0_357 = arith.constant 0 : index
    %c0_358 = arith.constant 0 : index
    %643 = vector.load %arg17[%c0_357, %c0_358] : memref<8x8xi32, #tpu.memory_space<vmem>>, vector<8x8xi32>
    tpu.vector_store %arg17[%c0_357, %c0_358], %642 {strides = array<i32>} : memref<8x8xi32, #tpu.memory_space<vmem>>, vector<8x8xi32>,
    return
  }
}

</mosaic_0001>

<bundles_post_ra>
// kernel: bilstm_crf_forward.1
= control target key start
LH: loop header
LB: loop body
LE: loop exit
PB: predicated region body
PF: predicated region fallthrough
CT: control target
= control target key end

     0   :  { %vm73_vm0 = vcmask 130048   ;;  %v4128_v0 = vmov 0.0|0.0   ;;  %vm4129_vm1 = vmmov 0   ;;  %v4130_v4 = vmov 0.0   ;;  %s4133_s28 = smov 64   ;;  %s4810_s1 = inlined_call_operand.vmem [shape: f32[16,128], index: 1, kind: input, shape index: {}]   ;;  %s4811_s2 = inlined_call_operand.vmem [shape: f32[32,128], index: 2, kind: input, shape index: {}]   ;;  %s4812_s0 = inlined_call_operand.vmem [shape: f32[48,16], index: 0, kind: input, shape index: {}]   ;;  %s4813_s3 = inlined_call_operand.vmem [shape: f32[1,128], index: 3, kind: input, shape index: {}]   ;;  %s4814_s4 = inlined_call_operand.vmem [shape: s32[8,1], index: 4, kind: input, shape index: {}]   ;;  %s4815_s7 = inlined_call_operand.vmem [shape: f32[32,128], index: 7, kind: input, shape index: {}]   ;;  %s4816_s8 = inlined_call_operand.vmem [shape: f32[32,128], index: 8, kind: input, shape index: {}]   ;;  %s4817_s6 = inlined_call_operand.vmem [shape: f32[32,128], index: 6, kind: input, shape index: {}]   ;;  %s4818_s14 = inlined_call_operand.vmem [shape: f32[8,8], index: 14, kind: input, shape index: {}]   ;;  %s4819_s9 = inlined_call_operand.vmem [shape: f32[32,128], index: 9, kind: input, shape index: {}]   ;;  %s4820_s15 = inlined_call_operand.vmem [shape: f32[8,8], index: 15, kind: input, shape index: {}]   ;;  %s4821_s5 = inlined_call_operand.vmem [shape: f32[8,32], index: 5, kind: input, shape index: {}]   ;;  %s4822_s10 = inlined_call_operand.vmem [shape: f32[1,128], index: 10, kind: input, shape index: {}]   ;;  %s4823_s12 = inlined_call_operand.vmem [shape: f32[16,8], index: 12, kind: input, shape index: {}]   ;;  %s4824_s11 = inlined_call_operand.vmem [shape: f32[16,8], index: 11, kind: input, shape index: {}]   ;;  %s4825_s13 = inlined_call_operand.vmem [shape: f32[1,8], index: 13, kind: input, shape index: {}]   ;;  %s4826_s16 = inlined_call_operand.vmem [shape: f32[8,8], index: 16, kind: input, shape index: {}]   ;;  %s4827_s18 = inlined_call_operand.vmem [shape: f32[1,8], index: 18, kind: output, shape index: {1}]   ;;  %s4828_s17 = inlined_call_operand.vmem [shape: s32[8,8], index: 17, kind: output, shape index: {0}]  }
   0x1   :  { %4832 = sst [smem:[#allocation12_spill]] %s4810_s1  ;;  %3894 = vmatprep.subr.bf16.mxu1 %v4128_v0  ;;  %3642 = vmatprep.mubr.msk.f32.mxu1 %vm4129_vm1, %v4130_v4  ;;  %vm193_vm2 = vcmask 261120   ;;  %v4291_v14 = vld [vmem:[%s4813_s3] ss:$0 sm:$0xff]  ;;  %vm1402_vm9 = vcmask 253952   ;;  %vm1171_vm10 = vcmask 64512  }
   0x2   :  { %4833 = sst [smem:[#allocation13_spill]] %s4811_s2  ;;  %s4835_s29 = sld [smem:[#allocation12_spill]]  ;;  %194 = vst.msk [vmem:[#allocation3] sm:$0xff] %vm193_vm2, %v4130_v4  ;;  %195 = vst.msk [vmem:[#allocation4] sm:$0xff] %vm193_vm2, %v4130_v4  ;;  %vm2736_vm15 = vcmask 57344  }
   0x3   :  { %4834 = sst [smem:[#allocation14_spill]] %s4812_s0  ;;  %s4836_s20 = sld [smem:[#allocation13_spill]]  ;;  %196 = vst.msk [vmem:[#allocation5] sm:$0xff] %vm193_vm2, %v4130_v4 }
   0x4   :  { %s4837_s24 = sld [smem:[#allocation14_spill]]  ;;  %s4131_s2 = smov 32   ;;  %1403 = vst.msk [vmem:[#allocation7] sm:$0x1] %vm1402_vm9, %v4130_v4  ;;  %1404 = vst.msk [vmem:[#allocation8] sm:$0x1] %vm1402_vm9, %v4130_v4 }
   0x5   :  { %s4132_s0 = smov 96  }
   0x8   :  { %v64_v1 = vld [vmem:[%s4835_s29] sm:$0xff]  ;;  %v65_v2 = vld [vmem:[%s4835_s29 + $0x8] sm:$0xff] }
   0x9   :  { %v200_v3 = vld [vmem:[%s4836_s20] sm:$0xff]  ;;  %v3890_v5 = vpack.c.bf16 %v65_v2, %v64_v1  ;;  %v201_v6 = vld [vmem:[%s4836_s20 + $0x8] sm:$0xff]  ;;  %v202_v9 = vld [vmem:[%s4836_s20 + $0x10] sm:$0xff] }
   0xa   :  { %v58_v7 = vld [vmem:[%s4837_s24] sm:$0xff]  ;;  %v4257_v8 = vpack.c.bf16 %v201_v6, %v200_v3  ;;  %v203_v10 = vld [vmem:[%s4836_s20 + $0x18] sm:$0xff]  ;;  %v59_v11 = vld [vmem:[%s4837_s24 + $0x8] sm:$0xff] }
   0xb   :  { %3625 = vmatprep.mubr.msk.f32.mxu0 %vm73_vm0, %v58_v7  ;;  %3891 = vmatprep.subr.bf16.mxu0 %v3890_v5  ;;  %v4270_v12 = vpack.c.bf16 %v203_v10, %v202_v9  ;;  %v199_v13 = vld [vmem:[#allocation3] sm:$0xff]  ;;  %v285_v22 = vld [vmem:[#allocation4] sm:$0xff]  ;;  %v60_v34 = vld [vmem:[%s4837_s24 + $0x10] sm:$0xff] }
   0xc   :  { %3896 = vmatpush3.bf16.msra.mxu1 %v4257_v8  ;;  %3893 = vmatpush3.bf16.msra.mxu0 %v3890_v5  ;;  %v61_v35 = vld [vmem:[%s4837_s24 + $0x18] sm:$0xff]  ;;  %v62_v36 = vld [vmem:[%s4837_s24 + $0x20] sm:$0xff]  ;;  %v63_v37 = vld [vmem:[%s4837_s24 + $0x28] sm:$0xff] }
   0xd   :  { %3897 = vmatprep.subr.bf16.mxu1 %v4128_v0  ;;  %3900 = vmatprep.subr.bf16.mxu0 %v4128_v0 }
   0xf   :  { %3626 = vmatmul.mubr.msk.f32.vlgmr.msra.gmra.mrb[0].mxu0 %vm73_vm0, %v59_v11 }
  0x10   :  { %3899 = vmatpush3.bf16.msra.mxu1 %v4270_v12  ;;  %3902 = vmatpush3.bf16.msra.mxu0 %v4257_v8 }
  0x11   :  { %3903 = vmatprep.subr.bf16.mxu0 %v4128_v0  ;;  %3906 = vmatprep.subr.bf16.mxu1 %v4128_v0 }
  0x12   :  { %3628 = vmatprep.mubr.msk.f32.mxu0 %vm73_vm0, %v60_v34 }
  0x13   :  { %3643 = vmatmul.mubr.msk.f32.vlgmr.msra.gmra.mrb[0].mxu1 %vm193_vm2, %v199_v13  ;;  %3629 = vmatmul.mubr.msk.f32.gmra.mrb[2].mxu0 %vm73_vm0, %v61_v35 }
  0x14   :  { %3905 = vmatpush3.bf16.msra.mxu0 %v4270_v12  ;;  %3908 = vmatpush3.bf16.msra.mxu1 %v4257_v8 }
  0x15   :  { %3909 = vmatprep.subr.bf16.mxu1 %v4128_v0  ;;  %3664 = vmatprep.mubr.msk.f32.mxu1 %vm4129_vm1, %v4130_v4 }
  0x16   :  { %3912 = vmatprep.subr.bf16.mxu0 %v4128_v0  ;;  %3631 = vmatprep.mubr.msk.f32.mxu0 %vm73_vm0, %v62_v36 }
  0x17   :  { %3632 = vmatmul.mubr.msk.f32.gmra.mrb[4].mxu0 %vm73_vm0, %v63_v37 }
  0x18   :  { %3911 = vmatpush3.bf16.msra.mxu1 %v4270_v12  ;;  %3653 = vmatprep.mubr.msk.f32.mxu0 %vm4129_vm1, %v4130_v4 }
  0x19   :  { %3918 = vmatprep.subr.bf16.mxu1 %v4128_v0 }
  0xe2   :  { %v3627_v15 = vpop.f32.mrb[0].mxu0 }
  0xe3   :  { %v158_v16 = vpop.f32.mrb[1].mxu0  ;;  %v164_v48 = vadd.f32 %v3627_v15, %v4291_v14 }
  0xe4   :  { %v159_v17 = vadd.f32 %v4291_v14, %v158_v16 }
  0xe6   :  { %v273_v18 = vpop.f32.mrb[0].mxu1  ;;  %v4323_v42 = vpop.f32.mrb[2].mxu0 }
  0xe7   :  { %v277_v19 = vadd.f32 %v273_v18, %v159_v17  ;;  %v3644_v20 = vpop.f32.mrb[1].mxu1  ;;  %v168_v43 = vpop.f32.mrb[3].mxu0 }
  0xe8   :  { %v169_v9 = vadd.f32 %v4291_v14, %v168_v43 }
  0xe9   :  { %4016 = vtanh.f32 %v277_v19  ;;  %v3439_v23 = vmul.f32 -1.442695, %v277_v19 }
  0xea   :  { %v4333_v46 = vpop.f32.mrb[4].mxu0 }
  0xeb   :  { %4018 = vpow2.f32 %v3439_v23  ;;  %v4335_v47 = vpop.f32.mrb[5].mxu0 }
  0xf3   :  { %v4017_v21 = vpop.eup %4016 }
  0xf4   :  { %292 = vrot.lane.b32.xlu0 %v4017_v21, %s4131_s2 }
  0xf5   :  { %v4019_v24 = vpop.eup %4018 }
  0xf6   :  { %v281_v25 = vadd.f32 1.0, %v4019_v24 }
  0xf8   :  { %287 = vrot.lane.b32.xlu0 %v285_v22, %s4131_s2  ;;  %4020 = vrcp.f32 %v281_v25 }
 0x102   :  { %v4021_v26 = vpop.eup %4020 }
 0x166   :  { %v293_v27 = vpop.permute.xlu0 %292 }
 0x167   :  { %v295_v28 = vmul.f32 %v4021_v26, %v293_v27 }
 0x169   :  { %297 = vrot.lane.b32.xlu1 %v295_v28, %s4131_s2 }
 0x16a   :  { %v288_v29 = vpop.permute.xlu0 %287 }
 0x16b   :  { %v290_v30 = vmul.f32 %v4021_v26, %v288_v29 }
 0x1db   :  { %v298_v31 = vpop.permute.xlu1 %297 }
 0x1dc   :  { %v300_v32 = vadd.f32 %v298_v31, %v290_v30 }
 0x1de   :  { %4022 = vtanh.f32 %v300_v32 }
 0x1e8   :  { %v4023_v33 = vpop.eup %4022 }
 0x1e9   :  { %303 = vrot.lane.b32.xlu1 %v4023_v33, %s4131_s2  ;;  %v174_v33 = vadd.f32 %v4323_v42, %v4291_v14 }
 0x1ed   :  { %313 = vrot.lane.b32.xlu1 %v300_v32, %s4132_s0 }
 0x25b   :  { %v304_v38 = vpop.permute.xlu1 %303 }
 0x25c   :  { %v4317_v39 = vmul.f32 %v4021_v26, %v304_v38 }
 0x25e   :  { %308 = vrot.lane.b32.xlu0 %v4317_v39, %s4133_s28 }
 0x25f   :  { %v314_v40 = vpop.permute.xlu1 %313 }
 0x260   :  { %316 = vst.msk [vmem:[#allocation4] sm:$0xff] %vm193_vm2, %v314_v40 }
 0x267   :  { %v421_v41 = vld [vmem:[#allocation4] sm:$0xff] }
 0x268   :  { %423 = vrot.lane.b32.xlu1 %v421_v41, %s4131_s2 }
 0x2d0   :  { %v309_v44 = vpop.permute.xlu0 %308 }
 0x2d1   :  { %311 = vst.msk [vmem:[#allocation3] sm:$0xff] %vm193_vm2, %v309_v44 }
 0x2d8   :  { %v335_v45 = vld [vmem:[#allocation3] sm:$0xff] }
 0x2d9   :  { %3654 = vmatmul.mubr.msk.f32.vlgmr.msra.gmra.mrb[6].mxu0 %vm193_vm2, %v335_v45 }
 0x2da   :  { %3914 = vmatpush3.bf16.msra.mxu0 %v4257_v8  ;;  %3675 = vmatprep.mubr.msk.f32.mxu0 %vm4129_vm1, %v4130_v4  ;;  %v424_v59 = vpop.permute.xlu1 %423 }
 0x2db   :  { %3915 = vmatprep.subr.bf16.mxu0 %v4128_v0 }
 0x2de   :  { %3917 = vmatpush3.bf16.msra.mxu0 %v4270_v12 }
 0x2df   :  { %3924 = vmatprep.subr.bf16.mxu0 %v4128_v0 }
 0x3ac   :  { %v409_v49 = vpop.f32.mrb[6].mxu0 }
 0x3ad   :  { %v413_v50 = vadd.f32 %v409_v49, %v164_v48  ;;  %v3655_v51 = vpop.f32.mrb[7].mxu0 }
 0x3af   :  { %4024 = vtanh.f32 %v413_v50  ;;  %v3442_v53 = vmul.f32 -1.442695, %v413_v50 }
 0x3b1   :  { %4026 = vpow2.f32 %v3442_v53 }
 0x3b9   :  { %v4025_v52 = vpop.eup %4024 }
 0x3ba   :  { %428 = vrot.lane.b32.xlu0 %v4025_v52, %s4131_s2 }
 0x3bb   :  { %v4027_v54 = vpop.eup %4026 }
 0x3bc   :  { %v417_v55 = vadd.f32 1.0, %v4027_v54 }
 0x3be   :  { %4028 = vrcp.f32 %v417_v55 }
 0x3c8   :  { %v4029_v56 = vpop.eup %4028 }
 0x3c9   :  { %v426_v60 = vmul.f32 %v4029_v56, %v424_v59 }
 0x42c   :  { %v429_v57 = vpop.permute.xlu0 %428 }
 0x42d   :  { %v431_v58 = vmul.f32 %v4029_v56, %v429_v57 }
 0x42f   :  { %433 = vrot.lane.b32.xlu0 %v431_v58, %s4131_s2 }
 0x4a1   :  { %v434_v61 = vpop.permute.xlu0 %433 }
 0x4a2   :  { %v436_v62 = vadd.f32 %v434_v61, %v426_v60 }
 0x4a4   :  { %4030 = vtanh.f32 %v436_v62 }
 0x4ae   :  { %v4031_v63 = vpop.eup %4030 }
 0x4af   :  { %439 = vrot.lane.b32.xlu1 %v4031_v63, %s4131_s2 }
 0x4b3   :  { %449 = vrot.lane.b32.xlu1 %v436_v62, %s4132_s0 }
 0x521   :  { %v440_v1 = vpop.permute.xlu1 %439 }
 0x522   :  { %v4342_v2 = vmul.f32 %v4029_v56, %v440_v1  ;;  %v179_v56 = vadd.f32 %v4291_v14, %v4335_v47 }
 0x524   :  { %444 = vrot.lane.b32.xlu0 %v4342_v2, %s4133_s28 }
 0x525   :  { %v450_v3 = vpop.permute.xlu1 %449 }
 0x526   :  { %452 = vst.msk [vmem:[#allocation4] sm:$0xff] %vm193_vm2, %v450_v3 }
 0x52d   :  { %v557_v5 = vld [vmem:[#allocation4] sm:$0xff] }
 0x52e   :  { %559 = vrot.lane.b32.xlu1 %v557_v5, %s4131_s2 }
 0x596   :  { %v445_v6 = vpop.permute.xlu0 %444 }
 0x597   :  { %447 = vst.msk [vmem:[#allocation3] sm:$0xff] %vm193_vm2, %v445_v6 }
 0x59e   :  { %v471_v7 = vld [vmem:[#allocation3] sm:$0xff] }
 0x59f   :  { %3665 = vmatmul.mubr.msk.f32.vlgmr.msra.gmra.mrb[2].mxu1 %vm193_vm2, %v471_v7 }
 0x5a0   :  { %3920 = vmatpush3.bf16.msra.mxu1 %v4257_v8  ;;  %3686 = vmatprep.mubr.msk.f32.mxu1 %vm4129_vm1, %v4130_v4  ;;  %v560_v22 = vpop.permute.xlu1 %559 }
 0x5a1   :  { %3921 = vmatprep.subr.bf16.mxu1 %v4128_v0 }
 0x5a4   :  { %3923 = vmatpush3.bf16.msra.mxu1 %v4270_v12 }
 0x5a5   :  { %3930 = vmatprep.subr.bf16.mxu1 %v4128_v0 }
 0x672   :  { %v545_v10 = vpop.f32.mrb[2].mxu1 }
 0x673   :  { %v549_v11 = vadd.f32 %v545_v10, %v169_v9  ;;  %v3666_v13 = vpop.f32.mrb[3].mxu1 }
 0x675   :  { %4032 = vtanh.f32 %v549_v11  ;;  %v3445_v16 = vmul.f32 -1.442695, %v549_v11  ;;  %v4134_v11 = vmov 0  }
 0x676   :  { %4015 = vset.pattern.permute.xlu0 %v4134_v11  ;;  %4014 = vset.pattern.permute.xlu1 %v4134_v11 }
 0x677   :  { %4034 = vpow2.f32 %v3445_v16 }
 0x67f   :  { %v4033_v15 = vpop.eup %4032 }
 0x680   :  { %564 = vrot.lane.b32.xlu0 %v4033_v15, %s4131_s2 }
 0x681   :  { %v4035_v17 = vpop.eup %4034 }
 0x682   :  { %v553_v18 = vadd.f32 1.0, %v4035_v17  ;;  %v197_v17 = vld [vmem:[%s4814_s4] sm:$0xff] }
 0x683   :  { %vm318_vm3 = vcmp.eq.s32.totalorder %v197_v17, 0  ;;  %vm590_vm4 = vcmp.eq.s32.totalorder %v197_v17, 2  ;;  %vm726_vm5 = vcmp.eq.s32.totalorder %v197_v17, 3  ;;  %vm998_vm6 = vcmp.eq.s32.totalorder %v197_v17, 5 }
 0x684   :  { %4036 = vrcp.f32 %v553_v18  ;;  %vm454_vm7 = vcmp.eq.s32.totalorder %v197_v17, 1  ;;  %vm862_vm8 = vcmp.eq.s32.totalorder %v197_v17, 4 }
 0x68e   :  { %v4037_v19 = vpop.eup %4036 }
 0x68f   :  { %v562_v23 = vmul.f32 %v4037_v19, %v560_v22  ;;  %v3455_v22 = vsel %vm998_vm6, 1.0, %v4130_v4 }
 0x6f2   :  { %v565_v20 = vpop.permute.xlu0 %564 }
 0x6f3   :  { %v567_v21 = vmul.f32 %v4037_v19, %v565_v20  ;;  %v3446_v20 = vsel %vm590_vm4, 1.0, %v4130_v4 }
 0x6f5   :  { %569 = vrot.lane.b32.xlu0 %v567_v21, %s4131_s2  ;;  %v3449_v21 = vsel %vm726_vm5, 1.0, %v4130_v4 }
 0x767   :  { %v570_v24 = vpop.permute.xlu0 %569 }
 0x768   :  { %v572_v25 = vadd.f32 %v570_v24, %v562_v23 }
 0x76a   :  { %4038 = vtanh.f32 %v572_v25 }
 0x774   :  { %v4039_v26 = vpop.eup %4038 }
 0x775   :  { %575 = vrot.lane.b32.xlu1 %v4039_v26, %s4131_s2 }
 0x779   :  { %585 = vrot.lane.b32.xlu1 %v572_v25, %s4132_s0 }
 0x7e7   :  { %v576_v27 = vpop.permute.xlu1 %575 }
 0x7e8   :  { %v4361_v28 = vmul.f32 %v4037_v19, %v576_v27  ;;  %v3440_v19 = vsel %vm318_vm3, 1.0, %v4130_v4 }
 0x7ea   :  { %580 = vrot.lane.b32.xlu0 %v4361_v28, %s4133_s28 }
 0x7eb   :  { %v586_v29 = vpop.permute.xlu1 %585 }
 0x7ec   :  { %588 = vst.msk [vmem:[#allocation4] sm:$0xff] %vm193_vm2, %v586_v29 }
 0x7f3   :  { %v693_v30 = vld [vmem:[#allocation4] sm:$0xff] }
 0x7f4   :  { %695 = vrot.lane.b32.xlu1 %v693_v30, %s4131_s2 }
 0x85c   :  { %v581_v31 = vpop.permute.xlu0 %580 }
 0x85d   :  { %583 = vst.msk [vmem:[#allocation3] sm:$0xff] %vm193_vm2, %v581_v31 }
 0x864   :  { %v607_v32 = vld [vmem:[#allocation3] sm:$0xff] }
 0x865   :  { %3676 = vmatmul.mubr.msk.f32.vlgmr.msra.gmra.mrb[8].mxu0 %vm193_vm2, %v607_v32 }
 0x866   :  { %3926 = vmatpush3.bf16.msra.mxu0 %v4257_v8  ;;  %3697 = vmatprep.mubr.msk.f32.mxu0 %vm4129_vm1, %v4130_v4  ;;  %v696_v44 = vpop.permute.xlu1 %695 }
 0x867   :  { %3927 = vmatprep.subr.bf16.mxu0 %v4128_v0 }
 0x86a   :  { %3929 = vmatpush3.bf16.msra.mxu0 %v4270_v12 }
 0x86b   :  { %3936 = vmatprep.subr.bf16.mxu0 %v4128_v0 }
 0x938   :  { %v681_v34 = vpop.f32.mrb[8].mxu0 }
 0x939   :  { %v685_v35 = vadd.f32 %v681_v34, %v174_v33  ;;  %v3677_v36 = vpop.f32.mrb[9].mxu0  ;;  %v317_v33 = vld [vmem:[#allocation5] sm:$0xff] }
 0x93a   :  { %v184_v36 = vadd.f32 %v4333_v46, %v4291_v14  ;;  %v3443_v14 = vsel %vm454_vm7, 1.0, %v4130_v4  ;;  %v3452_v46 = vsel %vm862_vm8, 1.0, %v4130_v4 }
 0x93b   :  { %4040 = vtanh.f32 %v685_v35  ;;  %v3448_v8 = vmul.f32 -1.442695, %v685_v35 }
 0x93d   :  { %4042 = vpow2.f32 %v3448_v8 }
 0x945   :  { %v4041_v37 = vpop.eup %4040 }
 0x946   :  { %700 = vrot.lane.b32.xlu0 %v4041_v37, %s4131_s2 }
 0x947   :  { %v4043_v38 = vpop.eup %4042 }
 0x948   :  { %v689_v40 = vadd.f32 1.0, %v4043_v38 }
 0x94a   :  { %4044 = vrcp.f32 %v689_v40 }
 0x954   :  { %v4045_v41 = vpop.eup %4044 }
 0x955   :  { %v698_v45 = vmul.f32 %v4045_v41, %v696_v44 }
 0x9b8   :  { %v701_v43 = vpop.permute.xlu0 %700 }
 0x9b9   :  { %v703_v12 = vmul.f32 %v4045_v41, %v701_v43 }
 0x9bb   :  { %705 = vrot.lane.b32.xlu0 %v703_v12, %s4131_s2 }
 0xa2d   :  { %v706_v42 = vpop.permute.xlu0 %705 }
 0xa2e   :  { %v708_v48 = vadd.f32 %v706_v42, %v698_v45 }
 0xa30   :  { %4046 = vtanh.f32 %v708_v48 }
 0xa3a   :  { %v4047_v49 = vpop.eup %4046 }
 0xa3b   :  { %711 = vrot.lane.b32.xlu1 %v4047_v49, %s4131_s2 }
 0xa3f   :  { %721 = vrot.lane.b32.xlu1 %v708_v48, %s4132_s0 }
 0xaad   :  { %v712_v50 = vpop.permute.xlu1 %711 }
 0xaae   :  { %v4381_v51 = vmul.f32 %v4045_v41, %v712_v50 }
 0xab0   :  { %716 = vrot.lane.b32.xlu0 %v4381_v51, %s4133_s28 }
 0xab1   :  { %v722_v52 = vpop.permute.xlu1 %721 }
 0xab2   :  { %724 = vst.msk [vmem:[#allocation4] sm:$0xff] %vm193_vm2, %v722_v52 }
 0xab9   :  { %v829_v53 = vld [vmem:[#allocation4] sm:$0xff] }
 0xaba   :  { %831 = vrot.lane.b32.xlu1 %v829_v53, %s4131_s2 }
 0xb22   :  { %v717_v54 = vpop.permute.xlu0 %716 }
 0xb23   :  { %719 = vst.msk [vmem:[#allocation3] sm:$0xff] %vm193_vm2, %v717_v54 }
 0xb2a   :  { %v743_v55 = vld [vmem:[#allocation3] sm:$0xff] }
 0xb2b   :  { %3687 = vmatmul.mubr.msk.f32.vlgmr.msra.gmra.mrb[4].mxu1 %vm193_vm2, %v743_v55 }
 0xb2c   :  { %3708 = vmatprep.mubr.msk.f32.mxu1 %vm4129_vm1, %v4130_v4  ;;  %v832_v6 = vpop.permute.xlu1 %831 }
 0xbfe   :  { %v817_v57 = vpop.f32.mrb[4].mxu1 }
 0xbff   :  { %v821_v58 = vadd.f32 %v817_v57, %v179_v56  ;;  %v3688_v59 = vpop.f32.mrb[5].mxu1  ;;  %v1014_v56 = vld [vmem:[%s4815_s7] sm:$0xff]  ;;  %v1015_v57 = vld [vmem:[%s4815_s7 + $0x8] sm:$0xff] }
 0xc01   :  { %4048 = vtanh.f32 %v821_v58  ;;  %v3451_v61 = vmul.f32 -1.442695, %v821_v58  ;;  %v3931_v58 = vpack.c.bf16 %v1015_v57, %v1014_v56 }
 0xc03   :  { %4050 = vpow2.f32 %v3451_v61  ;;  %v1017_v61 = vld [vmem:[%s4815_s7 + $0x18] sm:$0xff]  ;;  %3932 = vmatpush3.bf16.msra.mxu1 %v3931_v58 }
 0xc04   :  { %3933 = vmatprep.subr.bf16.mxu1 %v4128_v0 }
 0xc0b   :  { %v4049_v60 = vpop.eup %4048 }
 0xc0c   :  { %836 = vrot.lane.b32.xlu0 %v4049_v60, %s4131_s2  ;;  %v1016_v60 = vld [vmem:[%s4815_s7 + $0x10] sm:$0xff] }
 0xc0d   :  { %v4051_v62 = vpop.eup %4050 }
 0xc0e   :  { %v825_v63 = vadd.f32 1.0, %v4051_v62  ;;  %v1093_v62 = vld [vmem:[%s4816_s8 + $0x10] sm:$0xff] }
 0xc10   :  { %4052 = vrcp.f32 %v825_v63  ;;  %v3934_v63 = vpack.c.bf16 %v1017_v61, %v1016_v60 }
 0xc12   :  { %3935 = vmatpush3.bf16.msra.mxu1 %v3934_v63 }
 0xc13   :  { %3722 = vmatprep.subr.mxu1 %v4130_v4 }
 0xc1a   :  { %v4053_v1 = vpop.eup %4052 }
 0xc1b   :  { %v834_v7 = vmul.f32 %v4053_v1, %v832_v6 }
 0xc7e   :  { %v837_v3 = vpop.permute.xlu0 %836 }
 0xc7f   :  { %v839_v5 = vmul.f32 %v4053_v1, %v837_v3 }
 0xc81   :  { %841 = vrot.lane.b32.xlu0 %v839_v5, %s4131_s2 }
 0xcf3   :  { %v842_v47 = vpop.permute.xlu0 %841 }
 0xcf4   :  { %v844_v9 = vadd.f32 %v842_v47, %v834_v7 }
 0xcf6   :  { %4054 = vtanh.f32 %v844_v9 }
 0xd00   :  { %v4055_v10 = vpop.eup %4054 }
 0xd01   :  { %847 = vrot.lane.b32.xlu1 %v4055_v10, %s4131_s2 }
 0xd05   :  { %857 = vrot.lane.b32.xlu1 %v844_v9, %s4132_s0 }
 0xd73   :  { %v848_v13 = vpop.permute.xlu1 %847 }
 0xd74   :  { %v4397_v15 = vmul.f32 %v4053_v1, %v848_v13  ;;  %v1094_v1 = vld [vmem:[%s4816_s8 + $0x18] sm:$0xff] }
 0xd75   :  { %v3940_v3 = vpack.c.bf16 %v1094_v1, %v1093_v62 }
 0xd76   :  { %852 = vrot.lane.b32.xlu0 %v4397_v15, %s4133_s28 }
 0xd77   :  { %v858_v16 = vpop.permute.xlu1 %857 }
 0xd78   :  { %860 = vst.msk [vmem:[#allocation4] sm:$0xff] %vm193_vm2, %v858_v16 }
 0xd7f   :  { %v965_v18 = vld [vmem:[#allocation4] sm:$0xff] }
 0xd80   :  { %967 = vrot.lane.b32.xlu1 %v965_v18, %s4131_s2 }
 0xd84   :  { %323 = vperm.xlu1 %4014, %v3440_v19  }
 0xd88   :  { %595 = vperm.xlu1 %4014, %v3446_v20  }
 0xd8c   :  { %731 = vperm.xlu1 %4014, %v3449_v21  }
 0xd90   :  { %1003 = vperm.xlu1 %4014, %v3455_v22  }
 0xde8   :  { %v853_v23 = vpop.permute.xlu0 %852 }
 0xde9   :  { %855 = vst.msk [vmem:[#allocation3] sm:$0xff] %vm193_vm2, %v853_v23 }
 0xdf0   :  { %v879_v24 = vld [vmem:[#allocation3] sm:$0xff] }
 0xdf1   :  { %3698 = vmatmul.mubr.msk.f32.vlgmr.msra.gmra.mrb[10].mxu0 %vm193_vm2, %v879_v24 }
 0xdf2   :  { %3719 = vmatprep.mubr.msk.f32.mxu0 %vm4129_vm1, %v4130_v4  ;;  %v968_v25 = vpop.permute.xlu1 %967 }
 0xe03   :  { %v324_v26 = vpop.permute.xlu1 %323 }
 0xe04   :  { %v326_v27 = vmul.f32 %v324_v26, %v4317_v39  ;;  %v3464_v26 = vld [vmem:[#allocation8] ss:$0 sm:$0xff] }
 0xe06   :  { %328 = vrot.lane.b32.xlu1 %v326_v27, %s4133_s28  ;;  %v1166_v27 = vld [vmem:[%s4817_s6] sm:$0xff] }
 0xe07   :  { %v596_v29 = vpop.permute.xlu1 %595 }
 0xe08   :  { %v598_v30 = vmul.f32 %v596_v29, %v4361_v28  ;;  %v1167_v29 = vld [vmem:[%s4817_s6 + $0x8] sm:$0xff] }
 0xe0a   :  { %600 = vrot.lane.b32.xlu1 %v598_v30, %s4133_s28  ;;  %v1170_v30 = vld [vmem:[%s4818_s14] sm:$0xff] }
 0xe0b   :  { %v732_v31 = vpop.permute.xlu1 %731 }
 0xe0c   :  { %v734_v54 = vmul.f32 %v732_v31, %v4381_v51  ;;  %v1092_v51 = vld [vmem:[%s4816_s8 + $0x8] sm:$0xff]  ;;  %v3943_v31 = vpack.c.bf16 %v1167_v29, %v1166_v27 }
 0xe0f   :  { %v4418_v32 = vpop.permute.xlu1 %1003 }
 0xe78   :  { %v329_v34 = vpop.permute.xlu1 %328 }
 0xe79   :  { %v331_v35 = vadd.f32 %v329_v34, %v317_v33  ;;  %v1408_v33 = vld [vmem:[%s4819_s9 + $0x8] sm:$0xff] }
 0xe7b   :  { %332 = vst.msk [vmem:[#allocation5] sm:$0xff] %vm193_vm2, %v331_v35 }
 0xe7c   :  { %v601_v11 = vpop.permute.xlu1 %600 }
 0xe82   :  { %v453_v9 = vld [vmem:[#allocation5] sm:$0xff] }
 0xec4   :  { %v953_v37 = vpop.f32.mrb[10].mxu0 }
 0xec5   :  { %v957_v39 = vadd.f32 %v953_v37, %v184_v36  ;;  %v3699_v8 = vpop.f32.mrb[11].mxu0  ;;  %v1168_v36 = vld [vmem:[%s4817_s6 + $0x10] sm:$0xff]  ;;  %v1169_v37 = vld [vmem:[%s4817_s6 + $0x18] sm:$0xff] }
 0xec7   :  { %4056 = vtanh.f32 %v957_v39  ;;  %v3454_v28 = vmul.f32 -1.442695, %v957_v39 }
 0xec9   :  { %4058 = vpow2.f32 %v3454_v28 }
 0xed1   :  { %v4057_v38 = vpop.eup %4056 }
 0xed2   :  { %972 = vrot.lane.b32.xlu0 %v4057_v38, %s4131_s2  ;;  %v1318_v38 = vld [vmem:[%s4820_s15] sm:$0xff] }
 0xed3   :  { %v4059_v40 = vpop.eup %4058 }
 0xed4   :  { %v961_v41 = vadd.f32 1.0, %v4059_v40  ;;  %v3946_v40 = vpack.c.bf16 %v1169_v37, %v1168_v36 }
 0xed6   :  { %4060 = vrcp.f32 %v961_v41  ;;  %v1409_v41 = vld [vmem:[%s4819_s9 + $0x10] sm:$0xff] }
 0xee0   :  { %v4061_v43 = vpop.eup %4060 }
 0xee1   :  { %v970_v45 = vmul.f32 %v4061_v43, %v968_v25 }
 0xf44   :  { %v973_v12 = vpop.permute.xlu0 %972 }
 0xf45   :  { %v975_v44 = vmul.f32 %v4061_v43, %v973_v12 }
 0xf47   :  { %977 = vrot.lane.b32.xlu0 %v975_v44, %s4131_s2  ;;  %v1165_v44 = vld [vmem:[%s4821_s5] sm:$0xff] }
 0xf4b   :  { %459 = vperm.xlu0 %4015, %v3443_v14   ;;  %v1406_v14 = vld [vmem:[#allocation7] sm:$0x1] }
 0xf4f   :  { %867 = vperm.xlu0 %4015, %v3452_v46  }
 0xfb9   :  { %v978_v42 = vpop.permute.xlu0 %977 }
 0xfba   :  { %v4427_v48 = vadd.f32 %v978_v42, %v970_v45 }
 0xfbc   :  { %4062 = vtanh.f32 %v4427_v48 }
 0xfc6   :  { %v4063_v49 = vpop.eup %4062 }
 0xfc7   :  { %983 = vrot.lane.b32.xlu0 %v4063_v49, %s4131_s2 }
 0xfca   :  { %v460_v50 = vpop.permute.xlu0 %459 }
 0xfcb   :  { %v462_v52 = vmul.f32 %v460_v50, %v4342_v2  ;;  %v1091_v2 = vld [vmem:[%s4816_s8] sm:$0xff] }
 0xfcc   :  { %v3937_v59 = vpack.c.bf16 %v1092_v51, %v1091_v2 }
 0xfcd   :  { %464 = vrot.lane.b32.xlu0 %v462_v52, %s4133_s28 }
 0xfce   :  { %v868_v53 = vpop.permute.xlu0 %867  ;;  %3938 = vmatpush3.bf16.msra.mxu0 %v3937_v59 }
 0xfcf   :  { %v870_v55 = vmul.f32 %v868_v53, %v4397_v15  ;;  %3939 = vmatprep.subr.bf16.mxu0 %v4128_v0 }
 0xfd1   :  { %872 = vrot.lane.b32.xlu1 %v870_v55, %s4133_s28  ;;  %736 = vrot.lane.b32.xlu0 %v734_v54, %s4133_s28  ;;  %v3461_v54 = vld [vmem:[%s4822_s10] ss:$0 sm:$0xff] }
 0xfd2   :  { %3941 = vmatpush3.bf16.msra.mxu0 %v3940_v3 }
 0xfd3   :  { %3738 = vmatprep.subr.mxu0 %v4130_v4 }
0x1039   :  { %v984_v5 = vpop.permute.xlu0 %983 }
0x103a   :  { %v4464_v6 = vmul.f32 %v4061_v43, %v984_v5  ;;  %v1410_v43 = vld [vmem:[%s4819_s9 + $0x18] sm:$0xff] }
0x103b   :  { %v4528_v12 = vpack.c.bf16 %v1410_v43, %v1409_v41 }
0x103c   :  { %v1006_v7 = vmul.f32 %v4418_v32, %v4464_v6  ;;  %v1407_v32 = vld [vmem:[%s4819_s9] sm:$0xff] }
0x103d   :  { %v4512_v28 = vpack.c.bf16 %v1408_v33, %v1407_v32 }
0x103e   :  { %1008 = vrot.lane.b32.xlu0 %v1006_v7, %s4133_s28 }
0x103f   :  { %v465_v47 = vpop.permute.xlu0 %464 }
0x1040   :  { %v467_v10 = vadd.f32 %v465_v47, %v453_v9 }
0x1042   :  { %468 = vst.msk [vmem:[#allocation5] sm:$0xff] %vm193_vm2, %v467_v10  ;;  %1498 = vrot.lane.b32.xlu0 %v3464_v26, %s4131_s2 }
0x1043   :  { %v737_v16 = vpop.permute.xlu0 %736  ;;  %v873_v20 = vpop.permute.xlu1 %872 }
0x1049   :  { %v589_v13 = vld [vmem:[#allocation5] sm:$0xff] }
0x104a   :  { %v603_v15 = vadd.f32 %v601_v11, %v589_v13 }
0x104c   :  { %604 = vst.msk [vmem:[#allocation5] sm:$0xff] %vm193_vm2, %v603_v15 }
0x1053   :  { %v725_v17 = vld [vmem:[#allocation5] sm:$0xff] }
0x1054   :  { %v739_v18 = vadd.f32 %v737_v16, %v725_v17 }
0x1056   :  { %740 = vst.msk [vmem:[#allocation5] sm:$0xff] %vm193_vm2, %v739_v18 }
0x105d   :  { %v861_v19 = vld [vmem:[#allocation5] sm:$0xff] }
0x105e   :  { %v875_v21 = vadd.f32 %v873_v20, %v861_v19 }
0x1060   :  { %876 = vst.msk [vmem:[#allocation5] sm:$0xff] %vm193_vm2, %v875_v21 }
0x1067   :  { %v997_v23 = vld [vmem:[#allocation5] sm:$0xff] }
0x10b0   :  { %v1009_v22 = vpop.permute.xlu0 %1008 }
0x10b1   :  { %v1011_v24 = vadd.f32 %v1009_v22, %v997_v23 }
0x10b3   :  { %1012 = vst.msk [vmem:[#allocation5] sm:$0xff] %vm193_vm2, %v1011_v24 }
0x10b4   :  { %v1499_v5 = vpop.permute.xlu0 %1498 }
0x10ba   :  { %v1013_v25 = vld [vmem:[#allocation5] sm:$0xff] }
0x10bb   :  { %3709 = vmatmul.mubr.msk.f32.vlgmr.msra.gmra.mrb[6].mxu1 %vm193_vm2, %v1013_v25  ;;  %3720 = vmatmul.mubr.msk.f32.vlgmr.msra.gmra.mrb[12].mxu0 %vm193_vm2, %v1013_v25 }
0x10bc   :  { %3724 = vmatprep.mubr.msk.f32.mxu1 %vm4129_vm1, %v4130_v4  ;;  %3740 = vmatprep.mubr.msk.f32.mxu0 %vm4129_vm1, %v4130_v4 }
0x118e   :  { %v1087_v34 = vpop.f32.mrb[6].mxu1  ;;  %v1161_v35 = vpop.f32.mrb[12].mxu0 }
0x118f   :  { %v3710_v39 = vpop.f32.mrb[7].mxu1  ;;  %v3721_v8 = vpop.f32.mrb[13].mxu0  ;;  %3723 = vmatpush3.msra.mxu1 %v1087_v34  ;;  %3739 = vmatpush3.msra.mxu0 %v1161_v35 }
0x1190   :  { %3725 = vmatmul.mubr.msk.f32.vlgmr.msra.gmra.mrb[8].mxu1 %vm1171_vm10, %v1170_v30  ;;  %3942 = vmatprep.subr.bf16.mxu1 %v4128_v0 }
0x1191   :  { %3944 = vmatpush3.bf16.msra.mxu1 %v3943_v31  ;;  %3735 = vmatprep.mubr.msk.f32.mxu1 %vm4129_vm1, %v4130_v4 }
0x1192   :  { %3945 = vmatprep.subr.bf16.mxu1 %v4128_v0  ;;  %3741 = vmatmul.mubr.msk.f32.vlgmr.msra.gmra.mrb[14].mxu0 %vm1171_vm10, %v1318_v38 }
0x1193   :  { %3948 = vmatprep.subr.bf16.mxu0 %v4128_v0  ;;  %3751 = vmatprep.mubr.msk.f32.mxu0 %vm4129_vm1, %v4130_v4 }
0x1194   :  { %3950 = vmatpush3.bf16.msra.mxu0 %v4512_v28 }
0x1195   :  { %3947 = vmatpush3.bf16.msra.mxu1 %v3946_v40  ;;  %3951 = vmatprep.subr.bf16.mxu0 %v4128_v0 }
0x1196   :  { %3954 = vmatprep.subr.bf16.mxu1 %v4128_v0 }
0x1198   :  { %3736 = vmatmul.mubr.msk.f32.vlgmr.msra.gmra.mrb[10].mxu1 %vm193_vm2, %v1165_v44  ;;  %3953 = vmatpush3.bf16.msra.mxu0 %v4528_v12 }
0x1199   :  { %3956 = vmatpush3.bf16.msra.mxu1 %v4512_v28  ;;  %3762 = vmatprep.mubr.msk.f32.mxu1 %vm4129_vm1, %v4130_v4 }
0x119a   :  { %3957 = vmatprep.subr.bf16.mxu1 %v4128_v0  ;;  %3960 = vmatprep.subr.bf16.mxu0 %v4128_v0 }
0x119b   :  { %3752 = vmatmul.mubr.msk.f32.vlgmr.msra.gmra.mrb[16].mxu0 %vm193_vm2, %v1406_v14 }
0x119c   :  { %3962 = vmatpush3.bf16.msra.mxu0 %v4512_v28  ;;  %3773 = vmatprep.mubr.msk.f32.mxu0 %vm4129_vm1, %v4130_v4 }
0x119d   :  { %3959 = vmatpush3.bf16.msra.mxu1 %v4528_v12  ;;  %3963 = vmatprep.subr.bf16.mxu0 %v4128_v0 }
0x119e   :  { %3966 = vmatprep.subr.bf16.mxu1 %v4128_v0 }
0x11a0   :  { %3965 = vmatpush3.bf16.msra.mxu0 %v4528_v12 }
0x11a1   :  { %3972 = vmatprep.subr.bf16.mxu0 %v4128_v0 }
0x1263   :  { %v1241_v46 = vpop.f32.mrb[8].mxu1 }
0x1264   :  { %v3726_v45 = vpop.f32.mrb[9].mxu1 }
0x1265   :  { %v1388_v42 = vpop.f32.mrb[14].mxu0 }
0x1266   :  { %v3742_v49 = vpop.f32.mrb[15].mxu0 }
0x126b   :  { %v1314_v50 = vpop.f32.mrb[10].mxu1 }
0x126c   :  { %v1315_v52 = vadd.f32 %v1314_v50, %v1241_v46  ;;  %v3737_v53 = vpop.f32.mrb[11].mxu1 }
0x126e   :  { %v1392_v55 = vadd.f32 %v1388_v42, %v1315_v52  ;;  %v1480_v56 = vpop.f32.mrb[16].mxu0 }
0x126f   :  { %v3753_v57 = vpop.f32.mrb[17].mxu0 }
0x1270   :  { %v1400_v2 = vadd.f32 %v3461_v54, %v1392_v55 }
0x1272   :  { %1401 = vst [vmem:[#allocation6] sm:$0xff] %v1400_v2 }
0x1279   :  { %v1405_v58 = vld [vmem:[#allocation6] sm:$0x1]  ;;  %v1529_v19 = vld [vmem:[#allocation6 + $0x1] sm:$0x1]  ;;  %v1653_v41 = vld [vmem:[#allocation6 + $0x2] sm:$0x1] }
0x127a   :  { %v1484_v51 = vadd.f32 %v1480_v56, %v1405_v58 }
0x127c   :  { %4064 = vtanh.f32 %v1484_v51  ;;  %v3463_v60 = vmul.f32 -1.442695, %v1484_v51 }
0x127e   :  { %4066 = vpow2.f32 %v3463_v60 }
0x1286   :  { %v4065_v59 = vpop.eup %4064 }
0x1287   :  { %1503 = vrot.lane.b32.xlu1 %v4065_v59, %s4131_s2 }
0x1288   :  { %v4067_v61 = vpop.eup %4066 }
0x1289   :  { %v1488_v62 = vadd.f32 1.0, %v4067_v61 }
0x128b   :  { %4068 = vrcp.f32 %v1488_v62 }
0x1295   :  { %v4069_v63 = vpop.eup %4068 }
0x1296   :  { %v1501_v7 = vmul.f32 %v4069_v63, %v1499_v5 }
0x12f9   :  { %v1504_v1 = vpop.permute.xlu1 %1503 }
0x12fa   :  { %v1506_v3 = vmul.f32 %v4069_v63, %v1504_v1 }
0x12fc   :  { %1508 = vrot.lane.b32.xlu1 %v1506_v3, %s4131_s2 }
0x136e   :  { %v1509_v47 = vpop.permute.xlu1 %1508 }
0x136f   :  { %v1511_v9 = vadd.f32 %v1509_v47, %v1501_v7 }
0x1371   :  { %4070 = vtanh.f32 %v1511_v9 }
0x137b   :  { %v4071_v10 = vpop.eup %4070 }
0x137c   :  { %1514 = vrot.lane.b32.xlu0 %v4071_v10, %s4131_s2 }
0x1380   :  { %1524 = vrot.lane.b32.xlu0 %v1511_v9, %s4132_s0 }
0x13ee   :  { %v1515_v11 = vpop.permute.xlu0 %1514 }
0x13ef   :  { %v1517_v13 = vmul.f32 %v4069_v63, %v1515_v11  ;;  %v1777_v63 = vld [vmem:[#allocation6 + $0x3] sm:$0x1] }
0x13f1   :  { %1519 = vrot.lane.b32.xlu1 %v1517_v13, %s4133_s28 }
0x13f2   :  { %v1525_v15 = vpop.permute.xlu0 %1524 }
0x13f3   :  { %1527 = vst.msk [vmem:[#allocation8] sm:$0x1] %vm1402_vm9, %v1525_v15 }
0x13fa   :  { %v3467_v16 = vld [vmem:[#allocation8] ss:$0 sm:$0xff] }
0x13fb   :  { %1622 = vrot.lane.b32.xlu0 %v3467_v16, %s4131_s2 }
0x1463   :  { %v1520_v17 = vpop.permute.xlu1 %1519 }
0x1464   :  { %1522 = vst.msk [vmem:[#allocation7] sm:$0x1] %vm1402_vm9, %v1520_v17  ;;  %1528 = vst.msk [vmem:[#allocation9] sm:$0x1] %vm1402_vm9, %v1520_v17 }
0x146b   :  { %v1530_v18 = vld [vmem:[#allocation7] sm:$0x1] }
0x146c   :  { %3763 = vmatmul.mubr.msk.f32.vlgmr.msra.gmra.mrb[12].mxu1 %vm193_vm2, %v1530_v18 }
0x146d   :  { %3968 = vmatpush3.bf16.msra.mxu1 %v4512_v28  ;;  %3784 = vmatprep.mubr.msk.f32.mxu1 %vm4129_vm1, %v4130_v4  ;;  %v1623_v31 = vpop.permute.xlu0 %1622 }
0x146e   :  { %3969 = vmatprep.subr.bf16.mxu1 %v4128_v0 }
0x1471   :  { %3971 = vmatpush3.bf16.msra.mxu1 %v4528_v12 }
0x1472   :  { %3978 = vmatprep.subr.bf16.mxu1 %v4128_v0 }
0x153f   :  { %v1604_v20 = vpop.f32.mrb[12].mxu1 }
0x1540   :  { %v1608_v21 = vadd.f32 %v1604_v20, %v1529_v19  ;;  %v3764_v22 = vpop.f32.mrb[13].mxu1 }
0x1542   :  { %4072 = vtanh.f32 %v1608_v21  ;;  %v3466_v24 = vmul.f32 -1.442695, %v1608_v21 }
0x1544   :  { %4074 = vpow2.f32 %v3466_v24 }
0x154c   :  { %v4073_v23 = vpop.eup %4072 }
0x154d   :  { %1627 = vrot.lane.b32.xlu1 %v4073_v23, %s4131_s2 }
0x154e   :  { %v4075_v25 = vpop.eup %4074 }
0x154f   :  { %v1612_v26 = vadd.f32 1.0, %v4075_v25 }
0x1551   :  { %4076 = vrcp.f32 %v1612_v26 }
0x155b   :  { %v4077_v27 = vpop.eup %4076 }
0x155c   :  { %v1625_v32 = vmul.f32 %v4077_v27, %v1623_v31 }
0x15bf   :  { %v1628_v29 = vpop.permute.xlu1 %1627 }
0x15c0   :  { %v1630_v30 = vmul.f32 %v4077_v27, %v1628_v29 }
0x15c2   :  { %1632 = vrot.lane.b32.xlu1 %v1630_v30, %s4131_s2 }
0x1634   :  { %v1633_v33 = vpop.permute.xlu1 %1632 }
0x1635   :  { %v1635_v34 = vadd.f32 %v1633_v33, %v1625_v32 }
0x1637   :  { %4078 = vtanh.f32 %v1635_v34 }
0x1641   :  { %v4079_v35 = vpop.eup %4078 }
0x1642   :  { %1638 = vrot.lane.b32.xlu0 %v4079_v35, %s4131_s2 }
0x1646   :  { %1648 = vrot.lane.b32.xlu0 %v1635_v34, %s4132_s0 }
0x16b4   :  { %v1639_v36 = vpop.permute.xlu0 %1638 }
0x16b5   :  { %v1641_v37 = vmul.f32 %v4077_v27, %v1639_v36  ;;  %v1901_v27 = vld [vmem:[#allocation6 + $0x4] sm:$0x1] }
0x16b7   :  { %1643 = vrot.lane.b32.xlu1 %v1641_v37, %s4133_s28 }
0x16b8   :  { %v1649_v39 = vpop.permute.xlu0 %1648 }
0x16b9   :  { %1651 = vst.msk [vmem:[#allocation8] sm:$0x1] %vm1402_vm9, %v1649_v39 }
0x16c0   :  { %v3470_v8 = vld [vmem:[#allocation8] ss:$0 sm:$0xff] }
0x16c1   :  { %1746 = vrot.lane.b32.xlu0 %v3470_v8, %s4131_s2 }
0x1729   :  { %v1644_v38 = vpop.permute.xlu1 %1643 }
0x172a   :  { %1646 = vst.msk [vmem:[#allocation7] sm:$0x1] %vm1402_vm9, %v1644_v38  ;;  %1652 = vst.msk [vmem:[#allocation9 + $0x1] sm:$0x1] %vm1402_vm9, %v1644_v38 }
0x1731   :  { %v1654_v40 = vld [vmem:[#allocation7] sm:$0x1] }
0x1732   :  { %3774 = vmatmul.mubr.msk.f32.vlgmr.msra.gmra.mrb[18].mxu0 %vm193_vm2, %v1654_v40 }
0x1733   :  { %3974 = vmatpush3.bf16.msra.mxu0 %v4512_v28  ;;  %3795 = vmatprep.mubr.msk.f32.mxu0 %vm4129_vm1, %v4130_v4  ;;  %v1747_v54 = vpop.permute.xlu0 %1746 }
0x1734   :  { %3975 = vmatprep.subr.bf16.mxu0 %v4128_v0 }
0x1737   :  { %3977 = vmatpush3.bf16.msra.mxu0 %v4528_v12 }
0x1738   :  { %3984 = vmatprep.subr.bf16.mxu0 %v4128_v0 }
0x1805   :  { %v1728_v43 = vpop.f32.mrb[18].mxu0 }
0x1806   :  { %v1732_v44 = vadd.f32 %v1728_v43, %v1653_v41  ;;  %v3775_v14 = vpop.f32.mrb[19].mxu0 }
0x1808   :  { %4080 = vtanh.f32 %v1732_v44  ;;  %v3469_v45 = vmul.f32 -1.442695, %v1732_v44 }
0x180a   :  { %4082 = vpow2.f32 %v3469_v45 }
0x1812   :  { %v4081_v46 = vpop.eup %4080 }
0x1813   :  { %1751 = vrot.lane.b32.xlu1 %v4081_v46, %s4131_s2 }
0x1814   :  { %v4083_v42 = vpop.eup %4082 }
0x1815   :  { %v1736_v49 = vadd.f32 1.0, %v4083_v42 }
0x1817   :  { %4084 = vrcp.f32 %v1736_v49 }
0x1821   :  { %v4085_v50 = vpop.eup %4084 }
0x1822   :  { %v1749_v55 = vmul.f32 %v4085_v50, %v1747_v54 }
0x1885   :  { %v1752_v52 = vpop.permute.xlu1 %1751 }
0x1886   :  { %v1754_v53 = vmul.f32 %v4085_v50, %v1752_v52 }
0x1888   :  { %1756 = vrot.lane.b32.xlu1 %v1754_v53, %s4131_s2 }
0x18fa   :  { %v1757_v56 = vpop.permute.xlu1 %1756 }
0x18fb   :  { %v1759_v57 = vadd.f32 %v1757_v56, %v1749_v55 }
0x18fd   :  { %4086 = vtanh.f32 %v1759_v57 }
0x1907   :  { %v4087_v2 = vpop.eup %4086 }
0x1908   :  { %1762 = vrot.lane.b32.xlu0 %v4087_v2, %s4131_s2 }
0x190c   :  { %1772 = vrot.lane.b32.xlu0 %v1759_v57, %s4132_s0 }
0x197a   :  { %v1763_v58 = vpop.permute.xlu0 %1762 }
0x197b   :  { %v1765_v51 = vmul.f32 %v4085_v50, %v1763_v58  ;;  %v2025_v50 = vld [vmem:[#allocation6 + $0x5] sm:$0x1] }
0x197d   :  { %1767 = vrot.lane.b32.xlu1 %v1765_v51, %s4133_s28 }
0x197e   :  { %v1773_v59 = vpop.permute.xlu0 %1772 }
0x197f   :  { %1775 = vst.msk [vmem:[#allocation8] sm:$0x1] %vm1402_vm9, %v1773_v59 }
0x1986   :  { %v3473_v60 = vld [vmem:[#allocation8] ss:$0 sm:$0xff] }
0x1987   :  { %1870 = vrot.lane.b32.xlu0 %v3473_v60, %s4131_s2 }
0x19ef   :  { %v1768_v61 = vpop.permute.xlu1 %1767 }
0x19f0   :  { %1770 = vst.msk [vmem:[#allocation7] sm:$0x1] %vm1402_vm9, %v1768_v61  ;;  %1776 = vst.msk [vmem:[#allocation9 + $0x2] sm:$0x1] %vm1402_vm9, %v1768_v61 }
0x19f7   :  { %v1778_v62 = vld [vmem:[#allocation7] sm:$0x1] }
0x19f8   :  { %3785 = vmatmul.mubr.msk.f32.vlgmr.msra.gmra.mrb[14].mxu1 %vm193_vm2, %v1778_v62 }
0x19f9   :  { %3980 = vmatpush3.bf16.msra.mxu1 %v4512_v28  ;;  %3806 = vmatprep.mubr.msk.f32.mxu1 %vm4129_vm1, %v4130_v4  ;;  %v1871_v16 = vpop.permute.xlu0 %1870 }
0x19fa   :  { %3981 = vmatprep.subr.bf16.mxu1 %v4128_v0 }
0x19fd   :  { %3983 = vmatpush3.bf16.msra.mxu1 %v4528_v12 }
0x19fe   :  { %3990 = vmatprep.subr.bf16.mxu1 %v4128_v0 }
0x1acb   :  { %v1852_v1 = vpop.f32.mrb[14].mxu1 }
0x1acc   :  { %v1856_v3 = vadd.f32 %v1852_v1, %v1777_v63  ;;  %v3786_v5 = vpop.f32.mrb[15].mxu1 }
0x1ace   :  { %4088 = vtanh.f32 %v1856_v3  ;;  %v3472_v47 = vmul.f32 -1.442695, %v1856_v3 }
0x1ad0   :  { %4090 = vpow2.f32 %v3472_v47 }
0x1ad8   :  { %v4089_v7 = vpop.eup %4088 }
0x1ad9   :  { %1875 = vrot.lane.b32.xlu1 %v4089_v7, %s4131_s2 }
0x1ada   :  { %v4091_v9 = vpop.eup %4090 }
0x1adb   :  { %v1860_v10 = vadd.f32 1.0, %v4091_v9  ;;  %v2149_v9 = vld [vmem:[#allocation6 + $0x6] sm:$0x1] }
0x1add   :  { %4092 = vrcp.f32 %v1860_v10 }
0x1ae7   :  { %v4093_v11 = vpop.eup %4092 }
0x1ae8   :  { %v1873_v17 = vmul.f32 %v4093_v11, %v1871_v16 }
0x1b4b   :  { %v1876_v13 = vpop.permute.xlu1 %1875 }
0x1b4c   :  { %v1878_v15 = vmul.f32 %v4093_v11, %v1876_v13 }
0x1b4e   :  { %1880 = vrot.lane.b32.xlu1 %v1878_v15, %s4131_s2 }
0x1bc0   :  { %v1881_v18 = vpop.permute.xlu1 %1880 }
0x1bc1   :  { %v1883_v19 = vadd.f32 %v1881_v18, %v1873_v17 }
0x1bc3   :  { %4094 = vtanh.f32 %v1883_v19 }
0x1bcd   :  { %v4095_v20 = vpop.eup %4094 }
0x1bce   :  { %1886 = vrot.lane.b32.xlu0 %v4095_v20, %s4131_s2 }
0x1bd2   :  { %1896 = vrot.lane.b32.xlu0 %v1883_v19, %s4132_s0 }
0x1c40   :  { %v1887_v21 = vpop.permute.xlu0 %1886 }
0x1c41   :  { %v1889_v22 = vmul.f32 %v4093_v11, %v1887_v21 }
0x1c43   :  { %1891 = vrot.lane.b32.xlu1 %v1889_v22, %s4133_s28 }
0x1c44   :  { %v1897_v23 = vpop.permute.xlu0 %1896 }
0x1c45   :  { %1899 = vst.msk [vmem:[#allocation8] sm:$0x1] %vm1402_vm9, %v1897_v23 }
0x1c4c   :  { %v3476_v24 = vld [vmem:[#allocation8] ss:$0 sm:$0xff] }
0x1c4d   :  { %1994 = vrot.lane.b32.xlu0 %v3476_v24, %s4131_s2 }
0x1cb5   :  { %v1892_v25 = vpop.permute.xlu1 %1891 }
0x1cb6   :  { %1894 = vst.msk [vmem:[#allocation7] sm:$0x1] %vm1402_vm9, %v1892_v25  ;;  %1900 = vst.msk [vmem:[#allocation9 + $0x3] sm:$0x1] %vm1402_vm9, %v1892_v25 }
0x1cbd   :  { %v1902_v26 = vld [vmem:[#allocation7] sm:$0x1] }
0x1cbe   :  { %3796 = vmatmul.mubr.msk.f32.vlgmr.msra.gmra.mrb[20].mxu0 %vm193_vm2, %v1902_v26 }
0x1cbf   :  { %3986 = vmatpush3.bf16.msra.mxu0 %v4512_v28  ;;  %3817 = vmatprep.mubr.msk.f32.mxu0 %vm4129_vm1, %v4130_v4  ;;  %v1995_v8 = vpop.permute.xlu0 %1994 }
0x1cc0   :  { %3987 = vmatprep.subr.bf16.mxu0 %v4128_v0 }
0x1cc3   :  { %3989 = vmatpush3.bf16.msra.mxu0 %v4528_v12 }
0x1cc4   :  { %3996 = vmatprep.subr.bf16.mxu0 %v4128_v0 }
0x1d91   :  { %v1976_v29 = vpop.f32.mrb[20].mxu0 }
0x1d92   :  { %v1980_v30 = vadd.f32 %v1976_v29, %v1901_v27  ;;  %v3797_v31 = vpop.f32.mrb[21].mxu0 }
0x1d94   :  { %4096 = vtanh.f32 %v1980_v30  ;;  %v3475_v33 = vmul.f32 -1.442695, %v1980_v30 }
0x1d96   :  { %4098 = vpow2.f32 %v3475_v33 }
0x1d9e   :  { %v4097_v32 = vpop.eup %4096 }
0x1d9f   :  { %1999 = vrot.lane.b32.xlu1 %v4097_v32, %s4131_s2 }
0x1da0   :  { %v4099_v34 = vpop.eup %4098 }
0x1da1   :  { %v1984_v35 = vadd.f32 1.0, %v4099_v34  ;;  %v2273_v34 = vld [vmem:[#allocation6 + $0x7] sm:$0x1] }
0x1da3   :  { %4100 = vrcp.f32 %v1984_v35 }
0x1dad   :  { %v4101_v36 = vpop.eup %4100 }
0x1dae   :  { %v1997_v38 = vmul.f32 %v4101_v36, %v1995_v8 }
0x1e11   :  { %v2000_v37 = vpop.permute.xlu1 %1999 }
0x1e12   :  { %v2002_v39 = vmul.f32 %v4101_v36, %v2000_v37 }
0x1e14   :  { %2004 = vrot.lane.b32.xlu1 %v2002_v39, %s4131_s2 }
0x1e86   :  { %v2005_v40 = vpop.permute.xlu1 %2004 }
0x1e87   :  { %v2007_v41 = vadd.f32 %v2005_v40, %v1997_v38 }
0x1e89   :  { %4102 = vtanh.f32 %v2007_v41 }
0x1e93   :  { %v4103_v43 = vpop.eup %4102 }
0x1e94   :  { %2010 = vrot.lane.b32.xlu0 %v4103_v43, %s4131_s2 }
0x1e98   :  { %2020 = vrot.lane.b32.xlu0 %v2007_v41, %s4132_s0 }
0x1f06   :  { %v2011_v44 = vpop.permute.xlu0 %2010 }
0x1f07   :  { %v2013_v14 = vmul.f32 %v4101_v36, %v2011_v44 }
0x1f09   :  { %2015 = vrot.lane.b32.xlu1 %v2013_v14, %s4133_s28 }
0x1f0a   :  { %v2021_v46 = vpop.permute.xlu0 %2020 }
0x1f0b   :  { %2023 = vst.msk [vmem:[#allocation8] sm:$0x1] %vm1402_vm9, %v2021_v46 }
0x1f12   :  { %v3479_v45 = vld [vmem:[#allocation8] ss:$0 sm:$0xff] }
0x1f13   :  { %2118 = vrot.lane.b32.xlu0 %v3479_v45, %s4131_s2 }
0x1f7b   :  { %v2016_v42 = vpop.permute.xlu1 %2015 }
0x1f7c   :  { %2018 = vst.msk [vmem:[#allocation7] sm:$0x1] %vm1402_vm9, %v2016_v42  ;;  %2024 = vst.msk [vmem:[#allocation9 + $0x4] sm:$0x1] %vm1402_vm9, %v2016_v42 }
0x1f83   :  { %v2026_v49 = vld [vmem:[#allocation7] sm:$0x1] }
0x1f84   :  { %3807 = vmatmul.mubr.msk.f32.vlgmr.msra.gmra.mrb[16].mxu1 %vm193_vm2, %v2026_v49 }
0x1f85   :  { %3992 = vmatpush3.bf16.msra.mxu1 %v4512_v28  ;;  %3828 = vmatprep.mubr.msk.f32.mxu1 %vm4129_vm1, %v4130_v4 }
0x1f86   :  { %3993 = vmatprep.subr.bf16.mxu1 %v4128_v0 }
0x1f89   :  { %3995 = vmatpush3.bf16.msra.mxu1 %v4528_v12  ;;  %v2119_v12 = vpop.permute.xlu0 %2118 }
0x1f8a   :  { %3838 = vmatprep.subr.mxu1 %v4130_v4 }
0x2057   :  { %v2100_v52 = vpop.f32.mrb[16].mxu1 }
0x2058   :  { %v2104_v53 = vadd.f32 %v2100_v52, %v2025_v50  ;;  %v3808_v54 = vpop.f32.mrb[17].mxu1 }
0x2059   :  { %v2409_v54 = vld [vmem:[%s4823_s12 + $0x8] sm:$0xff] }
0x205a   :  { %4104 = vtanh.f32 %v2104_v53  ;;  %v3478_v56 = vmul.f32 -1.442695, %v2104_v53  ;;  %v2408_v53 = vld [vmem:[%s4823_s12] sm:$0xff]  ;;  %s4135_s12 = smov 112  }
0x205c   :  { %4106 = vpow2.f32 %v3478_v56 }
0x2064   :  { %v4105_v55 = vpop.eup %4104 }
0x2065   :  { %2123 = vrot.lane.b32.xlu1 %v4105_v55, %s4131_s2  ;;  %v3997_v55 = vpack.c.bf16 %v2409_v54, %v2408_v53 }
0x2066   :  { %v4107_v28 = vpop.eup %4106 }
0x2067   :  { %v2108_v57 = vadd.f32 1.0, %v4107_v28 }
0x2069   :  { %4108 = vrcp.f32 %v2108_v57 }
0x2073   :  { %v4109_v2 = vpop.eup %4108 }
0x2074   :  { %v2121_v59 = vmul.f32 %v4109_v2, %v2119_v12 }
0x20d7   :  { %v2124_v58 = vpop.permute.xlu1 %2123 }
0x20d8   :  { %v2126_v51 = vmul.f32 %v4109_v2, %v2124_v58 }
0x20da   :  { %2128 = vrot.lane.b32.xlu1 %v2126_v51, %s4131_s2 }
0x214c   :  { %v2129_v60 = vpop.permute.xlu1 %2128 }
0x214d   :  { %v2131_v61 = vadd.f32 %v2129_v60, %v2121_v59  ;;  %v2398_v59 = vlaneseq }
0x214f   :  { %4110 = vtanh.f32 %v2131_v61  ;;  %v2399_v60 = vshrl.u32 %v2398_v59, 7 }
0x2159   :  { %v4111_v62 = vpop.eup %4110 }
0x215a   :  { %2134 = vrot.lane.b32.xlu0 %v4111_v62, %s4131_s2 }
0x215e   :  { %2144 = vrot.lane.b32.xlu0 %v2131_v61, %s4132_s0  ;;  %v2401_v61 = vand.u32 127, %v2398_v59 }
0x2160   :  { %v2402_v62 = vadd.s32 %v2401_v61, %v2399_v60  ;;  %vm2639_vm12 = vcmp.eq.s32.totalorder %v2399_v60, %v2401_v61  ;;  %vm2644_vm13 = vcmp.eq.s32.totalorder %v2401_v61, 3 }
0x2162   :  { %vm2403_vm11 = vcmp.eq.s32.totalorder %v2402_v62, 7 }
0x21cc   :  { %v2135_v63 = vpop.permute.xlu0 %2134 }
0x21cd   :  { %v2137_v1 = vmul.f32 %v4109_v2, %v2135_v63  ;;  %v3486_v63 = vsel %vm2403_vm11, 1.0, %v4130_v4 }
0x21cf   :  { %2139 = vrot.lane.b32.xlu1 %v2137_v1, %s4133_s28  ;;  %v4696_v1 = vsel %vm2639_vm12, 1.0, %v4130_v4 }
0x21d0   :  { %v2145_v3 = vpop.permute.xlu0 %2144 }
0x21d1   :  { %2147 = vst.msk [vmem:[#allocation8] sm:$0x1] %vm1402_vm9, %v2145_v3  ;;  %v4137_v3 = vmov -10000.0  }
0x21d8   :  { %v3482_v5 = vld [vmem:[#allocation8] ss:$0 sm:$0xff] }
0x21d9   :  { %2242 = vrot.lane.b32.xlu0 %v3482_v5, %s4131_s2  ;;  %v2645_v5 = vsel %vm2644_vm13, 0.0, %v4137_v3 }
0x2241   :  { %v2140_v7 = vpop.permute.xlu1 %2139 }
0x2242   :  { %2142 = vst.msk [vmem:[#allocation7] sm:$0x1] %vm1402_vm9, %v2140_v7  ;;  %2148 = vst.msk [vmem:[#allocation9 + $0x5] sm:$0x1] %vm1402_vm9, %v2140_v7 }
0x2249   :  { %v2150_v47 = vld [vmem:[#allocation7] sm:$0x1] }
0x224a   :  { %3818 = vmatmul.mubr.msk.f32.vlgmr.msra.gmra.mrb[22].mxu0 %vm193_vm2, %v2150_v47 }
0x224b   :  { %3835 = vmatprep.mubr.msk.f32.mxu0 %vm4129_vm1, %v4130_v4  ;;  %v2243_v22 = vpop.permute.xlu0 %2242  ;;  %3998 = vmatpush3.bf16.msra.mxu0 %v3997_v55 }
0x224c   :  { %3999 = vmatprep.subr.bf16.mxu0 %v4128_v0  ;;  %v2406_v0 = vld [vmem:[%s4824_s11] sm:$0xff] }
0x231d   :  { %v2224_v10 = vpop.f32.mrb[22].mxu0 }
0x231e   :  { %v2228_v11 = vadd.f32 %v2224_v10, %v2149_v9  ;;  %v3819_v13 = vpop.f32.mrb[23].mxu0  ;;  %v2646_v9 = vmul.f32 %v4696_v1, %v2645_v5 }
0x2320   :  { %4112 = vtanh.f32 %v2228_v11  ;;  %v3481_v16 = vmul.f32 -1.442695, %v2228_v11 }
0x2322   :  { %4114 = vpow2.f32 %v3481_v16 }
0x232a   :  { %v4113_v15 = vpop.eup %4112 }
0x232b   :  { %2247 = vrot.lane.b32.xlu1 %v4113_v15, %s4131_s2  ;;  %v3490_v15 = vld [vmem:[%s4825_s13] ss:$0 sm:$0xff] }
0x232c   :  { %v4115_v17 = vpop.eup %4114 }
0x232d   :  { %v2232_v18 = vadd.f32 1.0, %v4115_v17 }
0x232f   :  { %4116 = vrcp.f32 %v2232_v18  ;;  %v4716_v18 = vld [vmem:[%s4826_s16] sm:$0xff] }
0x2339   :  { %v4117_v19 = vpop.eup %4116 }
0x233a   :  { %v2245_v23 = vmul.f32 %v4117_v19, %v2243_v22 }
0x239d   :  { %v2248_v20 = vpop.permute.xlu1 %2247 }
0x239e   :  { %v2250_v21 = vmul.f32 %v4117_v19, %v2248_v20 }
0x23a0   :  { %2252 = vrot.lane.b32.xlu1 %v2250_v21, %s4131_s2 }
0x2412   :  { %v2253_v24 = vpop.permute.xlu1 %2252 }
0x2413   :  { %v2255_v25 = vadd.f32 %v2253_v24, %v2245_v23 }
0x2415   :  { %4118 = vtanh.f32 %v2255_v25 }
0x241f   :  { %v4119_v26 = vpop.eup %4118 }
0x2420   :  { %2258 = vrot.lane.b32.xlu0 %v4119_v26, %s4131_s2 }
0x2424   :  { %2268 = vrot.lane.b32.xlu0 %v2255_v25, %s4132_s0 }
0x2492   :  { %v2259_v27 = vpop.permute.xlu0 %2258 }
0x2493   :  { %v2261_v29 = vmul.f32 %v4117_v19, %v2259_v27 }
0x2495   :  { %2263 = vrot.lane.b32.xlu1 %v2261_v29, %s4133_s28 }
0x2496   :  { %v2269_v30 = vpop.permute.xlu0 %2268 }
0x2497   :  { %2271 = vst.msk [vmem:[#allocation8] sm:$0x1] %vm1402_vm9, %v2269_v30  ;;  %v4721_v30 = vcvt.s32.f32 %v2399_v60 }
0x249e   :  { %v3485_v31 = vld [vmem:[#allocation8] ss:$0 sm:$0xff] }
0x249f   :  { %2366 = vrot.lane.b32.xlu0 %v3485_v31, %s4131_s2  ;;  %v4723_v31 = vsub.s32 0, %v2399_v60 }
0x2507   :  { %v2264_v32 = vpop.permute.xlu1 %2263 }
0x2508   :  { %2266 = vst.msk [vmem:[#allocation7] sm:$0x1] %vm1402_vm9, %v2264_v32  ;;  %2272 = vst.msk [vmem:[#allocation9 + $0x6] sm:$0x1] %vm1402_vm9, %v2264_v32 }
0x250f   :  { %v2274_v33 = vld [vmem:[#allocation7] sm:$0x1] }
0x2510   :  { %3829 = vmatmul.mubr.msk.f32.vlgmr.msra.gmra.mrb[18].mxu1 %vm193_vm2, %v2274_v33 }
0x2511   :  { %3840 = vmatprep.mubr.msk.f32.mxu1 %vm4129_vm1, %v4130_v4  ;;  %v2367_v14 = vpop.permute.xlu0 %2366 }
0x25e3   :  { %v2348_v35 = vpop.f32.mrb[18].mxu1 }
0x25e4   :  { %v2352_v36 = vadd.f32 %v2348_v35, %v2273_v34  ;;  %v3830_v37 = vpop.f32.mrb[19].mxu1 }
0x25e6   :  { %4120 = vtanh.f32 %v2352_v36  ;;  %v3484_v8 = vmul.f32 -1.442695, %v2352_v36 }
0x25e8   :  { %4122 = vpow2.f32 %v3484_v8 }
0x25f0   :  { %v4121_v39 = vpop.eup %4120 }
0x25f1   :  { %2371 = vrot.lane.b32.xlu1 %v4121_v39, %s4131_s2 }
0x25f2   :  { %v4123_v38 = vpop.eup %4122 }
0x25f3   :  { %v2356_v40 = vadd.f32 1.0, %v4123_v38 }
0x25f5   :  { %4124 = vrcp.f32 %v2356_v40 }
0x25ff   :  { %v4125_v41 = vpop.eup %4124 }
0x2600   :  { %v2369_v46 = vmul.f32 %v4125_v41, %v2367_v14 }
0x2663   :  { %v2372_v43 = vpop.permute.xlu1 %2371 }
0x2664   :  { %v2374_v44 = vmul.f32 %v4125_v41, %v2372_v43 }
0x2666   :  { %2376 = vrot.lane.b32.xlu1 %v2374_v44, %s4131_s2 }
0x26d8   :  { %v2377_v45 = vpop.permute.xlu1 %2376 }
0x26d9   :  { %v2379_v42 = vadd.f32 %v2377_v45, %v2369_v46 }
0x26db   :  { %4126 = vtanh.f32 %v2379_v42 }
0x26e5   :  { %v4127_v49 = vpop.eup %4126 }
0x26e6   :  { %2382 = vrot.lane.b32.xlu0 %v4127_v49, %s4131_s2 }
0x2758   :  { %v2383_v50 = vpop.permute.xlu0 %2382 }
0x2759   :  { %v2385_v52 = vmul.f32 %v4125_v41, %v2383_v50 }
0x275b   :  { %2387 = vrot.lane.b32.xlu1 %v2385_v52, %s4133_s28 }
0x275f   :  { %988 = vrot.lane.b32.xlu1 %v4464_v6, %s4133_s28  ;;  %v2407_v6 = vld [vmem:[%s4824_s11 + $0x8] sm:$0xff] }
0x2760   :  { %v4000_v58 = vpack.c.bf16 %v2407_v6, %v2406_v0 }
0x2763   :  { %2392 = vrot.lane.b32.xlu1 %v2379_v42, %s4132_s0 }
0x27cd   :  { %v2388_v56 = vpop.permute.xlu1 %2387 }
0x27ce   :  { %2390 = vst.msk [vmem:[#allocation7] sm:$0x1] %vm1402_vm9, %v2388_v56  ;;  %2396 = vst.msk [vmem:[#allocation9 + $0x7] sm:$0x1] %vm1402_vm9, %v2388_v56 }
0x27d1   :  { %v989_v28 = vpop.permute.xlu1 %988 }
0x27d2   :  { %991 = vst.msk [vmem:[#allocation3] sm:$0xff] %vm193_vm2, %v989_v28 }
0x27d5   :  { %v2393_v57 = vpop.permute.xlu1 %2392  ;;  %v2397_v2 = vld [vmem:[#allocation9] sm:$0xff] }
0x27d6   :  { %2395 = vst.msk [vmem:[#allocation8] sm:$0x1] %vm1402_vm9, %v2393_v57  ;;  %2411 = vrot.lane.b32.xlu0 %v2397_v2, %s4135_s12 }
0x27da   :  { %993 = vrot.lane.b32.xlu0 %v4427_v48, %s4132_s0  ;;  %v4136_v48 = vmov 1.0  }
0x2848   :  { %v2412_v51 = vpop.permute.xlu0 %2411 }
0x2849   :  { %3836 = vmatmul.mubr.msk.f32.vlgmr.msra.gmra.mrb[24].mxu0 %vm73_vm0, %v2412_v51 }
0x284a   :  { %4001 = vmatpush3.bf16.msra.mxu0 %v4000_v58  ;;  %3847 = vmatprep.mubr.msk.f32.mxu0 %vm4129_vm1, %v4130_v4 }
0x284b   :  { %3855 = vmatprep.subr.mxu0 %v4130_v4 }
0x284c   :  { %v994_v12 = vpop.permute.xlu0 %993 }
0x284d   :  { %996 = vst.msk [vmem:[#allocation4] sm:$0xff] %vm193_vm2, %v994_v12  ;;  %3848 = vmatmul.mubr.msk.f32.vlgmr.msra.gmra.mrb[26].mxu0 %vm73_vm0, %v2397_v2 }
0x284e   :  { %3857 = vmatprep.mubr.msk.f32.mxu0 %vm4129_vm1, %v4130_v4  ;;  %3856 = vmatpush3.msra.mxu0 %v4136_v48 }
0x284f   :  { %3865 = vmatprep.subr.mxu0 %v4130_v4 }
0x291c   :  { %v2481_v7 = vpop.f32.mrb[24].mxu0 }
0x291d   :  { %v3837_v47 = vpop.f32.mrb[25].mxu0  ;;  %3839 = vmatpush3.msra.mxu1 %v2481_v7 }
0x291e   :  { %3841 = vmatmul.mubr.msk.f32.vlgmr.msra.gmra.mrb[20].mxu1 %vm1171_vm10, %v3486_v63  ;;  %3850 = vmatprep.subr.mxu1 %v4130_v4 }
0x291f   :  { %3851 = vmatpush3.msra.mxu1 %v4136_v48  ;;  %3852 = vmatprep.mubr.msk.f32.mxu1 %vm4129_vm1, %v4130_v4 }
0x2920   :  { %v2626_v10 = vpop.f32.mrb[26].mxu0  ;;  %3860 = vmatprep.subr.mxu1 %v4130_v4 }
0x2921   :  { %v3849_v11 = vpop.f32.mrb[27].mxu0 }
0x2922   :  { %3853 = vmatmul.mubr.msk.f32.vlgmr.msra.gmra.mrb[22].mxu1 %vm1171_vm10, %v2646_v9 }
0x2923   :  { %3861 = vmatpush3.msra.mxu1 %v4136_v48  ;;  %3862 = vmatprep.mubr.msk.f32.mxu1 %vm4129_vm1, %v4130_v4 }
0x2924   :  { %3870 = vmatprep.subr.mxu1 %v4130_v4 }
0x29f1   :  { %v2554_v13 = vpop.f32.mrb[20].mxu1 }
0x29f2   :  { %v2627_v16 = vadd.f32 %v2626_v10, %v2554_v13  ;;  %v3842_v17 = vpop.f32.mrb[21].mxu1 }
0x29f4   :  { %v2637_v19 = vadd.f32 %v3490_v15, %v2627_v16 }
0x29f5   :  { %v2716_v20 = vpop.f32.mrb[22].mxu1 }
0x29f6   :  { %2638 = vst.msk [vmem:[#allocation10] sm:$0xff] %vm1171_vm10, %v2637_v19  ;;  %v2717_v21 = vadd.f32 %v2716_v20, %v4716_v18  ;;  %v3854_v22 = vpop.f32.mrb[23].mxu1 }
0x29f8   :  { %v2720_v23 = vsel %vm1171_vm10, %v2717_v21, -inf }
0x29f9   :  { %v2721_v24 = vrot.slane %v2720_v23, 4 }
0x29fb   :  { %v2722_v25 = vmax.f32 %v2720_v23, %v2721_v24 }
0x29fd   :  { %v2723_v26 = vrot.slane %v2722_v25, 2  ;;  %v2738_v33 = vld [vmem:[#allocation10] sm:$0x1]  ;;  %v2835_v56 = vld [vmem:[#allocation10 + $0x1] sm:$0x1] }
0x29fe   :  { %v2932_v15 = vld [vmem:[#allocation10 + $0x2] sm:$0x1] }
0x29ff   :  { %v2724_v27 = vmax.f32 %v2722_v25, %v2723_v26 }
0x2a01   :  { %v2725_v29 = vrot.slane %v2724_v27, 1 }
0x2a03   :  { %v2726_v32 = vmax.f32 %v2724_v27, %v2725_v29 }
0x2a05   :  { %vm2727_vm14 = vcmp.eq.f32.partialorder %v2717_v21, %v2726_v32  ;;  %v2739_v34 = vadd.f32 %v2738_v33, %v2726_v32 }
0x2a06   :  { %v2728_v35 = vsel %vm2727_vm14, %v4721_v30, 8.0 }
0x2a07   :  { %v2729_v36 = vsel %vm1171_vm10, %v2728_v35, inf  ;;  %v2743_v37 = vrot.slane %v2739_v34, %v4723_v31 }
0x2a08   :  { %v2730_v39 = vrot.slane %v2729_v36, 4 }
0x2a09   :  { %v2744_v8 = vmul.f32 %v4696_v1, %v2743_v37 }
0x2a0a   :  { %v2731_v38 = vmin.f32 %v2729_v36, %v2730_v39 }
0x2a0b   :  { %3858 = vmatmul.mubr.msk.f32.vlgmr.msra.gmra.mrb[28].mxu0 %vm1171_vm10, %v2744_v8 }
0x2a0c   :  { %v2732_v40 = vrot.slane %v2731_v38, 2  ;;  %3866 = vmatpush3.msra.mxu0 %v4136_v48  ;;  %3867 = vmatprep.mubr.msk.f32.mxu0 %vm4129_vm1, %v4130_v4 }
0x2a0d   :  { %3875 = vmatprep.subr.mxu0 %v4130_v4 }
0x2a0e   :  { %v2733_v41 = vmin.f32 %v2731_v38, %v2732_v40  ;;  %v3029_v40 = vld [vmem:[#allocation10 + $0x3] sm:$0x1] }
0x2a10   :  { %v2734_v43 = vrot.slane %v2733_v41, 1 }
0x2a12   :  { %v2735_v44 = vmin.f32 %v2733_v41, %v2734_v43 }
0x2a14   :  { %2737 = vst.msk [vmem:[#allocation11] sm:$0x1] %vm2736_vm15, %v2735_v44 }
0x2ade   :  { %v2814_v14 = vpop.f32.mrb[28].mxu0 }
0x2adf   :  { %v2815_v46 = vadd.f32 %v2814_v14, %v4716_v18  ;;  %v3859_v45 = vpop.f32.mrb[29].mxu0 }
0x2ae1   :  { %v2818_v42 = vsel %vm1171_vm10, %v2815_v46, -inf }
0x2ae2   :  { %v2819_v49 = vrot.slane %v2818_v42, 4 }
0x2ae4   :  { %v2820_v50 = vmax.f32 %v2818_v42, %v2819_v49 }
0x2ae6   :  { %v2821_v52 = vrot.slane %v2820_v50, 2 }
0x2ae8   :  { %v2822_v53 = vmax.f32 %v2820_v50, %v2821_v52 }
0x2aea   :  { %v2823_v54 = vrot.slane %v2822_v53, 1 }
0x2aec   :  { %v2824_v55 = vmax.f32 %v2822_v53, %v2823_v54 }
0x2aee   :  { %vm2825_vm0 = vcmp.eq.f32.partialorder %v2815_v46, %v2824_v55  ;;  %v2836_v28 = vadd.f32 %v2835_v56, %v2824_v55 }
0x2aef   :  { %v2826_v57 = vsel %vm2825_vm0, %v4721_v30, 8.0 }
0x2af0   :  { %v2827_v2 = vsel %vm1171_vm10, %v2826_v57, inf  ;;  %v2840_v0 = vrot.slane %v2836_v28, %v4723_v31 }
0x2af1   :  { %v2828_v6 = vrot.slane %v2827_v2, 4 }
0x2af2   :  { %v2841_v58 = vmul.f32 %v4696_v1, %v2840_v0 }
0x2af3   :  { %v2829_v51 = vmin.f32 %v2827_v2, %v2828_v6 }
0x2af4   :  { %3863 = vmatmul.mubr.msk.f32.vlgmr.msra.gmra.mrb[24].mxu1 %vm1171_vm10, %v2841_v58 }
0x2af5   :  { %v2830_v12 = vrot.slane %v2829_v51, 2  ;;  %3871 = vmatpush3.msra.mxu1 %v4136_v48  ;;  %3872 = vmatprep.mubr.msk.f32.mxu1 %vm4129_vm1, %v4130_v4 }
0x2af6   :  { %3880 = vmatprep.subr.mxu1 %v4130_v4 }
0x2af7   :  { %v2831_v59 = vmin.f32 %v2829_v51, %v2830_v12  ;;  %v3126_v12 = vld [vmem:[#allocation10 + $0x4] sm:$0x1] }
0x2af9   :  { %v2832_v60 = vrot.slane %v2831_v59, 1 }
0x2afb   :  { %v2833_v61 = vmin.f32 %v2831_v59, %v2832_v60 }
0x2afd   :  { %2834 = vst.msk [vmem:[#allocation11 + $0x1] sm:$0x1] %vm2736_vm15, %v2833_v61 }
0x2bc7   :  { %v2911_v62 = vpop.f32.mrb[24].mxu1 }
0x2bc8   :  { %v2912_v63 = vadd.f32 %v2911_v62, %v4716_v18  ;;  %v3864_v3 = vpop.f32.mrb[25].mxu1 }
0x2bca   :  { %v2915_v5 = vsel %vm1171_vm10, %v2912_v63, -inf }
0x2bcb   :  { %v2916_v7 = vrot.slane %v2915_v5, 4 }
0x2bcd   :  { %v2917_v47 = vmax.f32 %v2915_v5, %v2916_v7 }
0x2bcf   :  { %v2918_v9 = vrot.slane %v2917_v47, 2 }
0x2bd1   :  { %v2919_v10 = vmax.f32 %v2917_v47, %v2918_v9 }
0x2bd3   :  { %v2920_v11 = vrot.slane %v2919_v10, 1 }
0x2bd5   :  { %v2921_v13 = vmax.f32 %v2919_v10, %v2920_v11 }
0x2bd7   :  { %vm2922_vm2 = vcmp.eq.f32.partialorder %v2912_v63, %v2921_v13  ;;  %v2933_v16 = vadd.f32 %v2932_v15, %v2921_v13 }
0x2bd8   :  { %v2923_v17 = vsel %vm2922_vm2, %v4721_v30, 8.0 }
0x2bd9   :  { %v2924_v19 = vsel %vm1171_vm10, %v2923_v17, inf  ;;  %v2937_v20 = vrot.slane %v2933_v16, %v4723_v31 }
0x2bda   :  { %v2925_v21 = vrot.slane %v2924_v19, 4 }
0x2bdb   :  { %v2938_v22 = vmul.f32 %v4696_v1, %v2937_v20 }
0x2bdc   :  { %v2926_v23 = vmin.f32 %v2924_v19, %v2925_v21 }
0x2bdd   :  { %3868 = vmatmul.mubr.msk.f32.vlgmr.msra.gmra.mrb[30].mxu0 %vm1171_vm10, %v2938_v22 }
0x2bde   :  { %v2927_v24 = vrot.slane %v2926_v23, 2  ;;  %3876 = vmatpush3.msra.mxu0 %v4136_v48  ;;  %3877 = vmatprep.mubr.msk.f32.mxu0 %vm4129_vm1, %v4130_v4 }
0x2bdf   :  { %3885 = vmatprep.subr.mxu0 %v4130_v4 }
0x2be0   :  { %v2928_v25 = vmin.f32 %v2926_v23, %v2927_v24  ;;  %v3223_v23 = vld [vmem:[#allocation10 + $0x5] sm:$0x1] }
0x2be2   :  { %v2929_v26 = vrot.slane %v2928_v25, 1 }
0x2be4   :  { %v2930_v27 = vmin.f32 %v2928_v25, %v2929_v26 }
0x2be6   :  { %2931 = vst.msk [vmem:[#allocation11 + $0x2] sm:$0x1] %vm2736_vm15, %v2930_v27 }
0x2cb0   :  { %v3008_v29 = vpop.f32.mrb[30].mxu0 }
0x2cb1   :  { %v3009_v32 = vadd.f32 %v3008_v29, %v4716_v18  ;;  %v3869_v33 = vpop.f32.mrb[31].mxu0 }
0x2cb3   :  { %v3012_v34 = vsel %vm1171_vm10, %v3009_v32, -inf }
0x2cb4   :  { %v3013_v35 = vrot.slane %v3012_v34, 4 }
0x2cb6   :  { %v3014_v36 = vmax.f32 %v3012_v34, %v3013_v35 }
0x2cb8   :  { %v3015_v37 = vrot.slane %v3014_v36, 2 }
0x2cba   :  { %v3016_v39 = vmax.f32 %v3014_v36, %v3015_v37 }
0x2cbc   :  { %v3017_v8 = vrot.slane %v3016_v39, 1 }
0x2cbe   :  { %v3018_v38 = vmax.f32 %v3016_v39, %v3017_v8 }
0x2cc0   :  { %vm3019_vm3 = vcmp.eq.f32.partialorder %v3009_v32, %v3018_v38  ;;  %v3030_v41 = vadd.f32 %v3029_v40, %v3018_v38 }
0x2cc1   :  { %v3020_v43 = vsel %vm3019_vm3, %v4721_v30, 8.0 }
0x2cc2   :  { %v3021_v44 = vsel %vm1171_vm10, %v3020_v43, inf  ;;  %v3034_v14 = vrot.slane %v3030_v41, %v4723_v31 }
0x2cc3   :  { %v3022_v46 = vrot.slane %v3021_v44, 4 }
0x2cc4   :  { %v3035_v45 = vmul.f32 %v4696_v1, %v3034_v14 }
0x2cc5   :  { %v3023_v42 = vmin.f32 %v3021_v44, %v3022_v46 }
0x2cc6   :  { %3873 = vmatmul.mubr.msk.f32.vlgmr.msra.gmra.mrb[26].mxu1 %vm1171_vm10, %v3035_v45  ;;  %v3320_v45 = vld [vmem:[#allocation10 + $0x6] sm:$0x1] }
0x2cc7   :  { %v3024_v49 = vrot.slane %v3023_v42, 2  ;;  %3881 = vmatpush3.msra.mxu1 %v4136_v48  ;;  %3882 = vmatprep.mubr.msk.f32.mxu1 %vm4129_vm1, %v4130_v4 }
0x2cc9   :  { %v3025_v50 = vmin.f32 %v3023_v42, %v3024_v49 }
0x2ccb   :  { %v3026_v52 = vrot.slane %v3025_v50, 1 }
0x2ccd   :  { %v3027_v53 = vmin.f32 %v3025_v50, %v3026_v52 }
0x2ccf   :  { %3028 = vst.msk [vmem:[#allocation11 + $0x3] sm:$0x1] %vm2736_vm15, %v3027_v53 }
0x2d99   :  { %v3105_v54 = vpop.f32.mrb[26].mxu1 }
0x2d9a   :  { %v3106_v55 = vadd.f32 %v3105_v54, %v4716_v18  ;;  %v3874_v56 = vpop.f32.mrb[27].mxu1 }
0x2d9c   :  { %v3109_v28 = vsel %vm1171_vm10, %v3106_v55, -inf }
0x2d9d   :  { %v3110_v57 = vrot.slane %v3109_v28, 4 }
0x2d9f   :  { %v3111_v2 = vmax.f32 %v3109_v28, %v3110_v57 }
0x2da1   :  { %v3112_v0 = vrot.slane %v3111_v2, 2 }
0x2da3   :  { %v3113_v6 = vmax.f32 %v3111_v2, %v3112_v0 }
0x2da5   :  { %v3114_v58 = vrot.slane %v3113_v6, 1 }
0x2da7   :  { %v3115_v51 = vmax.f32 %v3113_v6, %v3114_v58 }
0x2da9   :  { %vm3116_vm4 = vcmp.eq.f32.partialorder %v3106_v55, %v3115_v51  ;;  %v3127_v59 = vadd.f32 %v3126_v12, %v3115_v51 }
0x2daa   :  { %v3117_v60 = vsel %vm3116_vm4, %v4721_v30, 8.0 }
0x2dab   :  { %v3118_v61 = vsel %vm1171_vm10, %v3117_v60, inf  ;;  %v3131_v62 = vrot.slane %v3127_v59, %v4723_v31 }
0x2dac   :  { %v3119_v63 = vrot.slane %v3118_v61, 4 }
0x2dad   :  { %v3132_v3 = vmul.f32 %v4696_v1, %v3131_v62  ;;  %v3417_v62 = vld [vmem:[#allocation10 + $0x7] sm:$0x1] }
0x2dae   :  { %v3120_v5 = vmin.f32 %v3118_v61, %v3119_v63 }
0x2daf   :  { %3878 = vmatmul.mubr.msk.f32.vlgmr.msra.gmra.mrb[32].mxu0 %vm1171_vm10, %v3132_v3 }
0x2db0   :  { %v3121_v7 = vrot.slane %v3120_v5, 2  ;;  %3886 = vmatpush3.msra.mxu0 %v4136_v48  ;;  %3887 = vmatprep.mubr.msk.f32.mxu0 %vm4129_vm1, %v4130_v4 }
0x2db2   :  { %v3122_v47 = vmin.f32 %v3120_v5, %v3121_v7 }
0x2db4   :  { %v3123_v9 = vrot.slane %v3122_v47, 1 }
0x2db6   :  { %v3124_v10 = vmin.f32 %v3122_v47, %v3123_v9 }
0x2db8   :  { %3125 = vst.msk [vmem:[#allocation11 + $0x4] sm:$0x1] %vm2736_vm15, %v3124_v10 }
0x2e82   :  { %v3202_v11 = vpop.f32.mrb[32].mxu0 }
0x2e83   :  { %v3203_v13 = vadd.f32 %v3202_v11, %v4716_v18  ;;  %v3879_v15 = vpop.f32.mrb[33].mxu0 }
0x2e85   :  { %v3206_v16 = vsel %vm1171_vm10, %v3203_v13, -inf }
0x2e86   :  { %v3207_v17 = vrot.slane %v3206_v16, 4 }
0x2e88   :  { %v3208_v19 = vmax.f32 %v3206_v16, %v3207_v17 }
0x2e8a   :  { %v3209_v20 = vrot.slane %v3208_v19, 2 }
0x2e8c   :  { %v3210_v21 = vmax.f32 %v3208_v19, %v3209_v20 }
0x2e8e   :  { %v3211_v22 = vrot.slane %v3210_v21, 1 }
0x2e90   :  { %v3212_v48 = vmax.f32 %v3210_v21, %v3211_v22 }
0x2e92   :  { %vm3213_vm5 = vcmp.eq.f32.partialorder %v3203_v13, %v3212_v48  ;;  %v3224_v4 = vadd.f32 %v3223_v23, %v3212_v48 }
0x2e93   :  { %v3214_v24 = vsel %vm3213_vm5, %v4721_v30, 8.0 }
0x2e94   :  { %v3215_v25 = vsel %vm1171_vm10, %v3214_v24, inf  ;;  %v3228_v26 = vrot.slane %v3224_v4, %v4723_v31 }
0x2e95   :  { %v3216_v27 = vrot.slane %v3215_v25, 4 }
0x2e96   :  { %v3229_v29 = vmul.f32 %v4696_v1, %v3228_v26 }
0x2e97   :  { %v3217_v32 = vmin.f32 %v3215_v25, %v3216_v27 }
0x2e98   :  { %3883 = vmatmul.mubr.msk.f32.vlgmr.msra.gmra.mrb[28].mxu1 %vm1171_vm10, %v3229_v29 }
0x2e99   :  { %v3218_v33 = vrot.slane %v3217_v32, 2 }
0x2e9b   :  { %v3219_v34 = vmin.f32 %v3217_v32, %v3218_v33 }
0x2e9d   :  { %v3220_v35 = vrot.slane %v3219_v34, 1 }
0x2e9f   :  { %v3221_v36 = vmin.f32 %v3219_v34, %v3220_v35 }
0x2ea1   :  { %3222 = vst.msk [vmem:[#allocation11 + $0x5] sm:$0x1] %vm2736_vm15, %v3221_v36 }
0x2f6b   :  { %v3299_v37 = vpop.f32.mrb[28].mxu1 }
0x2f6c   :  { %v3300_v39 = vadd.f32 %v3299_v37, %v4716_v18  ;;  %v3884_v8 = vpop.f32.mrb[29].mxu1 }
0x2f6e   :  { %v3303_v38 = vsel %vm1171_vm10, %v3300_v39, -inf }
0x2f6f   :  { %v3304_v40 = vrot.slane %v3303_v38, 4 }
0x2f71   :  { %v3305_v41 = vmax.f32 %v3303_v38, %v3304_v40 }
0x2f73   :  { %v3306_v43 = vrot.slane %v3305_v41, 2 }
0x2f75   :  { %v3307_v44 = vmax.f32 %v3305_v41, %v3306_v43 }
0x2f77   :  { %v3308_v14 = vrot.slane %v3307_v44, 1 }
0x2f79   :  { %v3309_v46 = vmax.f32 %v3307_v44, %v3308_v14 }
0x2f7b   :  { %vm3310_vm1 = vcmp.eq.f32.partialorder %v3300_v39, %v3309_v46  ;;  %v3321_v42 = vadd.f32 %v3320_v45, %v3309_v46 }
0x2f7c   :  { %v3311_v49 = vsel %vm3310_vm1, %v4721_v30, 8.0 }
0x2f7d   :  { %v3312_v50 = vsel %vm1171_vm10, %v3311_v49, inf  ;;  %v3325_v52 = vrot.slane %v3321_v42, %v4723_v31 }
0x2f7e   :  { %v3313_v53 = vrot.slane %v3312_v50, 4 }
0x2f7f   :  { %v3326_v54 = vmul.f32 %v4696_v1, %v3325_v52 }
0x2f80   :  { %v3314_v55 = vmin.f32 %v3312_v50, %v3313_v53 }
0x2f81   :  { %3888 = vmatmul.mubr.msk.f32.vlgmr.msra.gmra.mrb[34].mxu0 %vm1171_vm10, %v3326_v54 }
0x2f82   :  { %v3315_v56 = vrot.slane %v3314_v55, 2 }
0x2f84   :  { %v3316_v28 = vmin.f32 %v3314_v55, %v3315_v56 }
0x2f86   :  { %v3317_v57 = vrot.slane %v3316_v28, 1 }
0x2f88   :  { %v3318_v2 = vmin.f32 %v3316_v28, %v3317_v57 }
0x2f8a   :  { %3319 = vst.msk [vmem:[#allocation11 + $0x6] sm:$0x1] %vm2736_vm15, %v3318_v2 }
0x3054   :  { %v3396_v0 = vpop.f32.mrb[34].mxu0 }
0x3055   :  { %v3397_v6 = vadd.f32 %v3396_v0, %v4716_v18  ;;  %v3889_v58 = vpop.f32.mrb[35].mxu0 }
0x3057   :  { %v3400_v51 = vsel %vm1171_vm10, %v3397_v6, -inf }
0x3058   :  { %v3401_v12 = vrot.slane %v3400_v51, 4 }
0x305a   :  { %v3402_v31 = vmax.f32 %v3400_v51, %v3401_v12 }
0x305c   :  { %v3403_v59 = vrot.slane %v3402_v31, 2 }
0x305e   :  { %v3404_v60 = vmax.f32 %v3402_v31, %v3403_v59 }
0x3060   :  { %v3405_v1 = vrot.slane %v3404_v60, 1 }
0x3062   :  { %v3406_v61 = vmax.f32 %v3404_v60, %v3405_v1 }
0x3064   :  { %vm3407_vm6 = vcmp.eq.f32.partialorder %v3397_v6, %v3406_v61  ;;  %v3418_v63 = vadd.f32 %v3417_v62, %v3406_v61 }
0x3065   :  { %v3408_v3 = vsel %vm3407_vm6, %v4721_v30, 8.0 }
0x3066   :  { %v3409_v5 = vsel %vm1171_vm10, %v3408_v3, inf  ;;  %3419 = vst.msk [vmem:[%s4827_s18] sm:$0x1] %vm2736_vm15, %v3418_v63 }
0x3067   :  { %v3410_v18 = vrot.slane %v3409_v5, 4 }
0x3069   :  { %v3411_v7 = vmin.f32 %v3409_v5, %v3410_v18 }
0x306b   :  { %v3412_v47 = vrot.slane %v3411_v7, 2 }
0x306d   :  { %v3413_v9 = vmin.f32 %v3411_v7, %v3412_v47 }
0x306f   :  { %v3414_v10 = vrot.slane %v3413_v9, 1 }
0x3071   :  { %v3415_v11 = vmin.f32 %v3413_v9, %v3414_v10 }
0x3073   :  { %3416 = vst.msk [vmem:[#allocation11 + $0x7] sm:$0x1] %vm2736_vm15, %v3415_v11 }
0x307a   :  { %v3420_v13 = vld [vmem:[#allocation11] sm:$0xff] }
0x307b   :  { %v4002_v15 = vtrunc.f32 %v3420_v13 }
0x307d   :  { %v4003_v16 = vcvt.f32.s32 %v4002_v15 }
0x307f   :  { %3422 = vst.msk [vmem:[%s4828_s17] sm:$0xff] %vm1171_vm10, %v4003_v16 }

</bundles_post_ra>
